<compile_context>
chip_gen: v7x
topology: tpu7x:2x2x1
jax: 0.10.0
libtpu: 0.0.40
codegen_flags: <defaults>
</compile_context>

<pallas_src>
import numpy as np
import jax
import jax.numpy as jnp
from jax.experimental import pallas as pl
from jax.experimental.pallas import tpu as pltpu


# ---------------------------------------------------------------------------
# Pallas kernel: fused chain of convs over a flattened zero-padded canvas
# ---------------------------------------------------------------------------

def _tap_offsets(W, ksize):
    """Flat-canvas offsets of the conv taps (canvas row stride = W + 2)."""
    if ksize == 1:
        return [0]
    return [(dy - 1) * (W + 2) + (dx - 1) for dy in range(3) for dx in range(3)]


def make_conv_chain_kernel(H, W, chain, out_dtype):
    """Kernel computing a chain of convs (all at spatial size HxW) on one image.

    chain: list of {'ksize': 1 or 3, 'act': 'relu' or 'none'}.

    Operands (in order):
      x_ref    : (1, Cin0, Pi + 2*suffix[0])  bf16  padded canvas + halo
      mask_ref : (1,       Pi + 2*suffix[0])  f32   1.0 on interior pixels
      w_k, b_k : (Cout_k, taps_k*Cin_k) bf16 , (Cout_k, 1) f32 per conv k
      o_ref    : (1, Cout_{n-1}, Pi)          out_dtype
    where Pi = (H+2)*(W+2) and suffix[k] = sum of reaches of convs k..n-1
    (reach = W+3 for a 3x3 conv, 0 for a 1x1 conv).
    """
    n = len(chain)
    Pi = (H + 2) * (W + 2)
    reaches = [(W + 3) if c["ksize"] == 3 else 0 for c in chain]
    suffix = [sum(reaches[k:]) for k in range(n + 1)]
    all_offs = [_tap_offsets(W, c["ksize"]) for c in chain]

    def kernel(*refs):
        x_ref, mask_ref = refs[0], refs[1]
        w_refs = [refs[2 + 2 * k] for k in range(n)]
        b_refs = [refs[3 + 2 * k] for k in range(n)]
        o_ref = refs[2 + 2 * n]

        # f32 working copy; channel count is a multiple of 8 so the stacked-RHS
        # concatenation below is (8,128)-tile aligned.
        cur = x_ref[0].astype(jnp.float32)            # (Cin0, Pi + 2*suffix[0])
        for k in range(n):
            L = Pi + 2 * suffix[k + 1]                # output length of conv k
            offs = all_offs[k]
            if len(offs) == 1:                        # 1x1 conv
                rhs = cur
            else:                                     # 3x3: stack 9 shifted slices
                rhs = jnp.concatenate(
                    [cur[:, reaches[k] + off: reaches[k] + off + L]
                     for off in offs], axis=0)        # (9*Cin, L)
            y = jnp.dot(w_refs[k][...], rhs.astype(jnp.bfloat16),
                        preferred_element_type=jnp.float32)     # (Cout, L) f32
            y = y + b_refs[k][...]                    # (Cout, 1) lane-broadcast
            if chain[k]["act"] == "relu":
                y = jnp.maximum(y, 0.0)
            if k < n - 1:
                # Re-impose the zero padding ring / halo so the next conv reads
                # correct zeros at ring positions.
                mstart = suffix[0] - suffix[k + 1]
                cur = y * mask_ref[:, mstart:mstart + L]
            else:
                o_ref[0] = y.astype(out_dtype)

    return kernel


def conv_chain(x_canvas, mask, weights, biases, chain, H, W, out_dtype):
    """Run a fused conv chain as one pallas_call, gridded over the batch axis.

    x_canvas : (B, Cin0, Pi + 2*halo) bf16 ; returns (B, Cout, Pi) out_dtype.
    """
    B = x_canvas.shape[0]
    Pi = (H + 2) * (W + 2)
    cout = weights[-1].shape[0]
    kernel = make_conv_chain_kernel(H, W, chain, out_dtype)

    operands = [x_canvas, mask]
    in_specs = [pl.BlockSpec((1,) + tuple(x_canvas.shape[1:]),
                             lambda b: (b, 0, 0)),
                pl.BlockSpec(mask.shape, lambda b: (0, 0))]
    for w, b in zip(weights, biases):
        operands += [w, b]
        in_specs += [pl.BlockSpec(w.shape, lambda b: (0, 0)),
                     pl.BlockSpec(b.shape, lambda b: (0, 0))]

    flops = int(2 * sum(w.shape[0] * w.shape[1] for w in weights) * Pi * B)
    bytes_accessed = int(
        x_canvas.size * x_canvas.dtype.itemsize
        + mask.size * mask.dtype.itemsize
        + sum(w.size * w.dtype.itemsize + b.size * b.dtype.itemsize
              for w, b in zip(weights, biases))
        + B * cout * Pi * jnp.dtype(out_dtype).itemsize)

    return pl.pallas_call(
        kernel,
        out_shape=jax.ShapeDtypeStruct((B, cout, Pi), out_dtype),
        grid=(B,),
        in_specs=in_specs,
        out_specs=pl.BlockSpec((1, cout, Pi), lambda b: (b, 0, 0)),
        compiler_params=pltpu.CompilerParams(
            dimension_semantics=("parallel",),        # images independent; v7x 2xTC
            vmem_limit_bytes=64 * 1024 * 1024),
        cost_estimate=pl.CostEstimate(flops=flops, transcendentals=0,
                                      bytes_accessed=bytes_accessed),
    )(*operands)


# ---------------------------------------------------------------------------
# Plain-JAX glue: layout, pooling, upsampling (bf16 inter-block tensors)
# ---------------------------------------------------------------------------

def to_canvas(x, halo, cin_pad=None):
    """(B, C, H, W) -> (B, C', (H+2)*(W+2) + 2*halo) bf16 zero-padded canvas."""
    B, C, H, W = x.shape
    if cin_pad is not None and cin_pad > C:
        x = jnp.pad(x, ((0, 0), (0, cin_pad - C), (0, 0), (0, 0)))
        C = cin_pad
    xp = jnp.pad(x, ((0, 0), (0, 0), (1, 1), (1, 1)))
    flat = xp.reshape(B, C, (H + 2) * (W + 2))
    flat = jnp.pad(flat, ((0, 0), (0, 0), (halo, halo)))
    return flat.astype(jnp.bfloat16)


def from_canvas(y, H, W):
    """(B, C, (H+2)*(W+2)) -> (B, C, H, W) interior pixels."""
    B, C, _ = y.shape
    return y.reshape(B, C, H + 2, W + 2)[:, :, 1:H + 1, 1:W + 1]


def canvas_mask(H, W, halo):
    """(1, (H+2)*(W+2) + 2*halo) f32: 1.0 on interior canvas pixels, else 0."""
    m = np.zeros((H + 2, W + 2), np.float32)
    m[1:H + 1, 1:W + 1] = 1.0
    flat = np.pad(m.reshape(-1), (halo, halo))
    return jnp.asarray(flat[None, :])


def maxpool2(x):
    """2x2 / stride-2 max pool on (B, C, H, W)."""
    B, C, H, W = x.shape
    return jnp.max(x.reshape(B, C, H // 2, 2, W // 2, 2), axis=(3, 5))


def up2_matrix(n):
    """Bilinear x2 interpolation matrix, align_corners=True
    (matches torch.nn.UpsamplingBilinear2d(scale_factor=2))."""
    m = 2 * n
    U = np.zeros((m, n), dtype=np.float32)
    if n == 1:
        U[:, 0] = 1.0
        return U
    scale = (n - 1) / (m - 1)
    for o in range(m):
        src = o * scale
        i0 = int(np.floor(src))
        i1 = min(i0 + 1, n - 1)
        f = src - i0
        U[o, i0] += 1.0 - f
        U[o, i1] += f
    return U


def upsample2(x):
    """(B, C, H, W) -> (B, C, 2H, 2W), bilinear, align_corners=True."""
    B, C, H, W = x.shape
    Uh = jnp.asarray(up2_matrix(H))
    Uw = jnp.asarray(up2_matrix(W))
    return jnp.einsum("oh,pw,bchw->bcop", Uh, Uw, x)


# ---------------------------------------------------------------------------
# Parameters (deterministic, in-script); BN folded into conv weights/bias.
# 3x3 weights are stored pre-stacked as (Cout, 9*Cin_pad), tap-major /
# channel-minor, matching the in-kernel stacked-RHS row order.
# ---------------------------------------------------------------------------

def _pad8(c):
    return ((c + 7) // 8) * 8


def init_params(key, input_channels, num_layers, base_num):
    eps = 1e-5
    bn_scale = float(1.0 / np.sqrt(1.0 + eps))   # gamma=1, var=1, mean=0, beta=0
    keys = iter(jax.random.split(key, 16 * num_layers + 8))

    def rnd(shape):
        return 0.1 * jax.random.normal(next(keys), shape, jnp.float32)

    def conv3x3(cin, cout, with_bn):
        cin_p = _pad8(cin)
        w = rnd((cout, cin, 3, 3))               # torch OIHW layout
        b = rnd((cout,))
        s = bn_scale if with_bn else 1.0
        wp = jnp.pad(w, ((0, 0), (0, cin_p - cin), (0, 0), (0, 0)))
        wflat = jnp.transpose(wp, (0, 2, 3, 1)).reshape(cout, 9 * cin_p) * s
        bias = (b * s).reshape(cout, 1)
        return wflat.astype(jnp.bfloat16), bias.astype(jnp.float32)

    params = {"enc": [], "dec": []}
    cin = input_channels
    for i in range(num_layers):
        cout = base_num * 2 ** i
        params["enc"].append([conv3x3(cin, cout, True),
                              conv3x3(cout, cout, True)])
        cin = cout
    for i in range(num_layers - 1, 0, -1):
        c_in = base_num * 2 ** i
        c_out = base_num * 2 ** (i - 1)
        # DeconvBlock.upconv conv (bias, no BN, no act) + ConvBlock(c_in//2 -> c_out)
        params["dec"].append([conv3x3(c_in, c_in // 2, False),
                              conv3x3(c_in // 2, c_out, True),
                              conv3x3(c_out, c_out, True)])
    # final 1x1 head, bias=False (mode='normal')
    w_last = rnd((1, base_num))
    params["last"] = (w_last.astype(jnp.bfloat16), jnp.zeros((1, 1), jnp.float32))
    return params


# ---------------------------------------------------------------------------
# AE forward (encoder -> decoder -> 1x1 head), mode='normal'
# ---------------------------------------------------------------------------

def _chain_halo(chain, sw):
    return sum((sw + 3) if c["ksize"] == 3 else 0 for c in chain)


def ae_forward(x_nchw, params):
    num_layers = len(params["enc"])
    x = x_nchw                                          # (B, C, H, W)
    sh, sw = x.shape[2], x.shape[3]

    # ------------------------- encoder -------------------------
    for i in range(num_layers):
        (w0, b0), (w1, b1) = params["enc"][i]
        chain = [{"ksize": 3, "act": "relu"}, {"ksize": 3, "act": "relu"}]
        halo = _chain_halo(chain, sw)
        cin_pad = w0.shape[1] // 9
        y = conv_chain(to_canvas(x, halo, cin_pad), canvas_mask(sh, sw, halo),
                       [w0, w1], [b0, b1], chain, sh, sw, jnp.bfloat16)
        x = from_canvas(y, sh, sw)
        if i == 0 or i != num_layers - 1:               # ConvBlock max_pool flag
            x = maxpool2(x)
            sh, sw = sh // 2, sw // 2

    # ------------------------- decoder -------------------------
    for j in range(num_layers - 1):
        x = upsample2(x)                                # UpsamplingBilinear2d(x2)
        sh, sw = 2 * sh, 2 * sw
        weights = [wb[0] for wb in params["dec"][j]]
        biases = [wb[1] for wb in params["dec"][j]]
        chain = [{"ksize": 3, "act": "none"},           # DeconvBlock.upconv conv
                 {"ksize": 3, "act": "relu"},           # ConvBlock conv1 (+BN)
                 {"ksize": 3, "act": "relu"}]           # ConvBlock conv2 (+BN)
        out_dtype = jnp.bfloat16
        if j == num_layers - 2:
            # fuse the final 1x1 "last" conv into the last decoder block
            chain.append({"ksize": 1, "act": "none"})
            weights.append(params["last"][0])
            biases.append(params["last"][1])
            out_dtype = jnp.float32
        halo = _chain_halo(chain, sw)
        cin_pad = weights[0].shape[1] // 9
        y = conv_chain(to_canvas(x, halo, cin_pad), canvas_mask(sh, sw, halo),
                       weights, biases, chain, sh, sw, out_dtype)
        x = from_canvas(y, sh, sw)

    return x.astype(jnp.float32)                        # (B, 1, H, W)


# ---------------------------------------------------------------------------

if __name__ == "__main__":
    # AE(input_channels=4, num_layers=3, mode='normal', base_num=8)
    B, C_in, H, W = 2, 4, 16, 16
    num_layers, base_num = 3, 8

    key = jax.random.PRNGKey(0)
    kx, kp = jax.random.split(key)
    x = jax.random.normal(kx, (B, C_in, H, W), jnp.float32)
    params = init_params(kp, C_in, num_layers, base_num)

    fwd = jax.jit(lambda inp: ae_forward(inp, params))
    y = jax.block_until_ready(fwd(x))

    assert y.shape == (B, 1, H, W), y.shape
    assert bool(jnp.all(jnp.isfinite(y)))
    print("KERNEL_OK")
</pallas_src>

<mosaic_0001>
module attributes {stable_mosaic.version = 11 : i64} {
  func.func @kernel(%arg0: i32, %arg1: memref<1x8x400xbf16, #tpu.memory_space<vmem>>, %arg2: memref<1x400xf32, #tpu.memory_space<vmem>>, %arg3: memref<8x72xbf16, #tpu.memory_space<vmem>>, %arg4: memref<8x1xf32, #tpu.memory_space<vmem>>, %arg5: memref<8x72xbf16, #tpu.memory_space<vmem>>, %arg6: memref<8x1xf32, #tpu.memory_space<vmem>>, %arg7: memref<1x8x324xbf16, #tpu.memory_space<vmem>>) attributes {dimension_semantics = [#tpu.dimension_semantics<parallel>], iteration_bounds = array<i64: 2>, scalar_prefetch = 0 : i64, scratch_operands = 0 : i64, tpu.core_type = #tpu.core_type<tc>, window_params = [{transform_indices = @transform_0, window_bounds = array<i64: 1, 8, 400>}, {pipeline_mode = #tpu.pipeline_mode<synchronous>, transform_indices = @transform_1, window_bounds = array<i64: 1, 400>}, {pipeline_mode = #tpu.pipeline_mode<synchronous>, transform_indices = @transform_2, window_bounds = array<i64: 8, 72>}, {pipeline_mode = #tpu.pipeline_mode<synchronous>, transform_indices = @transform_3, window_bounds = array<i64: 8, 1>}, {pipeline_mode = #tpu.pipeline_mode<synchronous>, transform_indices = @transform_4, window_bounds = array<i64: 8, 72>}, {pipeline_mode = #tpu.pipeline_mode<synchronous>, transform_indices = @transform_5, window_bounds = array<i64: 8, 1>}, {transform_indices = @transform_6, window_bounds = array<i64: 1, 8, 324>}]} {
    %c0 = arith.constant 0 : index
    %c0_0 = arith.constant 0 : index
    %c0_1 = arith.constant 0 : index
    %0 = vector.load %arg1[%c0, %c0_0, %c0_1] : memref<1x8x400xbf16, #tpu.memory_space<vmem>>, vector<1x8x400xbf16>
    %1 = vector.shape_cast %0 : vector<1x8x400xbf16> to vector<8x400xbf16>
    %2 = arith.extf %1 : vector<8x400xbf16> to vector<8x400xf32>
    %3 = vector.extract_strided_slice %2 {offsets = [0, 0], sizes = [8, 362], strides = [1, 1]} : vector<8x400xf32> to vector<8x362xf32>
    %4 = vector.extract_strided_slice %2 {offsets = [0, 1], sizes = [8, 362], strides = [1, 1]} : vector<8x400xf32> to vector<8x362xf32>
    %5 = vector.extract_strided_slice %2 {offsets = [0, 2], sizes = [8, 362], strides = [1, 1]} : vector<8x400xf32> to vector<8x362xf32>
    %6 = vector.extract_strided_slice %2 {offsets = [0, 18], sizes = [8, 362], strides = [1, 1]} : vector<8x400xf32> to vector<8x362xf32>
    %7 = vector.extract_strided_slice %2 {offsets = [0, 19], sizes = [8, 362], strides = [1, 1]} : vector<8x400xf32> to vector<8x362xf32>
    %8 = vector.extract_strided_slice %2 {offsets = [0, 20], sizes = [8, 362], strides = [1, 1]} : vector<8x400xf32> to vector<8x362xf32>
    %9 = vector.extract_strided_slice %2 {offsets = [0, 36], sizes = [8, 362], strides = [1, 1]} : vector<8x400xf32> to vector<8x362xf32>
    %10 = vector.extract_strided_slice %2 {offsets = [0, 37], sizes = [8, 362], strides = [1, 1]} : vector<8x400xf32> to vector<8x362xf32>
    %11 = vector.extract_strided_slice %2 {offsets = [0, 38], sizes = [8, 362], strides = [1, 1]} : vector<8x400xf32> to vector<8x362xf32>
    %12 = tpu.concatenate %3, %4, %5, %6, %7, %8, %9, %10, %11 in 0 : vector<8x362xf32>, vector<8x362xf32>, vector<8x362xf32>, vector<8x362xf32>, vector<8x362xf32>, vector<8x362xf32>, vector<8x362xf32>, vector<8x362xf32>, vector<8x362xf32> -> vector<72x362xf32>
    %c0_2 = arith.constant 0 : index
    %c0_3 = arith.constant 0 : index
    %13 = vector.load %arg3[%c0_2, %c0_3] : memref<8x72xbf16, #tpu.memory_space<vmem>>, vector<8x72xbf16>
    %14 = arith.truncf %12 : vector<72x362xf32> to vector<72x362xbf16>
    %cst = arith.constant dense<0.000000e+00> : vector<8x362xf32>
    %15 = tpu.matmul %13, %14, %cst {dimension_numbers = #tpu.dot_dimension_numbers<[1], [0], [0], [1], [0, 0, 1, 1], [], []>} : vector<8x72xbf16>, vector<72x362xbf16>, vector<8x362xf32> -> vector<8x362xf32>
    %c0_4 = arith.constant 0 : index
    %c0_5 = arith.constant 0 : index
    %16 = vector.load %arg4[%c0_4, %c0_5] : memref<8x1xf32, #tpu.memory_space<vmem>>, vector<8x1xf32>
    %17 = vector.broadcast %16 : vector<8x1xf32> to vector<8x362xf32>
    %18 = arith.addf %15, %17 : vector<8x362xf32>
    %cst_6 = arith.constant 0.000000e+00 : f32
    %19 = vector.broadcast %cst_6 : f32 to vector<8x362xf32>
    %20 = arith.maximumf %18, %19 : vector<8x362xf32>
    %c0_7 = arith.constant 0 : index
    %c19 = arith.constant 19 : index
    %21 = vector.load %arg2[%c0_7, %c19] : memref<1x400xf32, #tpu.memory_space<vmem>>, vector<1x362xf32>
    %22 = vector.broadcast %21 : vector<1x362xf32> to vector<8x362xf32>
    %23 = arith.mulf %20, %22 : vector<8x362xf32>
    %24 = vector.extract_strided_slice %23 {offsets = [0, 0], sizes = [8, 324], strides = [1, 1]} : vector<8x362xf32> to vector<8x324xf32>
    %25 = vector.extract_strided_slice %23 {offsets = [0, 1], sizes = [8, 324], strides = [1, 1]} : vector<8x362xf32> to vector<8x324xf32>
    %26 = vector.extract_strided_slice %23 {offsets = [0, 2], sizes = [8, 324], strides = [1, 1]} : vector<8x362xf32> to vector<8x324xf32>
    %27 = vector.extract_strided_slice %23 {offsets = [0, 18], sizes = [8, 324], strides = [1, 1]} : vector<8x362xf32> to vector<8x324xf32>
    %28 = vector.extract_strided_slice %23 {offsets = [0, 19], sizes = [8, 324], strides = [1, 1]} : vector<8x362xf32> to vector<8x324xf32>
    %29 = vector.extract_strided_slice %23 {offsets = [0, 20], sizes = [8, 324], strides = [1, 1]} : vector<8x362xf32> to vector<8x324xf32>
    %30 = vector.extract_strided_slice %23 {offsets = [0, 36], sizes = [8, 324], strides = [1, 1]} : vector<8x362xf32> to vector<8x324xf32>
    %31 = vector.extract_strided_slice %23 {offsets = [0, 37], sizes = [8, 324], strides = [1, 1]} : vector<8x362xf32> to vector<8x324xf32>
    %32 = vector.extract_strided_slice %23 {offsets = [0, 38], sizes = [8, 324], strides = [1, 1]} : vector<8x362xf32> to vector<8x324xf32>
    %33 = tpu.concatenate %24, %25, %26, %27, %28, %29, %30, %31, %32 in 0 : vector<8x324xf32>, vector<8x324xf32>, vector<8x324xf32>, vector<8x324xf32>, vector<8x324xf32>, vector<8x324xf32>, vector<8x324xf32>, vector<8x324xf32>, vector<8x324xf32> -> vector<72x324xf32>
    %c0_8 = arith.constant 0 : index
    %c0_9 = arith.constant 0 : index
    %34 = vector.load %arg5[%c0_8, %c0_9] : memref<8x72xbf16, #tpu.memory_space<vmem>>, vector<8x72xbf16>
    %35 = arith.truncf %33 : vector<72x324xf32> to vector<72x324xbf16>
    %cst_10 = arith.constant dense<0.000000e+00> : vector<8x324xf32>
    %36 = tpu.matmul %34, %35, %cst_10 {dimension_numbers = #tpu.dot_dimension_numbers<[1], [0], [0], [1], [0, 0, 1, 1], [], []>} : vector<8x72xbf16>, vector<72x324xbf16>, vector<8x324xf32> -> vector<8x324xf32>
    %c0_11 = arith.constant 0 : index
    %c0_12 = arith.constant 0 : index
    %37 = vector.load %arg6[%c0_11, %c0_12] : memref<8x1xf32, #tpu.memory_space<vmem>>, vector<8x1xf32>
    %38 = vector.broadcast %37 : vector<8x1xf32> to vector<8x324xf32>
    %39 = arith.addf %36, %38 : vector<8x324xf32>
    %cst_13 = arith.constant 0.000000e+00 : f32
    %40 = vector.broadcast %cst_13 : f32 to vector<8x324xf32>
    %41 = arith.maximumf %39, %40 : vector<8x324xf32>
    %42 = arith.truncf %41 : vector<8x324xf32> to vector<8x324xbf16>
    %c0_14 = arith.constant 0 : index
    %c0_15 = arith.constant 0 : index
    %c0_16 = arith.constant 0 : index
    %43 = vector.load %arg7[%c0_14, %c0_15, %c0_16] : memref<1x8x324xbf16, #tpu.memory_space<vmem>>, vector<1x8x324xbf16>
    %44 = vector.shape_cast %43 : vector<1x8x324xbf16> to vector<8x324xbf16>
    %45 = vector.shape_cast %42 : vector<8x324xbf16> to vector<1x8x324xbf16>
    tpu.vector_store %arg7[%c0_14, %c0_15, %c0_16], %45 {strides = array<i32>} : memref<1x8x324xbf16, #tpu.memory_space<vmem>>, vector<1x8x324xbf16>,
    return
  }
  func.func @transform_0(%arg0: i32) -> (i32, i32, i32) {
    %c0_i32 = arith.constant 0 : i32
    %c0_i32_0 = arith.constant 0 : i32
    %c0_i32_1 = arith.constant 0 : i32
    return %arg0, %c0_i32, %c0_i32_0 : i32, i32, i32
  }
  func.func @transform_1(%arg0: i32) -> (i32, i32) {
    %c0_i32 = arith.constant 0 : i32
    %c0_i32_0 = arith.constant 0 : i32
    %c0_i32_1 = arith.constant 0 : i32
    return %c0_i32, %c0_i32_0 : i32, i32
  }
  func.func @transform_2(%arg0: i32) -> (i32, i32) {
    %c0_i32 = arith.constant 0 : i32
    %c0_i32_0 = arith.constant 0 : i32
    %c0_i32_1 = arith.constant 0 : i32
    return %c0_i32, %c0_i32_0 : i32, i32
  }
  func.func @transform_3(%arg0: i32) -> (i32, i32) {
    %c0_i32 = arith.constant 0 : i32
    %c0_i32_0 = arith.constant 0 : i32
    %c0_i32_1 = arith.constant 0 : i32
    return %c0_i32, %c0_i32_0 : i32, i32
  }
  func.func @transform_4(%arg0: i32) -> (i32, i32) {
    %c0_i32 = arith.constant 0 : i32
    %c0_i32_0 = arith.constant 0 : i32
    %c0_i32_1 = arith.constant 0 : i32
    return %c0_i32, %c0_i32_0 : i32, i32
  }
  func.func @transform_5(%arg0: i32) -> (i32, i32) {
    %c0_i32 = arith.constant 0 : i32
    %c0_i32_0 = arith.constant 0 : i32
    %c0_i32_1 = arith.constant 0 : i32
    return %c0_i32, %c0_i32_0 : i32, i32
  }
  func.func @transform_6(%arg0: i32) -> (i32, i32, i32) {
    %c0_i32 = arith.constant 0 : i32
    %c0_i32_0 = arith.constant 0 : i32
    %c0_i32_1 = arith.constant 0 : i32
    return %arg0, %c0_i32, %c0_i32_0 : i32, i32, i32
  }
}

module attributes {stable_mosaic.version = 11 : i64} {
  func.func @kernel(%arg0: i32, %arg1: memref<1x8x144xbf16, #tpu.memory_space<vmem>>, %arg2: memref<1x144xf32, #tpu.memory_space<vmem>>, %arg3: memref<16x72xbf16, #tpu.memory_space<vmem>>, %arg4: memref<16x1xf32, #tpu.memory_space<vmem>>, %arg5: memref<16x144xbf16, #tpu.memory_space<vmem>>, %arg6: memref<16x1xf32, #tpu.memory_space<vmem>>, %arg7: memref<1x16x100xbf16, #tpu.memory_space<vmem>>) attributes {dimension_semantics = [#tpu.dimension_semantics<parallel>], iteration_bounds = array<i64: 2>, scalar_prefetch = 0 : i64, scratch_operands = 0 : i64, tpu.core_type = #tpu.core_type<tc>, window_params = [{transform_indices = @transform_0, window_bounds = array<i64: 1, 8, 144>}, {pipeline_mode = #tpu.pipeline_mode<synchronous>, transform_indices = @transform_1, window_bounds = array<i64: 1, 144>}, {pipeline_mode = #tpu.pipeline_mode<synchronous>, transform_indices = @transform_2, window_bounds = array<i64: 16, 72>}, {pipeline_mode = #tpu.pipeline_mode<synchronous>, transform_indices = @transform_3, window_bounds = array<i64: 16, 1>}, {pipeline_mode = #tpu.pipeline_mode<synchronous>, transform_indices = @transform_4, window_bounds = array<i64: 16, 144>}, {pipeline_mode = #tpu.pipeline_mode<synchronous>, transform_indices = @transform_5, window_bounds = array<i64: 16, 1>}, {transform_indices = @transform_6, window_bounds = array<i64: 1, 16, 100>}]} {
    %c0 = arith.constant 0 : index
    %c0_0 = arith.constant 0 : index
    %c0_1 = arith.constant 0 : index
    %0 = vector.load %arg1[%c0, %c0_0, %c0_1] : memref<1x8x144xbf16, #tpu.memory_space<vmem>>, vector<1x8x144xbf16>
    %1 = vector.shape_cast %0 : vector<1x8x144xbf16> to vector<8x144xbf16>
    %2 = arith.extf %1 : vector<8x144xbf16> to vector<8x144xf32>
    %3 = vector.extract_strided_slice %2 {offsets = [0, 0], sizes = [8, 122], strides = [1, 1]} : vector<8x144xf32> to vector<8x122xf32>
    %4 = vector.extract_strided_slice %2 {offsets = [0, 1], sizes = [8, 122], strides = [1, 1]} : vector<8x144xf32> to vector<8x122xf32>
    %5 = vector.extract_strided_slice %2 {offsets = [0, 2], sizes = [8, 122], strides = [1, 1]} : vector<8x144xf32> to vector<8x122xf32>
    %6 = vector.extract_strided_slice %2 {offsets = [0, 10], sizes = [8, 122], strides = [1, 1]} : vector<8x144xf32> to vector<8x122xf32>
    %7 = vector.extract_strided_slice %2 {offsets = [0, 11], sizes = [8, 122], strides = [1, 1]} : vector<8x144xf32> to vector<8x122xf32>
    %8 = vector.extract_strided_slice %2 {offsets = [0, 12], sizes = [8, 122], strides = [1, 1]} : vector<8x144xf32> to vector<8x122xf32>
    %9 = vector.extract_strided_slice %2 {offsets = [0, 20], sizes = [8, 122], strides = [1, 1]} : vector<8x144xf32> to vector<8x122xf32>
    %10 = vector.extract_strided_slice %2 {offsets = [0, 21], sizes = [8, 122], strides = [1, 1]} : vector<8x144xf32> to vector<8x122xf32>
    %11 = vector.extract_strided_slice %2 {offsets = [0, 22], sizes = [8, 122], strides = [1, 1]} : vector<8x144xf32> to vector<8x122xf32>
    %12 = tpu.concatenate %3, %4, %5, %6, %7, %8, %9, %10, %11 in 0 : vector<8x122xf32>, vector<8x122xf32>, vector<8x122xf32>, vector<8x122xf32>, vector<8x122xf32>, vector<8x122xf32>, vector<8x122xf32>, vector<8x122xf32>, vector<8x122xf32> -> vector<72x122xf32>
    %c0_2 = arith.constant 0 : index
    %c0_3 = arith.constant 0 : index
    %13 = vector.load %arg3[%c0_2, %c0_3] : memref<16x72xbf16, #tpu.memory_space<vmem>>, vector<16x72xbf16>
    %14 = arith.truncf %12 : vector<72x122xf32> to vector<72x122xbf16>
    %cst = arith.constant dense<0.000000e+00> : vector<16x122xf32>
    %15 = tpu.matmul %13, %14, %cst {dimension_numbers = #tpu.dot_dimension_numbers<[1], [0], [0], [1], [0, 0, 1, 1], [], []>} : vector<16x72xbf16>, vector<72x122xbf16>, vector<16x122xf32> -> vector<16x122xf32>
    %c0_4 = arith.constant 0 : index
    %c0_5 = arith.constant 0 : index
    %16 = vector.load %arg4[%c0_4, %c0_5] : memref<16x1xf32, #tpu.memory_space<vmem>>, vector<16x1xf32>
    %17 = vector.broadcast %16 : vector<16x1xf32> to vector<16x122xf32>
    %18 = arith.addf %15, %17 : vector<16x122xf32>
    %cst_6 = arith.constant 0.000000e+00 : f32
    %19 = vector.broadcast %cst_6 : f32 to vector<16x122xf32>
    %20 = arith.maximumf %18, %19 : vector<16x122xf32>
    %c0_7 = arith.constant 0 : index
    %c11 = arith.constant 11 : index
    %21 = vector.load %arg2[%c0_7, %c11] : memref<1x144xf32, #tpu.memory_space<vmem>>, vector<1x122xf32>
    %22 = vector.broadcast %21 : vector<1x122xf32> to vector<16x122xf32>
    %23 = arith.mulf %20, %22 : vector<16x122xf32>
    %24 = vector.extract_strided_slice %23 {offsets = [0, 0], sizes = [16, 100], strides = [1, 1]} : vector<16x122xf32> to vector<16x100xf32>
    %25 = vector.extract_strided_slice %23 {offsets = [0, 1], sizes = [16, 100], strides = [1, 1]} : vector<16x122xf32> to vector<16x100xf32>
    %26 = vector.extract_strided_slice %23 {offsets = [0, 2], sizes = [16, 100], strides = [1, 1]} : vector<16x122xf32> to vector<16x100xf32>
    %27 = vector.extract_strided_slice %23 {offsets = [0, 10], sizes = [16, 100], strides = [1, 1]} : vector<16x122xf32> to vector<16x100xf32>
    %28 = vector.extract_strided_slice %23 {offsets = [0, 11], sizes = [16, 100], strides = [1, 1]} : vector<16x122xf32> to vector<16x100xf32>
    %29 = vector.extract_strided_slice %23 {offsets = [0, 12], sizes = [16, 100], strides = [1, 1]} : vector<16x122xf32> to vector<16x100xf32>
    %30 = vector.extract_strided_slice %23 {offsets = [0, 20], sizes = [16, 100], strides = [1, 1]} : vector<16x122xf32> to vector<16x100xf32>
    %31 = vector.extract_strided_slice %23 {offsets = [0, 21], sizes = [16, 100], strides = [1, 1]} : vector<16x122xf32> to vector<16x100xf32>
    %32 = vector.extract_strided_slice %23 {offsets = [0, 22], sizes = [16, 100], strides = [1, 1]} : vector<16x122xf32> to vector<16x100xf32>
    %33 = tpu.concatenate %24, %25, %26, %27, %28, %29, %30, %31, %32 in 0 : vector<16x100xf32>, vector<16x100xf32>, vector<16x100xf32>, vector<16x100xf32>, vector<16x100xf32>, vector<16x100xf32>, vector<16x100xf32>, vector<16x100xf32>, vector<16x100xf32> -> vector<144x100xf32>
    %c0_8 = arith.constant 0 : index
    %c0_9 = arith.constant 0 : index
    %34 = vector.load %arg5[%c0_8, %c0_9] : memref<16x144xbf16, #tpu.memory_space<vmem>>, vector<16x144xbf16>
    %35 = arith.truncf %33 : vector<144x100xf32> to vector<144x100xbf16>
    %cst_10 = arith.constant dense<0.000000e+00> : vector<16x100xf32>
    %36 = tpu.matmul %34, %35, %cst_10 {dimension_numbers = #tpu.dot_dimension_numbers<[1], [0], [0], [1], [0, 0, 1, 1], [], []>} : vector<16x144xbf16>, vector<144x100xbf16>, vector<16x100xf32> -> vector<16x100xf32>
    %c0_11 = arith.constant 0 : index
    %c0_12 = arith.constant 0 : index
    %37 = vector.load %arg6[%c0_11, %c0_12] : memref<16x1xf32, #tpu.memory_space<vmem>>, vector<16x1xf32>
    %38 = vector.broadcast %37 : vector<16x1xf32> to vector<16x100xf32>
    %39 = arith.addf %36, %38 : vector<16x100xf32>
    %cst_13 = arith.constant 0.000000e+00 : f32
    %40 = vector.broadcast %cst_13 : f32 to vector<16x100xf32>
    %41 = arith.maximumf %39, %40 : vector<16x100xf32>
    %42 = arith.truncf %41 : vector<16x100xf32> to vector<16x100xbf16>
    %c0_14 = arith.constant 0 : index
    %c0_15 = arith.constant 0 : index
    %c0_16 = arith.constant 0 : index
    %43 = vector.load %arg7[%c0_14, %c0_15, %c0_16] : memref<1x16x100xbf16, #tpu.memory_space<vmem>>, vector<1x16x100xbf16>
    %44 = vector.shape_cast %43 : vector<1x16x100xbf16> to vector<16x100xbf16>
    %45 = vector.shape_cast %42 : vector<16x100xbf16> to vector<1x16x100xbf16>
    tpu.vector_store %arg7[%c0_14, %c0_15, %c0_16], %45 {strides = array<i32>} : memref<1x16x100xbf16, #tpu.memory_space<vmem>>, vector<1x16x100xbf16>,
    return
  }
  func.func @transform_0(%arg0: i32) -> (i32, i32, i32) {
    %c0_i32 = arith.constant 0 : i32
    %c0_i32_0 = arith.constant 0 : i32
    %c0_i32_1 = arith.constant 0 : i32
    return %arg0, %c0_i32, %c0_i32_0 : i32, i32, i32
  }
  func.func @transform_1(%arg0: i32) -> (i32, i32) {
    %c0_i32 = arith.constant 0 : i32
    %c0_i32_0 = arith.constant 0 : i32
    %c0_i32_1 = arith.constant 0 : i32
    return %c0_i32, %c0_i32_0 : i32, i32
  }
  func.func @transform_2(%arg0: i32) -> (i32, i32) {
    %c0_i32 = arith.constant 0 : i32
    %c0_i32_0 = arith.constant 0 : i32
    %c0_i32_1 = arith.constant 0 : i32
    return %c0_i32, %c0_i32_0 : i32, i32
  }
  func.func @transform_3(%arg0: i32) -> (i32, i32) {
    %c0_i32 = arith.constant 0 : i32
    %c0_i32_0 = arith.constant 0 : i32
    %c0_i32_1 = arith.constant 0 : i32
    return %c0_i32, %c0_i32_0 : i32, i32
  }
  func.func @transform_4(%arg0: i32) -> (i32, i32) {
    %c0_i32 = arith.constant 0 : i32
    %c0_i32_0 = arith.constant 0 : i32
    %c0_i32_1 = arith.constant 0 : i32
    return %c0_i32, %c0_i32_0 : i32, i32
  }
  func.func @transform_5(%arg0: i32) -> (i32, i32) {
    %c0_i32 = arith.constant 0 : i32
    %c0_i32_0 = arith.constant 0 : i32
    %c0_i32_1 = arith.constant 0 : i32
    return %c0_i32, %c0_i32_0 : i32, i32
  }
  func.func @transform_6(%arg0: i32) -> (i32, i32, i32) {
    %c0_i32 = arith.constant 0 : i32
    %c0_i32_0 = arith.constant 0 : i32
    %c0_i32_1 = arith.constant 0 : i32
    return %arg0, %c0_i32, %c0_i32_0 : i32, i32, i32
  }
}

module attributes {stable_mosaic.version = 11 : i64} {
  func.func @kernel(%arg0: i32, %arg1: memref<1x16x64xbf16, #tpu.memory_space<vmem>>, %arg2: memref<1x64xf32, #tpu.memory_space<vmem>>, %arg3: memref<32x144xbf16, #tpu.memory_space<vmem>>, %arg4: memref<32x1xf32, #tpu.memory_space<vmem>>, %arg5: memref<32x288xbf16, #tpu.memory_space<vmem>>, %arg6: memref<32x1xf32, #tpu.memory_space<vmem>>, %arg7: memref<1x32x36xbf16, #tpu.memory_space<vmem>>) attributes {dimension_semantics = [#tpu.dimension_semantics<parallel>], iteration_bounds = array<i64: 2>, scalar_prefetch = 0 : i64, scratch_operands = 0 : i64, tpu.core_type = #tpu.core_type<tc>, window_params = [{transform_indices = @transform_0, window_bounds = array<i64: 1, 16, 64>}, {pipeline_mode = #tpu.pipeline_mode<synchronous>, transform_indices = @transform_1, window_bounds = array<i64: 1, 64>}, {pipeline_mode = #tpu.pipeline_mode<synchronous>, transform_indices = @transform_2, window_bounds = array<i64: 32, 144>}, {pipeline_mode = #tpu.pipeline_mode<synchronous>, transform_indices = @transform_3, window_bounds = array<i64: 32, 1>}, {pipeline_mode = #tpu.pipeline_mode<synchronous>, transform_indices = @transform_4, window_bounds = array<i64: 32, 288>}, {pipeline_mode = #tpu.pipeline_mode<synchronous>, transform_indices = @transform_5, window_bounds = array<i64: 32, 1>}, {transform_indices = @transform_6, window_bounds = array<i64: 1, 32, 36>}]} {
    %c0 = arith.constant 0 : index
    %c0_0 = arith.constant 0 : index
    %c0_1 = arith.constant 0 : index
    %0 = vector.load %arg1[%c0, %c0_0, %c0_1] : memref<1x16x64xbf16, #tpu.memory_space<vmem>>, vector<1x16x64xbf16>
    %1 = vector.shape_cast %0 : vector<1x16x64xbf16> to vector<16x64xbf16>
    %2 = arith.extf %1 : vector<16x64xbf16> to vector<16x64xf32>
    %3 = vector.extract_strided_slice %2 {offsets = [0, 0], sizes = [16, 50], strides = [1, 1]} : vector<16x64xf32> to vector<16x50xf32>
    %4 = vector.extract_strided_slice %2 {offsets = [0, 1], sizes = [16, 50], strides = [1, 1]} : vector<16x64xf32> to vector<16x50xf32>
    %5 = vector.extract_strided_slice %2 {offsets = [0, 2], sizes = [16, 50], strides = [1, 1]} : vector<16x64xf32> to vector<16x50xf32>
    %6 = vector.extract_strided_slice %2 {offsets = [0, 6], sizes = [16, 50], strides = [1, 1]} : vector<16x64xf32> to vector<16x50xf32>
    %7 = vector.extract_strided_slice %2 {offsets = [0, 7], sizes = [16, 50], strides = [1, 1]} : vector<16x64xf32> to vector<16x50xf32>
    %8 = vector.extract_strided_slice %2 {offsets = [0, 8], sizes = [16, 50], strides = [1, 1]} : vector<16x64xf32> to vector<16x50xf32>
    %9 = vector.extract_strided_slice %2 {offsets = [0, 12], sizes = [16, 50], strides = [1, 1]} : vector<16x64xf32> to vector<16x50xf32>
    %10 = vector.extract_strided_slice %2 {offsets = [0, 13], sizes = [16, 50], strides = [1, 1]} : vector<16x64xf32> to vector<16x50xf32>
    %11 = vector.extract_strided_slice %2 {offsets = [0, 14], sizes = [16, 50], strides = [1, 1]} : vector<16x64xf32> to vector<16x50xf32>
    %12 = tpu.concatenate %3, %4, %5, %6, %7, %8, %9, %10, %11 in 0 : vector<16x50xf32>, vector<16x50xf32>, vector<16x50xf32>, vector<16x50xf32>, vector<16x50xf32>, vector<16x50xf32>, vector<16x50xf32>, vector<16x50xf32>, vector<16x50xf32> -> vector<144x50xf32>
    %c0_2 = arith.constant 0 : index
    %c0_3 = arith.constant 0 : index
    %13 = vector.load %arg3[%c0_2, %c0_3] : memref<32x144xbf16, #tpu.memory_space<vmem>>, vector<32x144xbf16>
    %14 = arith.truncf %12 : vector<144x50xf32> to vector<144x50xbf16>
    %cst = arith.constant dense<0.000000e+00> : vector<32x50xf32>
    %15 = tpu.matmul %13, %14, %cst {dimension_numbers = #tpu.dot_dimension_numbers<[1], [0], [0], [1], [0, 0, 1, 1], [], []>} : vector<32x144xbf16>, vector<144x50xbf16>, vector<32x50xf32> -> vector<32x50xf32>
    %c0_4 = arith.constant 0 : index
    %c0_5 = arith.constant 0 : index
    %16 = vector.load %arg4[%c0_4, %c0_5] : memref<32x1xf32, #tpu.memory_space<vmem>>, vector<32x1xf32>
    %17 = vector.broadcast %16 : vector<32x1xf32> to vector<32x50xf32>
    %18 = arith.addf %15, %17 : vector<32x50xf32>
    %cst_6 = arith.constant 0.000000e+00 : f32
    %19 = vector.broadcast %cst_6 : f32 to vector<32x50xf32>
    %20 = arith.maximumf %18, %19 : vector<32x50xf32>
    %c0_7 = arith.constant 0 : index
    %c7 = arith.constant 7 : index
    %21 = vector.load %arg2[%c0_7, %c7] : memref<1x64xf32, #tpu.memory_space<vmem>>, vector<1x50xf32>
    %22 = vector.broadcast %21 : vector<1x50xf32> to vector<32x50xf32>
    %23 = arith.mulf %20, %22 : vector<32x50xf32>
    %24 = vector.extract_strided_slice %23 {offsets = [0, 0], sizes = [32, 36], strides = [1, 1]} : vector<32x50xf32> to vector<32x36xf32>
    %25 = vector.extract_strided_slice %23 {offsets = [0, 1], sizes = [32, 36], strides = [1, 1]} : vector<32x50xf32> to vector<32x36xf32>
    %26 = vector.extract_strided_slice %23 {offsets = [0, 2], sizes = [32, 36], strides = [1, 1]} : vector<32x50xf32> to vector<32x36xf32>
    %27 = vector.extract_strided_slice %23 {offsets = [0, 6], sizes = [32, 36], strides = [1, 1]} : vector<32x50xf32> to vector<32x36xf32>
    %28 = vector.extract_strided_slice %23 {offsets = [0, 7], sizes = [32, 36], strides = [1, 1]} : vector<32x50xf32> to vector<32x36xf32>
    %29 = vector.extract_strided_slice %23 {offsets = [0, 8], sizes = [32, 36], strides = [1, 1]} : vector<32x50xf32> to vector<32x36xf32>
    %30 = vector.extract_strided_slice %23 {offsets = [0, 12], sizes = [32, 36], strides = [1, 1]} : vector<32x50xf32> to vector<32x36xf32>
    %31 = vector.extract_strided_slice %23 {offsets = [0, 13], sizes = [32, 36], strides = [1, 1]} : vector<32x50xf32> to vector<32x36xf32>
    %32 = vector.extract_strided_slice %23 {offsets = [0, 14], sizes = [32, 36], strides = [1, 1]} : vector<32x50xf32> to vector<32x36xf32>
    %33 = tpu.concatenate %24, %25, %26, %27, %28, %29, %30, %31, %32 in 0 : vector<32x36xf32>, vector<32x36xf32>, vector<32x36xf32>, vector<32x36xf32>, vector<32x36xf32>, vector<32x36xf32>, vector<32x36xf32>, vector<32x36xf32>, vector<32x36xf32> -> vector<288x36xf32>
    %c0_8 = arith.constant 0 : index
    %c0_9 = arith.constant 0 : index
    %34 = vector.load %arg5[%c0_8, %c0_9] : memref<32x288xbf16, #tpu.memory_space<vmem>>, vector<32x288xbf16>
    %35 = arith.truncf %33 : vector<288x36xf32> to vector<288x36xbf16>
    %cst_10 = arith.constant dense<0.000000e+00> : vector<32x36xf32>
    %36 = tpu.matmul %34, %35, %cst_10 {dimension_numbers = #tpu.dot_dimension_numbers<[1], [0], [0], [1], [0, 0, 1, 1], [], []>} : vector<32x288xbf16>, vector<288x36xbf16>, vector<32x36xf32> -> vector<32x36xf32>
    %c0_11 = arith.constant 0 : index
    %c0_12 = arith.constant 0 : index
    %37 = vector.load %arg6[%c0_11, %c0_12] : memref<32x1xf32, #tpu.memory_space<vmem>>, vector<32x1xf32>
    %38 = vector.broadcast %37 : vector<32x1xf32> to vector<32x36xf32>
    %39 = arith.addf %36, %38 : vector<32x36xf32>
    %cst_13 = arith.constant 0.000000e+00 : f32
    %40 = vector.broadcast %cst_13 : f32 to vector<32x36xf32>
    %41 = arith.maximumf %39, %40 : vector<32x36xf32>
    %42 = arith.truncf %41 : vector<32x36xf32> to vector<32x36xbf16>
    %c0_14 = arith.constant 0 : index
    %c0_15 = arith.constant 0 : index
    %c0_16 = arith.constant 0 : index
    %43 = vector.load %arg7[%c0_14, %c0_15, %c0_16] : memref<1x32x36xbf16, #tpu.memory_space<vmem>>, vector<1x32x36xbf16>
    %44 = vector.shape_cast %43 : vector<1x32x36xbf16> to vector<32x36xbf16>
    %45 = vector.shape_cast %42 : vector<32x36xbf16> to vector<1x32x36xbf16>
    tpu.vector_store %arg7[%c0_14, %c0_15, %c0_16], %45 {strides = array<i32>} : memref<1x32x36xbf16, #tpu.memory_space<vmem>>, vector<1x32x36xbf16>,
    return
  }
  func.func @transform_0(%arg0: i32) -> (i32, i32, i32) {
    %c0_i32 = arith.constant 0 : i32
    %c0_i32_0 = arith.constant 0 : i32
    %c0_i32_1 = arith.constant 0 : i32
    return %arg0, %c0_i32, %c0_i32_0 : i32, i32, i32
  }
  func.func @transform_1(%arg0: i32) -> (i32, i32) {
    %c0_i32 = arith.constant 0 : i32
    %c0_i32_0 = arith.constant 0 : i32
    %c0_i32_1 = arith.constant 0 : i32
    return %c0_i32, %c0_i32_0 : i32, i32
  }
  func.func @transform_2(%arg0: i32) -> (i32, i32) {
    %c0_i32 = arith.constant 0 : i32
    %c0_i32_0 = arith.constant 0 : i32
    %c0_i32_1 = arith.constant 0 : i32
    return %c0_i32, %c0_i32_0 : i32, i32
  }
  func.func @transform_3(%arg0: i32) -> (i32, i32) {
    %c0_i32 = arith.constant 0 : i32
    %c0_i32_0 = arith.constant 0 : i32
    %c0_i32_1 = arith.constant 0 : i32
    return %c0_i32, %c0_i32_0 : i32, i32
  }
  func.func @transform_4(%arg0: i32) -> (i32, i32) {
    %c0_i32 = arith.constant 0 : i32
    %c0_i32_0 = arith.constant 0 : i32
    %c0_i32_1 = arith.constant 0 : i32
    return %c0_i32, %c0_i32_0 : i32, i32
  }
  func.func @transform_5(%arg0: i32) -> (i32, i32) {
    %c0_i32 = arith.constant 0 : i32
    %c0_i32_0 = arith.constant 0 : i32
    %c0_i32_1 = arith.constant 0 : i32
    return %c0_i32, %c0_i32_0 : i32, i32
  }
  func.func @transform_6(%arg0: i32) -> (i32, i32, i32) {
    %c0_i32 = arith.constant 0 : i32
    %c0_i32_0 = arith.constant 0 : i32
    %c0_i32_1 = arith.constant 0 : i32
    return %arg0, %c0_i32, %c0_i32_0 : i32, i32, i32
  }
}

module attributes {stable_mosaic.version = 11 : i64} {
  func.func @kernel(%arg0: i32, %arg1: memref<1x32x166xbf16, #tpu.memory_space<vmem>>, %arg2: memref<1x166xf32, #tpu.memory_space<vmem>>, %arg3: memref<16x288xbf16, #tpu.memory_space<vmem>>, %arg4: memref<16x1xf32, #tpu.memory_space<vmem>>, %arg5: memref<16x144xbf16, #tpu.memory_space<vmem>>, %arg6: memref<16x1xf32, #tpu.memory_space<vmem>>, %arg7: memref<16x144xbf16, #tpu.memory_space<vmem>>, %arg8: memref<16x1xf32, #tpu.memory_space<vmem>>, %arg9: memref<1x16x100xbf16, #tpu.memory_space<vmem>>) attributes {dimension_semantics = [#tpu.dimension_semantics<parallel>], iteration_bounds = array<i64: 2>, scalar_prefetch = 0 : i64, scratch_operands = 0 : i64, tpu.core_type = #tpu.core_type<tc>, window_params = [{transform_indices = @transform_0, window_bounds = array<i64: 1, 32, 166>}, {pipeline_mode = #tpu.pipeline_mode<synchronous>, transform_indices = @transform_1, window_bounds = array<i64: 1, 166>}, {pipeline_mode = #tpu.pipeline_mode<synchronous>, transform_indices = @transform_2, window_bounds = array<i64: 16, 288>}, {pipeline_mode = #tpu.pipeline_mode<synchronous>, transform_indices = @transform_3, window_bounds = array<i64: 16, 1>}, {pipeline_mode = #tpu.pipeline_mode<synchronous>, transform_indices = @transform_4, window_bounds = array<i64: 16, 144>}, {pipeline_mode = #tpu.pipeline_mode<synchronous>, transform_indices = @transform_5, window_bounds = array<i64: 16, 1>}, {pipeline_mode = #tpu.pipeline_mode<synchronous>, transform_indices = @transform_6, window_bounds = array<i64: 16, 144>}, {pipeline_mode = #tpu.pipeline_mode<synchronous>, transform_indices = @transform_7, window_bounds = array<i64: 16, 1>}, {transform_indices = @transform_8, window_bounds = array<i64: 1, 16, 100>}]} {
    %c0 = arith.constant 0 : index
    %c0_0 = arith.constant 0 : index
    %c0_1 = arith.constant 0 : index
    %0 = vector.load %arg1[%c0, %c0_0, %c0_1] : memref<1x32x166xbf16, #tpu.memory_space<vmem>>, vector<1x32x166xbf16>
    %1 = vector.shape_cast %0 : vector<1x32x166xbf16> to vector<32x166xbf16>
    %2 = arith.extf %1 : vector<32x166xbf16> to vector<32x166xf32>
    %3 = vector.extract_strided_slice %2 {offsets = [0, 0], sizes = [32, 144], strides = [1, 1]} : vector<32x166xf32> to vector<32x144xf32>
    %4 = vector.extract_strided_slice %2 {offsets = [0, 1], sizes = [32, 144], strides = [1, 1]} : vector<32x166xf32> to vector<32x144xf32>
    %5 = vector.extract_strided_slice %2 {offsets = [0, 2], sizes = [32, 144], strides = [1, 1]} : vector<32x166xf32> to vector<32x144xf32>
    %6 = vector.extract_strided_slice %2 {offsets = [0, 10], sizes = [32, 144], strides = [1, 1]} : vector<32x166xf32> to vector<32x144xf32>
    %7 = vector.extract_strided_slice %2 {offsets = [0, 11], sizes = [32, 144], strides = [1, 1]} : vector<32x166xf32> to vector<32x144xf32>
    %8 = vector.extract_strided_slice %2 {offsets = [0, 12], sizes = [32, 144], strides = [1, 1]} : vector<32x166xf32> to vector<32x144xf32>
    %9 = vector.extract_strided_slice %2 {offsets = [0, 20], sizes = [32, 144], strides = [1, 1]} : vector<32x166xf32> to vector<32x144xf32>
    %10 = vector.extract_strided_slice %2 {offsets = [0, 21], sizes = [32, 144], strides = [1, 1]} : vector<32x166xf32> to vector<32x144xf32>
    %11 = vector.extract_strided_slice %2 {offsets = [0, 22], sizes = [32, 144], strides = [1, 1]} : vector<32x166xf32> to vector<32x144xf32>
    %12 = tpu.concatenate %3, %4, %5, %6, %7, %8, %9, %10, %11 in 0 : vector<32x144xf32>, vector<32x144xf32>, vector<32x144xf32>, vector<32x144xf32>, vector<32x144xf32>, vector<32x144xf32>, vector<32x144xf32>, vector<32x144xf32>, vector<32x144xf32> -> vector<288x144xf32>
    %c0_2 = arith.constant 0 : index
    %c0_3 = arith.constant 0 : index
    %13 = vector.load %arg3[%c0_2, %c0_3] : memref<16x288xbf16, #tpu.memory_space<vmem>>, vector<16x288xbf16>
    %14 = arith.truncf %12 : vector<288x144xf32> to vector<288x144xbf16>
    %cst = arith.constant dense<0.000000e+00> : vector<16x144xf32>
    %15 = tpu.matmul %13, %14, %cst {dimension_numbers = #tpu.dot_dimension_numbers<[1], [0], [0], [1], [0, 0, 1, 1], [], []>} : vector<16x288xbf16>, vector<288x144xbf16>, vector<16x144xf32> -> vector<16x144xf32>
    %c0_4 = arith.constant 0 : index
    %c0_5 = arith.constant 0 : index
    %16 = vector.load %arg4[%c0_4, %c0_5] : memref<16x1xf32, #tpu.memory_space<vmem>>, vector<16x1xf32>
    %17 = vector.broadcast %16 : vector<16x1xf32> to vector<16x144xf32>
    %18 = arith.addf %15, %17 : vector<16x144xf32>
    %c0_6 = arith.constant 0 : index
    %c11 = arith.constant 11 : index
    %19 = vector.load %arg2[%c0_6, %c11] : memref<1x166xf32, #tpu.memory_space<vmem>>, vector<1x144xf32>
    %20 = vector.broadcast %19 : vector<1x144xf32> to vector<16x144xf32>
    %21 = arith.mulf %18, %20 : vector<16x144xf32>
    %22 = vector.extract_strided_slice %21 {offsets = [0, 0], sizes = [16, 122], strides = [1, 1]} : vector<16x144xf32> to vector<16x122xf32>
    %23 = vector.extract_strided_slice %21 {offsets = [0, 1], sizes = [16, 122], strides = [1, 1]} : vector<16x144xf32> to vector<16x122xf32>
    %24 = vector.extract_strided_slice %21 {offsets = [0, 2], sizes = [16, 122], strides = [1, 1]} : vector<16x144xf32> to vector<16x122xf32>
    %25 = vector.extract_strided_slice %21 {offsets = [0, 10], sizes = [16, 122], strides = [1, 1]} : vector<16x144xf32> to vector<16x122xf32>
    %26 = vector.extract_strided_slice %21 {offsets = [0, 11], sizes = [16, 122], strides = [1, 1]} : vector<16x144xf32> to vector<16x122xf32>
    %27 = vector.extract_strided_slice %21 {offsets = [0, 12], sizes = [16, 122], strides = [1, 1]} : vector<16x144xf32> to vector<16x122xf32>
    %28 = vector.extract_strided_slice %21 {offsets = [0, 20], sizes = [16, 122], strides = [1, 1]} : vector<16x144xf32> to vector<16x122xf32>
    %29 = vector.extract_strided_slice %21 {offsets = [0, 21], sizes = [16, 122], strides = [1, 1]} : vector<16x144xf32> to vector<16x122xf32>
    %30 = vector.extract_strided_slice %21 {offsets = [0, 22], sizes = [16, 122], strides = [1, 1]} : vector<16x144xf32> to vector<16x122xf32>
    %31 = tpu.concatenate %22, %23, %24, %25, %26, %27, %28, %29, %30 in 0 : vector<16x122xf32>, vector<16x122xf32>, vector<16x122xf32>, vector<16x122xf32>, vector<16x122xf32>, vector<16x122xf32>, vector<16x122xf32>, vector<16x122xf32>, vector<16x122xf32> -> vector<144x122xf32>
    %c0_7 = arith.constant 0 : index
    %c0_8 = arith.constant 0 : index
    %32 = vector.load %arg5[%c0_7, %c0_8] : memref<16x144xbf16, #tpu.memory_space<vmem>>, vector<16x144xbf16>
    %33 = arith.truncf %31 : vector<144x122xf32> to vector<144x122xbf16>
    %cst_9 = arith.constant dense<0.000000e+00> : vector<16x122xf32>
    %34 = tpu.matmul %32, %33, %cst_9 {dimension_numbers = #tpu.dot_dimension_numbers<[1], [0], [0], [1], [0, 0, 1, 1], [], []>} : vector<16x144xbf16>, vector<144x122xbf16>, vector<16x122xf32> -> vector<16x122xf32>
    %c0_10 = arith.constant 0 : index
    %c0_11 = arith.constant 0 : index
    %35 = vector.load %arg6[%c0_10, %c0_11] : memref<16x1xf32, #tpu.memory_space<vmem>>, vector<16x1xf32>
    %36 = vector.broadcast %35 : vector<16x1xf32> to vector<16x122xf32>
    %37 = arith.addf %34, %36 : vector<16x122xf32>
    %cst_12 = arith.constant 0.000000e+00 : f32
    %38 = vector.broadcast %cst_12 : f32 to vector<16x122xf32>
    %39 = arith.maximumf %37, %38 : vector<16x122xf32>
    %c0_13 = arith.constant 0 : index
    %c22 = arith.constant 22 : index
    %40 = vector.load %arg2[%c0_13, %c22] : memref<1x166xf32, #tpu.memory_space<vmem>>, vector<1x122xf32>
    %41 = vector.broadcast %40 : vector<1x122xf32> to vector<16x122xf32>
    %42 = arith.mulf %39, %41 : vector<16x122xf32>
    %43 = vector.extract_strided_slice %42 {offsets = [0, 0], sizes = [16, 100], strides = [1, 1]} : vector<16x122xf32> to vector<16x100xf32>
    %44 = vector.extract_strided_slice %42 {offsets = [0, 1], sizes = [16, 100], strides = [1, 1]} : vector<16x122xf32> to vector<16x100xf32>
    %45 = vector.extract_strided_slice %42 {offsets = [0, 2], sizes = [16, 100], strides = [1, 1]} : vector<16x122xf32> to vector<16x100xf32>
    %46 = vector.extract_strided_slice %42 {offsets = [0, 10], sizes = [16, 100], strides = [1, 1]} : vector<16x122xf32> to vector<16x100xf32>
    %47 = vector.extract_strided_slice %42 {offsets = [0, 11], sizes = [16, 100], strides = [1, 1]} : vector<16x122xf32> to vector<16x100xf32>
    %48 = vector.extract_strided_slice %42 {offsets = [0, 12], sizes = [16, 100], strides = [1, 1]} : vector<16x122xf32> to vector<16x100xf32>
    %49 = vector.extract_strided_slice %42 {offsets = [0, 20], sizes = [16, 100], strides = [1, 1]} : vector<16x122xf32> to vector<16x100xf32>
    %50 = vector.extract_strided_slice %42 {offsets = [0, 21], sizes = [16, 100], strides = [1, 1]} : vector<16x122xf32> to vector<16x100xf32>
    %51 = vector.extract_strided_slice %42 {offsets = [0, 22], sizes = [16, 100], strides = [1, 1]} : vector<16x122xf32> to vector<16x100xf32>
    %52 = tpu.concatenate %43, %44, %45, %46, %47, %48, %49, %50, %51 in 0 : vector<16x100xf32>, vector<16x100xf32>, vector<16x100xf32>, vector<16x100xf32>, vector<16x100xf32>, vector<16x100xf32>, vector<16x100xf32>, vector<16x100xf32>, vector<16x100xf32> -> vector<144x100xf32>
    %c0_14 = arith.constant 0 : index
    %c0_15 = arith.constant 0 : index
    %53 = vector.load %arg7[%c0_14, %c0_15] : memref<16x144xbf16, #tpu.memory_space<vmem>>, vector<16x144xbf16>
    %54 = arith.truncf %52 : vector<144x100xf32> to vector<144x100xbf16>
    %cst_16 = arith.constant dense<0.000000e+00> : vector<16x100xf32>
    %55 = tpu.matmul %53, %54, %cst_16 {dimension_numbers = #tpu.dot_dimension_numbers<[1], [0], [0], [1], [0, 0, 1, 1], [], []>} : vector<16x144xbf16>, vector<144x100xbf16>, vector<16x100xf32> -> vector<16x100xf32>
    %c0_17 = arith.constant 0 : index
    %c0_18 = arith.constant 0 : index
    %56 = vector.load %arg8[%c0_17, %c0_18] : memref<16x1xf32, #tpu.memory_space<vmem>>, vector<16x1xf32>
    %57 = vector.broadcast %56 : vector<16x1xf32> to vector<16x100xf32>
    %58 = arith.addf %55, %57 : vector<16x100xf32>
    %cst_19 = arith.constant 0.000000e+00 : f32
    %59 = vector.broadcast %cst_19 : f32 to vector<16x100xf32>
    %60 = arith.maximumf %58, %59 : vector<16x100xf32>
    %61 = arith.truncf %60 : vector<16x100xf32> to vector<16x100xbf16>
    %c0_20 = arith.constant 0 : index
    %c0_21 = arith.constant 0 : index
    %c0_22 = arith.constant 0 : index
    %62 = vector.load %arg9[%c0_20, %c0_21, %c0_22] : memref<1x16x100xbf16, #tpu.memory_space<vmem>>, vector<1x16x100xbf16>
    %63 = vector.shape_cast %62 : vector<1x16x100xbf16> to vector<16x100xbf16>
    %64 = vector.shape_cast %61 : vector<16x100xbf16> to vector<1x16x100xbf16>
    tpu.vector_store %arg9[%c0_20, %c0_21, %c0_22], %64 {strides = array<i32>} : memref<1x16x100xbf16, #tpu.memory_space<vmem>>, vector<1x16x100xbf16>,
    return
  }
  func.func @transform_0(%arg0: i32) -> (i32, i32, i32) {
    %c0_i32 = arith.constant 0 : i32
    %c0_i32_0 = arith.constant 0 : i32
    %c0_i32_1 = arith.constant 0 : i32
    return %arg0, %c0_i32, %c0_i32_0 : i32, i32, i32
  }
  func.func @transform_1(%arg0: i32) -> (i32, i32) {
    %c0_i32 = arith.constant 0 : i32
    %c0_i32_0 = arith.constant 0 : i32
    %c0_i32_1 = arith.constant 0 : i32
    return %c0_i32, %c0_i32_0 : i32, i32
  }
  func.func @transform_2(%arg0: i32) -> (i32, i32) {
    %c0_i32 = arith.constant 0 : i32
    %c0_i32_0 = arith.constant 0 : i32
    %c0_i32_1 = arith.constant 0 : i32
    return %c0_i32, %c0_i32_0 : i32, i32
  }
  func.func @transform_3(%arg0: i32) -> (i32, i32) {
    %c0_i32 = arith.constant 0 : i32
    %c0_i32_0 = arith.constant 0 : i32
    %c0_i32_1 = arith.constant 0 : i32
    return %c0_i32, %c0_i32_0 : i32, i32
  }
  func.func @transform_4(%arg0: i32) -> (i32, i32) {
    %c0_i32 = arith.constant 0 : i32
    %c0_i32_0 = arith.constant 0 : i32
    %c0_i32_1 = arith.constant 0 : i32
    return %c0_i32, %c0_i32_0 : i32, i32
  }
  func.func @transform_5(%arg0: i32) -> (i32, i32) {
    %c0_i32 = arith.constant 0 : i32
    %c0_i32_0 = arith.constant 0 : i32
    %c0_i32_1 = arith.constant 0 : i32
    return %c0_i32, %c0_i32_0 : i32, i32
  }
  func.func @transform_6(%arg0: i32) -> (i32, i32) {
    %c0_i32 = arith.constant 0 : i32
    %c0_i32_0 = arith.constant 0 : i32
    %c0_i32_1 = arith.constant 0 : i32
    return %c0_i32, %c0_i32_0 : i32, i32
  }
  func.func @transform_7(%arg0: i32) -> (i32, i32) {
    %c0_i32 = arith.constant 0 : i32
    %c0_i32_0 = arith.constant 0 : i32
    %c0_i32_1 = arith.constant 0 : i32
    return %c0_i32, %c0_i32_0 : i32, i32
  }
  func.func @transform_8(%arg0: i32) -> (i32, i32, i32) {
    %c0_i32 = arith.constant 0 : i32
    %c0_i32_0 = arith.constant 0 : i32
    %c0_i32_1 = arith.constant 0 : i32
    return %arg0, %c0_i32, %c0_i32_0 : i32, i32, i32
  }
}

module attributes {stable_mosaic.version = 11 : i64} {
  func.func @kernel(%arg0: i32, %arg1: memref<1x16x438xbf16, #tpu.memory_space<vmem>>, %arg2: memref<1x438xf32, #tpu.memory_space<vmem>>, %arg3: memref<8x144xbf16, #tpu.memory_space<vmem>>, %arg4: memref<8x1xf32, #tpu.memory_space<vmem>>, %arg5: memref<8x72xbf16, #tpu.memory_space<vmem>>, %arg6: memref<8x1xf32, #tpu.memory_space<vmem>>, %arg7: memref<8x72xbf16, #tpu.memory_space<vmem>>, %arg8: memref<8x1xf32, #tpu.memory_space<vmem>>, %arg9: memref<1x8xbf16, #tpu.memory_space<vmem>>, %arg10: memref<1x1xf32, #tpu.memory_space<vmem>>, %arg11: memref<1x1x324xf32, #tpu.memory_space<vmem>>) attributes {dimension_semantics = [#tpu.dimension_semantics<parallel>], iteration_bounds = array<i64: 2>, scalar_prefetch = 0 : i64, scratch_operands = 0 : i64, tpu.core_type = #tpu.core_type<tc>, window_params = [{transform_indices = @transform_0, window_bounds = array<i64: 1, 16, 438>}, {pipeline_mode = #tpu.pipeline_mode<synchronous>, transform_indices = @transform_1, window_bounds = array<i64: 1, 438>}, {pipeline_mode = #tpu.pipeline_mode<synchronous>, transform_indices = @transform_2, window_bounds = array<i64: 8, 144>}, {pipeline_mode = #tpu.pipeline_mode<synchronous>, transform_indices = @transform_3, window_bounds = array<i64: 8, 1>}, {pipeline_mode = #tpu.pipeline_mode<synchronous>, transform_indices = @transform_4, window_bounds = array<i64: 8, 72>}, {pipeline_mode = #tpu.pipeline_mode<synchronous>, transform_indices = @transform_5, window_bounds = array<i64: 8, 1>}, {pipeline_mode = #tpu.pipeline_mode<synchronous>, transform_indices = @transform_6, window_bounds = array<i64: 8, 72>}, {pipeline_mode = #tpu.pipeline_mode<synchronous>, transform_indices = @transform_7, window_bounds = array<i64: 8, 1>}, {pipeline_mode = #tpu.pipeline_mode<synchronous>, transform_indices = @transform_8, window_bounds = array<i64: 1, 8>}, {pipeline_mode = #tpu.pipeline_mode<synchronous>, transform_indices = @transform_9, window_bounds = array<i64: 1, 1>}, {transform_indices = @transform_10, window_bounds = array<i64: 1, 1, 324>}]} {
    %c0 = arith.constant 0 : index
    %c0_0 = arith.constant 0 : index
    %c0_1 = arith.constant 0 : index
    %0 = vector.load %arg1[%c0, %c0_0, %c0_1] : memref<1x16x438xbf16, #tpu.memory_space<vmem>>, vector<1x16x438xbf16>
    %1 = vector.shape_cast %0 : vector<1x16x438xbf16> to vector<16x438xbf16>
    %2 = arith.extf %1 : vector<16x438xbf16> to vector<16x438xf32>
    %3 = vector.extract_strided_slice %2 {offsets = [0, 0], sizes = [16, 400], strides = [1, 1]} : vector<16x438xf32> to vector<16x400xf32>
    %4 = vector.extract_strided_slice %2 {offsets = [0, 1], sizes = [16, 400], strides = [1, 1]} : vector<16x438xf32> to vector<16x400xf32>
    %5 = vector.extract_strided_slice %2 {offsets = [0, 2], sizes = [16, 400], strides = [1, 1]} : vector<16x438xf32> to vector<16x400xf32>
    %6 = vector.extract_strided_slice %2 {offsets = [0, 18], sizes = [16, 400], strides = [1, 1]} : vector<16x438xf32> to vector<16x400xf32>
    %7 = vector.extract_strided_slice %2 {offsets = [0, 19], sizes = [16, 400], strides = [1, 1]} : vector<16x438xf32> to vector<16x400xf32>
    %8 = vector.extract_strided_slice %2 {offsets = [0, 20], sizes = [16, 400], strides = [1, 1]} : vector<16x438xf32> to vector<16x400xf32>
    %9 = vector.extract_strided_slice %2 {offsets = [0, 36], sizes = [16, 400], strides = [1, 1]} : vector<16x438xf32> to vector<16x400xf32>
    %10 = vector.extract_strided_slice %2 {offsets = [0, 37], sizes = [16, 400], strides = [1, 1]} : vector<16x438xf32> to vector<16x400xf32>
    %11 = vector.extract_strided_slice %2 {offsets = [0, 38], sizes = [16, 400], strides = [1, 1]} : vector<16x438xf32> to vector<16x400xf32>
    %12 = tpu.concatenate %3, %4, %5, %6, %7, %8, %9, %10, %11 in 0 : vector<16x400xf32>, vector<16x400xf32>, vector<16x400xf32>, vector<16x400xf32>, vector<16x400xf32>, vector<16x400xf32>, vector<16x400xf32>, vector<16x400xf32>, vector<16x400xf32> -> vector<144x400xf32>
    %c0_2 = arith.constant 0 : index
    %c0_3 = arith.constant 0 : index
    %13 = vector.load %arg3[%c0_2, %c0_3] : memref<8x144xbf16, #tpu.memory_space<vmem>>, vector<8x144xbf16>
    %14 = arith.truncf %12 : vector<144x400xf32> to vector<144x400xbf16>
    %cst = arith.constant dense<0.000000e+00> : vector<8x400xf32>
    %15 = tpu.matmul %13, %14, %cst {dimension_numbers = #tpu.dot_dimension_numbers<[1], [0], [0], [1], [0, 0, 1, 1], [], []>} : vector<8x144xbf16>, vector<144x400xbf16>, vector<8x400xf32> -> vector<8x400xf32>
    %c0_4 = arith.constant 0 : index
    %c0_5 = arith.constant 0 : index
    %16 = vector.load %arg4[%c0_4, %c0_5] : memref<8x1xf32, #tpu.memory_space<vmem>>, vector<8x1xf32>
    %17 = vector.broadcast %16 : vector<8x1xf32> to vector<8x400xf32>
    %18 = arith.addf %15, %17 : vector<8x400xf32>
    %c0_6 = arith.constant 0 : index
    %c19 = arith.constant 19 : index
    %19 = vector.load %arg2[%c0_6, %c19] : memref<1x438xf32, #tpu.memory_space<vmem>>, vector<1x400xf32>
    %20 = vector.broadcast %19 : vector<1x400xf32> to vector<8x400xf32>
    %21 = arith.mulf %18, %20 : vector<8x400xf32>
    %22 = vector.extract_strided_slice %21 {offsets = [0, 0], sizes = [8, 362], strides = [1, 1]} : vector<8x400xf32> to vector<8x362xf32>
    %23 = vector.extract_strided_slice %21 {offsets = [0, 1], sizes = [8, 362], strides = [1, 1]} : vector<8x400xf32> to vector<8x362xf32>
    %24 = vector.extract_strided_slice %21 {offsets = [0, 2], sizes = [8, 362], strides = [1, 1]} : vector<8x400xf32> to vector<8x362xf32>
    %25 = vector.extract_strided_slice %21 {offsets = [0, 18], sizes = [8, 362], strides = [1, 1]} : vector<8x400xf32> to vector<8x362xf32>
    %26 = vector.extract_strided_slice %21 {offsets = [0, 19], sizes = [8, 362], strides = [1, 1]} : vector<8x400xf32> to vector<8x362xf32>
    %27 = vector.extract_strided_slice %21 {offsets = [0, 20], sizes = [8, 362], strides = [1, 1]} : vector<8x400xf32> to vector<8x362xf32>
    %28 = vector.extract_strided_slice %21 {offsets = [0, 36], sizes = [8, 362], strides = [1, 1]} : vector<8x400xf32> to vector<8x362xf32>
    %29 = vector.extract_strided_slice %21 {offsets = [0, 37], sizes = [8, 362], strides = [1, 1]} : vector<8x400xf32> to vector<8x362xf32>
    %30 = vector.extract_strided_slice %21 {offsets = [0, 38], sizes = [8, 362], strides = [1, 1]} : vector<8x400xf32> to vector<8x362xf32>
    %31 = tpu.concatenate %22, %23, %24, %25, %26, %27, %28, %29, %30 in 0 : vector<8x362xf32>, vector<8x362xf32>, vector<8x362xf32>, vector<8x362xf32>, vector<8x362xf32>, vector<8x362xf32>, vector<8x362xf32>, vector<8x362xf32>, vector<8x362xf32> -> vector<72x362xf32>
    %c0_7 = arith.constant 0 : index
    %c0_8 = arith.constant 0 : index
    %32 = vector.load %arg5[%c0_7, %c0_8] : memref<8x72xbf16, #tpu.memory_space<vmem>>, vector<8x72xbf16>
    %33 = arith.truncf %31 : vector<72x362xf32> to vector<72x362xbf16>
    %cst_9 = arith.constant dense<0.000000e+00> : vector<8x362xf32>
    %34 = tpu.matmul %32, %33, %cst_9 {dimension_numbers = #tpu.dot_dimension_numbers<[1], [0], [0], [1], [0, 0, 1, 1], [], []>} : vector<8x72xbf16>, vector<72x362xbf16>, vector<8x362xf32> -> vector<8x362xf32>
    %c0_10 = arith.constant 0 : index
    %c0_11 = arith.constant 0 : index
    %35 = vector.load %arg6[%c0_10, %c0_11] : memref<8x1xf32, #tpu.memory_space<vmem>>, vector<8x1xf32>
    %36 = vector.broadcast %35 : vector<8x1xf32> to vector<8x362xf32>
    %37 = arith.addf %34, %36 : vector<8x362xf32>
    %cst_12 = arith.constant 0.000000e+00 : f32
    %38 = vector.broadcast %cst_12 : f32 to vector<8x362xf32>
    %39 = arith.maximumf %37, %38 : vector<8x362xf32>
    %c0_13 = arith.constant 0 : index
    %c38 = arith.constant 38 : index
    %40 = vector.load %arg2[%c0_13, %c38] : memref<1x438xf32, #tpu.memory_space<vmem>>, vector<1x362xf32>
    %41 = vector.broadcast %40 : vector<1x362xf32> to vector<8x362xf32>
    %42 = arith.mulf %39, %41 : vector<8x362xf32>
    %43 = vector.extract_strided_slice %42 {offsets = [0, 0], sizes = [8, 324], strides = [1, 1]} : vector<8x362xf32> to vector<8x324xf32>
    %44 = vector.extract_strided_slice %42 {offsets = [0, 1], sizes = [8, 324], strides = [1, 1]} : vector<8x362xf32> to vector<8x324xf32>
    %45 = vector.extract_strided_slice %42 {offsets = [0, 2], sizes = [8, 324], strides = [1, 1]} : vector<8x362xf32> to vector<8x324xf32>
    %46 = vector.extract_strided_slice %42 {offsets = [0, 18], sizes = [8, 324], strides = [1, 1]} : vector<8x362xf32> to vector<8x324xf32>
    %47 = vector.extract_strided_slice %42 {offsets = [0, 19], sizes = [8, 324], strides = [1, 1]} : vector<8x362xf32> to vector<8x324xf32>
    %48 = vector.extract_strided_slice %42 {offsets = [0, 20], sizes = [8, 324], strides = [1, 1]} : vector<8x362xf32> to vector<8x324xf32>
    %49 = vector.extract_strided_slice %42 {offsets = [0, 36], sizes = [8, 324], strides = [1, 1]} : vector<8x362xf32> to vector<8x324xf32>
    %50 = vector.extract_strided_slice %42 {offsets = [0, 37], sizes = [8, 324], strides = [1, 1]} : vector<8x362xf32> to vector<8x324xf32>
    %51 = vector.extract_strided_slice %42 {offsets = [0, 38], sizes = [8, 324], strides = [1, 1]} : vector<8x362xf32> to vector<8x324xf32>
    %52 = tpu.concatenate %43, %44, %45, %46, %47, %48, %49, %50, %51 in 0 : vector<8x324xf32>, vector<8x324xf32>, vector<8x324xf32>, vector<8x324xf32>, vector<8x324xf32>, vector<8x324xf32>, vector<8x324xf32>, vector<8x324xf32>, vector<8x324xf32> -> vector<72x324xf32>
    %c0_14 = arith.constant 0 : index
    %c0_15 = arith.constant 0 : index
    %53 = vector.load %arg7[%c0_14, %c0_15] : memref<8x72xbf16, #tpu.memory_space<vmem>>, vector<8x72xbf16>
    %54 = arith.truncf %52 : vector<72x324xf32> to vector<72x324xbf16>
    %cst_16 = arith.constant dense<0.000000e+00> : vector<8x324xf32>
    %55 = tpu.matmul %53, %54, %cst_16 {dimension_numbers = #tpu.dot_dimension_numbers<[1], [0], [0], [1], [0, 0, 1, 1], [], []>} : vector<8x72xbf16>, vector<72x324xbf16>, vector<8x324xf32> -> vector<8x324xf32>
    %c0_17 = arith.constant 0 : index
    %c0_18 = arith.constant 0 : index
    %56 = vector.load %arg8[%c0_17, %c0_18] : memref<8x1xf32, #tpu.memory_space<vmem>>, vector<8x1xf32>
    %57 = vector.broadcast %56 : vector<8x1xf32> to vector<8x324xf32>
    %58 = arith.addf %55, %57 : vector<8x324xf32>
    %cst_19 = arith.constant 0.000000e+00 : f32
    %59 = vector.broadcast %cst_19 : f32 to vector<8x324xf32>
    %60 = arith.maximumf %58, %59 : vector<8x324xf32>
    %c0_20 = arith.constant 0 : index
    %c57 = arith.constant 57 : index
    %61 = vector.load %arg2[%c0_20, %c57] : memref<1x438xf32, #tpu.memory_space<vmem>>, vector<1x324xf32>
    %62 = vector.broadcast %61 : vector<1x324xf32> to vector<8x324xf32>
    %63 = arith.mulf %60, %62 : vector<8x324xf32>
    %c0_21 = arith.constant 0 : index
    %c0_22 = arith.constant 0 : index
    %64 = vector.load %arg9[%c0_21, %c0_22] : memref<1x8xbf16, #tpu.memory_space<vmem>>, vector<1x8xbf16>
    %65 = arith.truncf %63 : vector<8x324xf32> to vector<8x324xbf16>
    %cst_23 = arith.constant dense<0.000000e+00> : vector<1x324xf32>
    %66 = tpu.matmul %64, %65, %cst_23 {dimension_numbers = #tpu.dot_dimension_numbers<[1], [0], [0], [1], [0, 0, 1, 1], [], []>} : vector<1x8xbf16>, vector<8x324xbf16>, vector<1x324xf32> -> vector<1x324xf32>
    %c0_24 = arith.constant 0 : index
    %c0_25 = arith.constant 0 : index
    %67 = vector.load %arg10[%c0_24, %c0_25] : memref<1x1xf32, #tpu.memory_space<vmem>>, vector<1x1xf32>
    %68 = vector.broadcast %67 : vector<1x1xf32> to vector<1x324xf32>
    %69 = arith.addf %66, %68 : vector<1x324xf32>
    %c0_26 = arith.constant 0 : index
    %c0_27 = arith.constant 0 : index
    %c0_28 = arith.constant 0 : index
    %70 = vector.load %arg11[%c0_26, %c0_27, %c0_28] : memref<1x1x324xf32, #tpu.memory_space<vmem>>, vector<1x1x324xf32>
    %71 = vector.shape_cast %70 : vector<1x1x324xf32> to vector<1x324xf32>
    %72 = vector.shape_cast %69 : vector<1x324xf32> to vector<1x1x324xf32>
    tpu.vector_store %arg11[%c0_26, %c0_27, %c0_28], %72 {strides = array<i32>} : memref<1x1x324xf32, #tpu.memory_space<vmem>>, vector<1x1x324xf32>,
    return
  }
  func.func @transform_0(%arg0: i32) -> (i32, i32, i32) {
    %c0_i32 = arith.constant 0 : i32
    %c0_i32_0 = arith.constant 0 : i32
    %c0_i32_1 = arith.constant 0 : i32
    return %arg0, %c0_i32, %c0_i32_0 : i32, i32, i32
  }
  func.func @transform_1(%arg0: i32) -> (i32, i32) {
    %c0_i32 = arith.constant 0 : i32
    %c0_i32_0 = arith.constant 0 : i32
    %c0_i32_1 = arith.constant 0 : i32
    return %c0_i32, %c0_i32_0 : i32, i32
  }
  func.func @transform_2(%arg0: i32) -> (i32, i32) {
    %c0_i32 = arith.constant 0 : i32
    %c0_i32_0 = arith.constant 0 : i32
    %c0_i32_1 = arith.constant 0 : i32
    return %c0_i32, %c0_i32_0 : i32, i32
  }
  func.func @transform_3(%arg0: i32) -> (i32, i32) {
    %c0_i32 = arith.constant 0 : i32
    %c0_i32_0 = arith.constant 0 : i32
    %c0_i32_1 = arith.constant 0 : i32
    return %c0_i32, %c0_i32_0 : i32, i32
  }
  func.func @transform_4(%arg0: i32) -> (i32, i32) {
    %c0_i32 = arith.constant 0 : i32
    %c0_i32_0 = arith.constant 0 : i32
    %c0_i32_1 = arith.constant 0 : i32
    return %c0_i32, %c0_i32_0 : i32, i32
  }
  func.func @transform_5(%arg0: i32) -> (i32, i32) {
    %c0_i32 = arith.constant 0 : i32
    %c0_i32_0 = arith.constant 0 : i32
    %c0_i32_1 = arith.constant 0 : i32
    return %c0_i32, %c0_i32_0 : i32, i32
  }
  func.func @transform_6(%arg0: i32) -> (i32, i32) {
    %c0_i32 = arith.constant 0 : i32
    %c0_i32_0 = arith.constant 0 : i32
    %c0_i32_1 = arith.constant 0 : i32
    return %c0_i32, %c0_i32_0 : i32, i32
  }
  func.func @transform_7(%arg0: i32) -> (i32, i32) {
    %c0_i32 = arith.constant 0 : i32
    %c0_i32_0 = arith.constant 0 : i32
    %c0_i32_1 = arith.constant 0 : i32
    return %c0_i32, %c0_i32_0 : i32, i32
  }
  func.func @transform_8(%arg0: i32) -> (i32, i32) {
    %c0_i32 = arith.constant 0 : i32
    %c0_i32_0 = arith.constant 0 : i32
    %c0_i32_1 = arith.constant 0 : i32
    return %c0_i32, %c0_i32_0 : i32, i32
  }
  func.func @transform_9(%arg0: i32) -> (i32, i32) {
    %c0_i32 = arith.constant 0 : i32
    %c0_i32_0 = arith.constant 0 : i32
    %c0_i32_1 = arith.constant 0 : i32
    return %c0_i32, %c0_i32_0 : i32, i32
  }
  func.func @transform_10(%arg0: i32) -> (i32, i32, i32) {
    %c0_i32 = arith.constant 0 : i32
    %c0_i32_0 = arith.constant 0 : i32
    %c0_i32_1 = arith.constant 0 : i32
    return %arg0, %c0_i32, %c0_i32_0 : i32, i32, i32
  }
}

</mosaic_0001>

<bundles_post_ra>
// kernel: _lambda_.5
= control target key start
LH: loop header
LB: loop body
LE: loop exit
PB: predicated region body
PF: predicated region fallthrough
CT: control target
= control target key end

     0   :  { %11 = vsyncpa [#allocation3], 0  ;;  %s1950_s0 = inlined_call_operand.hbm [shape: bf16[2,8,400], index: 0, kind: input, shape index: {}]   ;;  %s1951_s1 = inlined_call_operand.hbm [shape: f32[1,400], index: 1, kind: input, shape index: {}]   ;;  %s1952_s2 = inlined_call_operand.hbm [shape: bf16[8,72], index: 2, kind: input, shape index: {}]   ;;  %s1953_s3 = inlined_call_operand.hbm [shape: f32[8,1], index: 3, kind: input, shape index: {}]   ;;  %s1954_s4 = inlined_call_operand.hbm [shape: bf16[8,72], index: 4, kind: input, shape index: {}]   ;;  %s1955_s5 = inlined_call_operand.hbm [shape: f32[8,1], index: 5, kind: input, shape index: {}]   ;;  %s1956_s6 = inlined_call_operand.hbm [shape: bf16[2,8,324], index: 6, kind: output, shape index: {}]  }
   0x1   :  { %13 = vsyncpa [#allocation3 + $0x1], 0 }
   0x2   :  { %14 = vsyncpa [#allocation6], 0 }
   0x3   :  { %15 = vsyncpa [#allocation9], 0 }
   0x4   :  { %16 = vsyncpa [#allocation12], 0 }
   0x5   :  { %17 = vsyncpa [#allocation4], 0 }
   0x6   :  { %19 = vsyncpa [#allocation4 + $0x1], 0  ;;  %s1535_s21 = smov 0   ;;  %s1537_s22 = smov 0  }
   0x7   :  { %s1539_s23 = smov 0   ;;  %s1541_s24 = smov 0  }
   0x8 LB: > { %s1482_s25 = smov [#allocation5]   ;;  %s1556_s27 = sadd.s32 4294967295, %s1480_s24   ;;  %s1480_s24 = sphi %s1541_s24, %s1981_s24   ;;  %s1476_s23 = sphi %s1539_s23, %s1980_s23   ;;  %s1472_s22 = sphi %s1537_s22, %s1979_s22   ;;  %s1468_s21 = sphi %s1535_s21, %s1978_s21  }
   0x9   : > { %s200_s26 = sshll.u32 %s1482_s25, 4  ;;  %p954_p0 = scmp.ge.s32.totalorder %s1480_s24, 1  ;;  %s1561_s26 = int_to_ptr.vmem [resolvable:$true] %s200_s26 }
   0xa   : > { %p1957_p1 = scmp.eq.s32.totalorder %s1556_s27, 0  ;;  %p187_p2 = scmp.lt.s32.totalorder %s1480_s24, 3 }
   0xb   : > { %s1483_s29 = smov [#allocation8]   ;;  %s1484_s7 = smov [#allocation7]  }
   0xc   : > { %p1563_p3 = pnand %p954_p0, %p187_p2  ;;  %s222_s30 = sshll.u32 %s1483_s29, 4  ;;  %s1570_s30 = int_to_ptr.vmem [resolvable:$true] %s222_s30 }
   0xd   : > { %s211_s8 = sshll.u32 %s1484_s7, 4  ;;  %s1485_s10 = smov [#allocation10]   ;;  %s1578_s8 = int_to_ptr.vmem [resolvable:$true] %s211_s8 }
   0xe   : > { %s1960_s28 = scalar_select %p1563_p3, 1, 0 }
   0xf   : > { %p1051_p5 = pneg %p1563_p3  ;;  %s1580_s11 = sshll.u32 %s1485_s10, 4  ;;  %s234_s11 = int_to_ptr.vmem [resolvable:$true] %s1580_s11 }
  0x10   : > { %s1232_s14 = scalar_lea.hbm %s1951_s1, 64 }
  0x11   : > { %p1574_p6 = pnand %p1051_p5, %p1957_p1  ;;  %p1233_p7 = scmp.ne.s32.totalorder %s1951_s1, %s1232_s14 }
  0x12   : > { %p1239_p11 = scmp.lt.u32.totalorder %s1232_s14, %s1951_s1 }
  0x13   : > { %p1590_p8 = pneg %p1574_p6 }
  0x15   : > { %p1235_p9 = pnand %p1590_p8, %p1233_p7 }
  0x17   : > { %p1236_p10 = pneg %p1235_p9 }
  0x19   : > { %p1241_p12 = pnand %p1239_p11, %p1236_p10 }
  0x1b   : > { %1244 = shalt.err (!%p1241_p12)
}
  0x1c   : > { %s1245_s20 = scalar_lea.vmem %s1561_s26, 64  ;;  %p1253_p5 = scmp.lt.s32.totalorder %s1561_s26, %s1561_s26 }
  0x1d   : > { %p1246_p13 = scmp.ne.s32.totalorder %s1561_s26, %s1245_s20  ;;  %p1254_p4 = scmp.lt.s32.totalorder %s1245_s20, %s1245_s20 }
  0x1f   : > { %p1248_p0 = pnand %p1246_p13, %p1590_p8  ;;  %p1255_p7 = por %p1254_p4, %p1253_p5 }
  0x21   : > { %p1249_p2 = pneg %p1248_p0 }
  0x23   : > { %p1256_p9 = pnand %p1255_p7, %p1249_p2 }
  0x25   : > { %1259 = shalt.err (!%p1256_p9)
}
  0x26   : > { %1054 = dma.hbm_to_vmem [thread:$0]  (!%p1574_p6), %s1951_s1, 64, %s1561_s26, [#allocation6]  }
  0x27   : > { %s1260_s12 = scalar_lea.hbm %s1953_s3, 128 }
  0x28   : > { %p1261_p10 = scmp.ne.s32.totalorder %s1953_s3, %s1260_s12  ;;  %p1267_p12 = scmp.lt.u32.totalorder %s1260_s12, %s1953_s3 }
  0x2a   : > { %p1263_p4 = pnand %p1261_p10, %p1590_p8 }
  0x2c   : > { %p1264_p11 = pneg %p1263_p4 }
  0x2e   : > { %p1269_p13 = pnand %p1267_p12, %p1264_p11 }
  0x30   : > { %1272 = shalt.err (!%p1269_p13)
}
  0x31   : > { %s1273_s26 = scalar_lea.vmem %s1570_s30, 128  ;;  %p1281_p7 = scmp.lt.s32.totalorder %s1570_s30, %s1570_s30 }
  0x32   : > { %p1274_p0 = scmp.ne.s32.totalorder %s1570_s30, %s1273_s26  ;;  %p1282_p9 = scmp.lt.s32.totalorder %s1273_s26, %s1273_s26 }
  0x34   : > { %p1276_p2 = pnand %p1274_p0, %p1590_p8  ;;  %p1283_p10 = por %p1282_p9, %p1281_p7 }
  0x36   : > { %p1277_p5 = pneg %p1276_p2 }
  0x38   : > { %p1284_p4 = pnand %p1283_p10, %p1277_p5 }
  0x3a   : > { %1287 = shalt.err (!%p1284_p4)
}
  0x3b   : > { %1060 = dma.hbm_to_vmem [thread:$0]  (!%p1574_p6), %s1953_s3, 128, %s1570_s30, [#allocation9]  }
  0x3c   : > { %s1288_s29 = scalar_lea.hbm %s1952_s2, 64 }
  0x3d   : > { %p1289_p11 = scmp.ne.s32.totalorder %s1952_s2, %s1288_s29  ;;  %p1295_p0 = scmp.lt.u32.totalorder %s1288_s29, %s1952_s2 }
  0x3f   : > { %p1291_p12 = pnand %p1289_p11, %p1590_p8 }
  0x41   : > { %p1292_p13 = pneg %p1291_p12 }
  0x43   : > { %p1297_p2 = pnand %p1295_p0, %p1292_p13 }
  0x45   : > { %1300 = shalt.err (!%p1297_p2)
}
  0x46   : > { %s1301_s30 = scalar_lea.vmem %s1578_s8, 64  ;;  %p1309_p10 = scmp.lt.s32.totalorder %s1578_s8, %s1578_s8 }
  0x47   : > { %p1302_p5 = scmp.ne.s32.totalorder %s1578_s8, %s1301_s30  ;;  %p1310_p4 = scmp.lt.s32.totalorder %s1301_s30, %s1301_s30 }
  0x49   : > { %p1304_p7 = pnand %p1302_p5, %p1590_p8  ;;  %p1311_p11 = por %p1310_p4, %p1309_p10 }
  0x4b   : > { %p1305_p9 = pneg %p1304_p7 }
  0x4d   : > { %p1312_p12 = pnand %p1311_p11, %p1305_p9 }
  0x4f   : > { %1315 = shalt.err (!%p1312_p12)
}
  0x50   : > { %1057 = dma.hbm_to_vmem [thread:$0]  (!%p1574_p6), %s1952_s2, 64, %s1578_s8, [#allocation6]  }
  0x51   : > { %s1486_s16 = smov [#allocation11]   ;;  %s1316_s20 = scalar_lea.hbm %s1954_s4, 64 }
  0x52   : > { %s244_s26 = sshll.u32 %s1486_s16, 4  ;;  %p1317_p13 = scmp.ne.s32.totalorder %s1954_s4, %s1316_s20  ;;  %s245_s26 = int_to_ptr.vmem [resolvable:$true] %s244_s26 }
  0x53   : > { %p1323_p5 = scmp.lt.u32.totalorder %s1316_s20, %s1954_s4 }
  0x54   : > { %p1319_p0 = pnand %p1317_p13, %p1590_p8 }
  0x56   : > { %p1320_p2 = pneg %p1319_p0 }
  0x58   : > { %p1325_p7 = pnand %p1323_p5, %p1320_p2 }
  0x5a   : > { %1328 = shalt.err (!%p1325_p7)
}
  0x5b   : > { %s1329_s8 = scalar_lea.vmem %s234_s11, 64  ;;  %p1337_p11 = scmp.lt.s32.totalorder %s234_s11, %s234_s11 }
  0x5c   : > { %p1330_p9 = scmp.ne.s32.totalorder %s234_s11, %s1329_s8  ;;  %p1338_p12 = scmp.lt.s32.totalorder %s1329_s8, %s1329_s8 }
  0x5e   : > { %p1332_p10 = pnand %p1330_p9, %p1590_p8  ;;  %p1339_p1 = por %p1338_p12, %p1337_p11 }
  0x60   : > { %p1333_p4 = pneg %p1332_p10 }
  0x62   : > { %p1340_p3 = pnand %p1339_p1, %p1333_p4 }
  0x64   : > { %1343 = shalt.err (!%p1340_p3)
}
  0x65   : > { %1063 = dma.hbm_to_vmem [thread:$0]  (!%p1574_p6), %s1954_s4, 64, %s234_s11, [#allocation9]  }
  0x66   : > { %s1344_s15 = scalar_lea.hbm %s1955_s5, 128 }
  0x67   : > { %p1345_p13 = scmp.ne.s32.totalorder %s1955_s5, %s1344_s15  ;;  %p1351_p3 = scmp.lt.u32.totalorder %s1344_s15, %s1955_s5 }
  0x69   : > { %p1347_p0 = pnand %p1345_p13, %p1590_p8 }
  0x6b   : > { %p1348_p1 = pneg %p1347_p0 }
  0x6d   : > { %p1353_p2 = pnand %p1351_p3, %p1348_p1 }
  0x6f   : > { %1356 = shalt.err (!%p1353_p2)
}
  0x70   : > { %s1357_s25 = scalar_lea.vmem %s245_s26, 128  ;;  %p1365_p10 = scmp.lt.s32.totalorder %s245_s26, %s245_s26 }
  0x71   : > { %p1358_p5 = scmp.ne.s32.totalorder %s245_s26, %s1357_s25  ;;  %p1366_p4 = scmp.lt.s32.totalorder %s1357_s25, %s1357_s25 }
  0x73   : > { %p1360_p7 = pnand %p1358_p5, %p1590_p8  ;;  %p1367_p11 = por %p1366_p4, %p1365_p10 }
  0x75   : > { %p1361_p9 = pneg %p1360_p7 }
  0x77   : > { %p1368_p12 = pnand %p1367_p11, %p1361_p9 }
  0x79   : > { %1371 = shalt.err (!%p1368_p12)
}
  0x7a   : > { %1066 = dma.hbm_to_vmem [thread:$0]  (!%p1574_p6), %s1955_s5, 128, %s245_s26, [#allocation12]  }
  0x7b   : > { %s953_s17 = sadd.s32 4294967294, %s1480_s24   ;;  %s1696_s9 = sadd.s32 1, %s1480_s24  }
  0x7c   : > { %s32_s7 = sadd.s32 1, %s1476_s23  ;;  %s29_s10 = ssub.s32 %s1480_s24, %s1696_s9 }
  0x7d   : > { %p39_p8 = scmp.ne.s32.totalorder %s1476_s23, %s1472_s22  ;;  %p30_p13 = scmp.eq.s32.totalorder %s29_s10, 0 }
  0x7e   : > { %p40_p0 = scmp.eq.s32.totalorder %s1480_s24, 0  ;;  %p45_p1 = scmp.ne.s32.totalorder %s1472_s22, %s1468_s21 }
  0x7f   : > { %p174_p3 = scmp.eq.s32.totalorder %s1556_s27, 1  ;;  %p1963_p5 = scmp.eq.s32.totalorder %s1556_s27, 0 }
  0x80   : > { %s1708_s8 = scalar_select %p30_p13, %s1476_s23, %s32_s7  }
  0x81   : > { %p41_p2 = por %p40_p0, %p39_p8  ;;  %p1712_p7 = por %p1963_p5, %p45_p1 }
  0x82   : > { %p1716_p6 = por %p174_p3, %p39_p8  ;;  %p180_p9 = scmp.eq.s32.totalorder %s953_s17, 1 }
  0x83   : > { %p1080_p10 = scmp.lt.s32.totalorder %s1480_s24, 2  ;;  %s255_s13 = sand.u32 1, %s1476_s23  }
  0x84   : > { %s1965_s26 = scalar_select %p1716_p6, 1, 0 }
  0x85   : > { %p1722_p4 = por %p180_p9, %p45_p1  ;;  %s961_s14 = sshll.u32 %s255_s13, 4 }
  0x86   : > { %s982_s15 = sshll.u32 %s1480_s24, 8  ;;  %s259_s20 = scalar_lea.vmem [#allocation2], %s961_s14 }
  0x87   : > { %s1966_s30 = scalar_select %p1722_p4, 1, 0 }
  0x88   : > { %s1730_s19 = scalar_lea.hbm %s1950_s0, %s982_s15  ;;  %s267_s25 = sshll.u32 %s259_s20, 4  ;;  %s1736_s25 = int_to_ptr.vmem [resolvable:$true] %s267_s25 }
  0x89   : > { %p1732_p11 = pnand %p1080_p10, %p41_p2  ;;  %s256_s29 = scalar_lea.sflag [#allocation3], %s255_s13 }
  0x8a   : > { %s1372_s17 = scalar_lea.hbm %s1730_s19, 256  ;;  %s1377_s14 = scalar_lea.hbm %s1950_s0, 512 }
  0x8b   : > { %p1373_p12 = scmp.ne.s32.totalorder %s1730_s19, %s1372_s17  ;;  %p1374_p8 = pneg %p1732_p11 }
  0x8c   : > { %p1378_p1 = scmp.lt.u32.totalorder %s1730_s19, %s1950_s0  ;;  %p1379_p3 = scmp.lt.u32.totalorder %s1377_s14, %s1372_s17 }
  0x8d   : > { %p1375_p13 = pnand %p1374_p8, %p1373_p12  ;;  %p1381_p5 = scmp.lt.u32.totalorder %s1372_s17, %s1730_s19 }
  0x8e   : > { %p1380_p2 = por %p1379_p3, %p1378_p1 }
  0x8f   : > { %p1376_p0 = pneg %p1375_p13 }
  0x90   : > { %p1382_p9 = por %p1381_p5, %p1380_p2 }
  0x92   : > { %p1383_p10 = pnand %p1382_p9, %p1376_p0 }
  0x94   : > { %1386 = shalt.err (!%p1383_p10)
}
  0x95   : > { %s1387_s13 = scalar_lea.vmem %s1736_s25, 256  ;;  %s1487_s18 = smov [#allocation2]  }
  0x96   : > { %p1388_p12 = scmp.ne.s32.totalorder %s1736_s25, %s1387_s13  ;;  %s1392_s20 = sshll.u32 %s1487_s18, 4  ;;  %s1393_s20 = int_to_ptr.vmem [resolvable:$false] %s1392_s20 }
  0x97   : > { %s1394_s7 = scalar_lea.vmem %s1393_s20, 512  ;;  %p1395_p6 = scmp.lt.s32.totalorder %s1736_s25, %s1393_s20 }
  0x98   : > { %p1390_p13 = pnand %p1388_p12, %p1374_p8  ;;  %p1396_p1 = scmp.lt.s32.totalorder %s1394_s7, %s1387_s13 }
  0x9a   : > { %p1391_p4 = pneg %p1390_p13  ;;  %p1397_p3 = por %p1396_p1, %p1395_p6 }
  0x9c   : > { %p1398_p2 = pnand %p1397_p3, %p1391_p4 }
  0x9e   : > { %1401 = shalt.err (!%p1398_p2)
}
  0x9f   : > { %1070 = dma.hbm_to_vmem [thread:$0]  (!%p1732_p11), %s1730_s19, 256, %s1736_s25, %s256_s29  }
  0xa0   : > { %p1968_p0 = scmp.ne.s32.totalorder %s1960_s28, 0 }
  0xa1   : > { %s1766_s17 = sand.u32 (!%p1968_p0), 1, %s1472_s22  }
  0xa2   : > { %276 = sbr.rel (%p1968_p0) target bundleno = 942 (0x3ae), region = 44  ;;  %s965_s10 = sshll.u32 (!%p1968_p0), %s1766_s17, 4 }
  0xa3   : > { %s279_s14 = scalar_lea.sflag (!%p1968_p0), [#allocation3], %s1766_s17  ;;  %s282_s15 = scalar_lea.vmem (!%p1968_p0), [#allocation2], %s965_s10 }
  0xa9   : > { %1447 = dma.done.wait (%p1712_p7), %s279_s14, 256  }
  0xaa   : > { %1449 = vsyncadd (%p1712_p7), %s279_s14, 4294967040  ;;  %p1969_p6 = scmp.eq.s32.totalorder %s1556_s27, 0 }
  0xac   : > { %1451 = dma.done.wait (%p1969_p6), [#allocation6], 128   ;;  %p1970_p4 = pmov %p1969_p6 }
  0xae   : > { %1453 = vsyncadd (%p1970_p4), [#allocation6], 4294967168  ;;  %p1971_p11 = pmov %p1970_p4 }
  0xaf   : > { %p1972_p8 = pmov %p1970_p4 }
  0xb0   : > { %1455 = dma.done.wait (%p1971_p11), [#allocation9], 192  }
  0xb1   : > { %1457 = vsyncadd (%p1972_p8), [#allocation9], 4294967104  ;;  %p1973_p5 = pmov %p1970_p4 }
  0xb2   : > { %p1974_p9 = pmov %p1970_p4 }
  0xb3   : > { %1459 = dma.done.wait (%p1973_p5), [#allocation12], 128  }
  0xb4   : > { %1461 = vsyncadd (%p1974_p9), [#allocation12], 4294967168  ;;  %v1488_v0 = vmov 0.0   ;;  %v332_v1 = vld [vmem:[%s282_s15] sm:$0xff]  ;;  %v333_v2 = vld [vmem:[%s282_s15 + $0x8] sm:$0xff]  ;;  %s1489_s28 = smov 126   ;;  %v569_v12 = vlaneseq }
  0xb5   : > { %997 = vmatprep.subr.bf16.mxu1 %v1488_v0  ;;  %v1787_v3 = vunpack.c.h.bf16 %v332_v1  ;;  %v336_v4 = vunpack.c.l.bf16 %v333_v2  ;;  %s1490_s12 = smov 127   ;;  %v1792_v6 = vunpack.c.l.bf16 %v332_v1  ;;  %s1491_s19 = smov 110   ;;  %v337_v7 = vunpack.c.h.bf16 %v333_v2  ;;  %v567_v14 = vld [vmem:[#allocation5] sm:$0x7]  ;;  %v463_v18 = vld [vmem:[#allocation8] sm:$0xff] }
  0xb6   : > { %s1492_s25 = smov 108   ;;  %s1493_s11 = smov 109   ;;  %v1496_v9 = vmov 0   ;;  %vm1497_vm0 = vmmov 0   ;;  %v570_v13 = vshrl.u32 %v569_v12, 7  ;;  %vm347_vm1 = vcmask 1039360  }
  0xb7   : > { %v1140_v5 = vpack.i.bf16 %v336_v4, %v1787_v3  ;;  %s1494_s29 = smov 91   ;;  %s1495_s16 = smov 92   ;;  %v1175_v8 = vpack.i.bf16 %v337_v7, %v1792_v6  ;;  %515 = vmatprep.mubr.bf16.mxu0 %v1496_v9  ;;  %1007 = vmatprep.mubr.msk.bf16.mxu1 %vm1497_vm0, %v1488_v0  ;;  %v1185_v10 = vpack.i.bf16 %v337_v7, %v336_v4  ;;  %vm371_vm2 = vcmask 900096  }
  0xb8   : > { %1190 = vset.pattern.permute.xlu0 %v1496_v9  ;;  %1231 = vset.pattern.permute.xlu1 %v1496_v9  ;;  %v1180_v11 = vpack.i.bf16 %v1787_v3, %v1792_v6  ;;  %s1498_s13 = smov 90   ;;  %v575_v15 = vsub.s32 1, %v570_v13  ;;  %v579_v16 = vsub.s32 2, %v570_v13  ;;  %v571_v17 = vsub.s32 0, %v570_v13  ;;  %s1025_s18 = smul.u32 12, %s1766_s17 }
  0xb9   : > { %1141 = vrot.lane.b32.xlu1 %v1140_v5, %s1489_s28  ;;  %1136 = vrot.lane.b32.xlu0 %v1140_v5, %s1490_s12  ;;  %vm359_vm3 = vcmask 1031168   ;;  %vm395_vm4 = vcmask 883712   ;;  %vm383_vm5 = vcmask 891904   ;;  %vm410_vm6 = vcmask 752640   ;;  %s1026_s20 = smul.u32 192, %s1556_s27  ;;  %p1975_p10 = scmp.ne.s32.totalorder %s1965_s26, 0 }
  0xba   : > { %v576_v19 = vrot.slane %v567_v14, %v575_v15  ;;  %v580_v20 = vrot.slane %v567_v14, %v579_v16  ;;  %v572_v21 = vrot.slane %v567_v14, %v571_v17  ;;  %vm425_vm7 = vcmask 744448   ;;  %s330_s7 = scalar_lea.vmem [#allocation13], %s1025_s18 }
  0xbb   : > { %vm440_vm8 = vcmask 736256   ;;  %vm473_vm9 = vcmask 1043456   ;;  %vm469_vm10 = vcmask 588800   ;;  %vm818_vm11 = vcmask 551936   ;;  %s835_s10 = sshll.u32 %s330_s7, 4  ;;  %s1908_s10 = int_to_ptr.vmem [resolvable:$true] %s835_s10 }
  0xbc   : > { %s1402_s27 = scalar_lea.vmem %s1908_s10, 192 }
  0xbd   : > { %1146 = vrot.lane.b32.xlu1 %v1140_v5, %s1491_s19  ;;  %341 = vrot.lane.b32.xlu0 %v1792_v6, %s1490_s12  ;;  %p1403_p7 = scmp.ne.s32.totalorder %s1908_s10, %s1402_s27 }
  0xbf   : > { %p1404_p12 = pnand %p1403_p7, %p1975_p10 }
  0xc1   : > { %365 = vrot.lane.b32.xlu1 %v1792_v6, %s1491_s19  ;;  %353 = vrot.lane.b32.xlu0 %v1792_v6, %s1489_s28  ;;  %p1405_p13 = pneg %p1404_p12 }
  0xc5   : > { %1156 = vrot.lane.b32.xlu1 %v1140_v5, %s1492_s25  ;;  %1151 = vrot.lane.b32.xlu0 %v1140_v5, %s1493_s11 }
  0xc9   : > { %389 = vrot.lane.b32.xlu1 %v1792_v6, %s1492_s25  ;;  %377 = vrot.lane.b32.xlu0 %v1792_v6, %s1493_s11 }
  0xcd   : > { %1166 = vrot.lane.b32.xlu1 %v1140_v5, %s1494_s29  ;;  %1161 = vrot.lane.b32.xlu0 %v1140_v5, %s1495_s16 }
  0xd1   : > { %1176 = vrot.lane.b32.xlu1 %v1175_v8, %s1494_s29  ;;  %1171 = vrot.lane.b32.xlu0 %v1175_v8, %s1495_s16 }
  0xd5   : > { %1186 = vrot.lane.b32.xlu1 %v1185_v10, %s1498_s13  ;;  %1181 = vrot.lane.b32.xlu0 %v1180_v11, %s1498_s13 }
  0xd9   : > { %466 = vperm.xlu0 %1190, %v463_v18   ;;  %583 = vrot.lane.b32.xlu1 %v576_v19, %s1493_s11 }
  0xdd   : > { %585 = vrot.lane.b32.xlu1 %v580_v20, %s1493_s11  ;;  %581 = vrot.lane.b32.xlu0 %v572_v21, %s1493_s11 }
 0x12b   : > { %v1142_v22 = vpop.permute.xlu1 %1141  ;;  %v1137_v23 = vpop.permute.xlu0 %1136 }
 0x12c   : > { %v1139_v24 = vunpack.i.h.bf16 %v1137_v23  ;;  %v1138_v25 = vunpack.i.l.bf16 %v1137_v23  ;;  %v1144_v26 = vunpack.i.h.bf16 %v1142_v22  ;;  %v1143_v27 = vunpack.i.l.bf16 %v1142_v22 }
 0x12e   : > { %v450_v28 = vpack.c.bf16 %v1139_v24, %v336_v4  ;;  %v349_v29 = vsel %vm347_vm1, %v1138_v25, %v1139_v24  ;;  %v361_v38 = vsel %vm359_vm3, %v1143_v27, %v1144_v26 }
 0x12f   : > { %v1147_v30 = vpop.permute.xlu1 %1146  ;;  %v342_v31 = vpop.permute.xlu0 %341  ;;  %v449_v32 = vpack.c.bf16 %v349_v29, %v1787_v3 }
 0x130   : > { %v1149_v33 = vunpack.i.h.bf16 %v1147_v30  ;;  %v1148_v34 = vunpack.i.l.bf16 %v1147_v30  ;;  %v348_v35 = vsel %vm347_vm1, %v342_v31, %v1138_v25  ;;  %998 = vmatpush3.bf16.msra.mxu1 %v450_v28 }
 0x131   : > { %483 = vmatprep.subr.bf16.mxu0 %v449_v32  ;;  %999 = vmatprep.subr.bf16.mxu1 %v1488_v0  ;;  %v448_v36 = vpack.c.bf16 %v348_v35, %v1792_v6 }
 0x132   : > { %v453_v37 = vpack.c.bf16 %v1149_v33, %v1144_v26  ;;  %v373_v39 = vsel %vm371_vm2, %v1148_v34, %v1149_v33 }
 0x133   : > { %v366_v40 = vpop.permute.xlu1 %365  ;;  %484 = vmatpush1.bf16.msra.mxu0 %v448_v36  ;;  %v354_v41 = vpop.permute.xlu0 %353  ;;  %v452_v42 = vpack.c.bf16 %v373_v39, %v361_v38 }
 0x134   : > { %v372_v43 = vsel %vm371_vm2, %v366_v40, %v1148_v34  ;;  %v360_v44 = vsel %vm359_vm3, %v354_v41, %v1143_v27  ;;  %1000 = vmatpush3.bf16.msra.mxu1 %v453_v37  ;;  %v447_v34 = vld [vmem:[#allocation7] sm:$0xf] }
 0x135   : > { %v451_v45 = vpack.c.bf16 %v372_v43, %v360_v44  ;;  %485 = vmatprep.subr.bf16.mxu0 %v452_v42  ;;  %1001 = vmatprep.subr.bf16.mxu1 %v1488_v0 }
 0x137   : > { %v1157_v46 = vpop.permute.xlu1 %1156  ;;  %486 = vmatpush1.bf16.msra.mxu0 %v451_v45  ;;  %v1152_v47 = vpop.permute.xlu0 %1151 }
 0x138   : > { %v1159_v48 = vunpack.i.h.bf16 %v1157_v46  ;;  %v1158_v49 = vunpack.i.l.bf16 %v1157_v46  ;;  %v1154_v50 = vunpack.i.h.bf16 %v1152_v47  ;;  %v1153_v51 = vunpack.i.l.bf16 %v1152_v47 }
 0x13a   : > { %v456_v52 = vpack.c.bf16 %v1159_v48, %v1154_v50  ;;  %v385_v53 = vsel %vm383_vm5, %v1153_v51, %v1154_v50  ;;  %v397_v54 = vsel %vm395_vm4, %v1158_v49, %v1159_v48 }
 0x13b   : > { %v390_v55 = vpop.permute.xlu1 %389  ;;  %v378_v56 = vpop.permute.xlu0 %377  ;;  %v455_v57 = vpack.c.bf16 %v397_v54, %v385_v53 }
 0x13c   : > { %v396_v58 = vsel %vm395_vm4, %v390_v55, %v1158_v49  ;;  %v384_v59 = vsel %vm383_vm5, %v378_v56, %v1153_v51  ;;  %1002 = vmatpush3.bf16.msra.mxu1 %v456_v52 }
 0x13d   : > { %v454_v60 = vpack.c.bf16 %v396_v58, %v384_v59  ;;  %487 = vmatprep.subr.bf16.mxu0 %v455_v57  ;;  %1003 = vmatprep.subr.bf16.mxu1 %v1488_v0  ;;  %v702_v59 = vld [vmem:[#allocation11] sm:$0xff] }
 0x13f   : > { %v1167_v61 = vpop.permute.xlu1 %1166  ;;  %v1162_v62 = vpop.permute.xlu0 %1161  ;;  %488 = vmatpush1.bf16.msra.mxu0 %v454_v60 }
 0x140   : > { %v1169_v63 = vunpack.i.h.bf16 %v1167_v61  ;;  %v1168_v1 = vunpack.i.l.bf16 %v1167_v61  ;;  %v1164_v2 = vunpack.i.h.bf16 %v1162_v62  ;;  %v1163_v3 = vunpack.i.l.bf16 %v1162_v62 }
 0x142   : > { %v412_v4 = vsel %vm410_vm6, %v1163_v3, %v1164_v2  ;;  %v427_v5 = vsel %vm425_vm7, %v1168_v1, %v1169_v63 }
 0x143   : > { %v1177_v6 = vpop.permute.xlu1 %1176  ;;  %v1172_v7 = vpop.permute.xlu0 %1171  ;;  %v458_v8 = vpack.c.bf16 %v427_v5, %v412_v4 }
 0x144   : > { %v1179_v10 = vunpack.i.h.bf16 %v1177_v6  ;;  %v1178_v11 = vunpack.i.l.bf16 %v1177_v6  ;;  %v1174_v12 = vunpack.i.h.bf16 %v1172_v7  ;;  %v1173_v13 = vunpack.i.l.bf16 %v1172_v7 }
 0x145   : > { %489 = vmatprep.subr.bf16.mxu0 %v458_v8 }
 0x146   : > { %v411_v14 = vsel %vm410_vm6, %v1173_v13, %v1163_v3  ;;  %v426_v15 = vsel %vm425_vm7, %v1178_v11, %v1168_v1  ;;  %v413_v16 = vsel %vm410_vm6, %v1164_v2, %v1174_v12  ;;  %v428_v17 = vsel %vm425_vm7, %v1169_v63, %v1179_v10 }
 0x147   : > { %v1187_v18 = vpop.permute.xlu1 %1186  ;;  %v1182_v19 = vpop.permute.xlu0 %1181  ;;  %v457_v20 = vpack.c.bf16 %v426_v15, %v411_v14  ;;  %v459_v21 = vpack.c.bf16 %v428_v17, %v413_v16 }
 0x148   : > { %v1189_v22 = vunpack.i.h.bf16 %v1187_v18  ;;  %v1188_v23 = vunpack.i.l.bf16 %v1187_v18  ;;  %v1184_v24 = vunpack.i.h.bf16 %v1182_v19  ;;  %v1183_v25 = vunpack.i.l.bf16 %v1182_v19 }
 0x149   : > { %490 = vmatpush1.bf16.msra.mxu0 %v457_v20  ;;  %1004 = vmatpush3.bf16.msra.mxu1 %v459_v21 }
 0x14a   : > { %v442_v26 = vsel %vm440_vm8, %v1184_v24, %v1188_v23  ;;  %1005 = vmatprep.subr.bf16.mxu1 %v1488_v0  ;;  %v441_v27 = vsel %vm440_vm8, %v1183_v25, %v1184_v24  ;;  %v443_v28 = vsel %vm440_vm8, %v1188_v23, %v1189_v22 }
 0x14b   : > { %v461_v29 = vpack.c.bf16 %v442_v26, %v442_v26  ;;  %v460_v30 = vpack.c.bf16 %v441_v27, %v441_v27  ;;  %v462_v31 = vpack.c.bf16 %v443_v28, %v443_v28  ;;  %v584_v36 = vpop.permute.xlu1 %583 }
 0x14d   : > { %971 = vmatprep.subr.msk.bf16.mxu0 %vm473_vm9, %v461_v29  ;;  %v475_v32 = vsel %vm473_vm9, %v460_v30, 0  ;;  %v481_v33 = vsel %vm473_vm9, %v462_v31, 0 }
 0x14e   : > { %492 = vmatpush1.bf16.msra.mxu0 %v475_v32  ;;  %1006 = vmatpush3.bf16.msra.mxu1 %v481_v33 }
 0x14f   : > { %1011 = vmatprep.subr.bf16.mxu1 %v1488_v0  ;;  %v586_v52 = vpop.permute.xlu1 %585 }
 0x150   : > { %v588_v54 = vsel %vm383_vm5, %v584_v36, %v586_v52 }
 0x151   : > { %972 = vmatmul.mubr.msk.bf16.vlgmr.msra.gmra.mrb[0].mxu0 %vm469_vm10, %v447_v34  ;;  %1008 = vmatmul.mubr.msk.bf16.vlgmr.msra.gmra.mrb[0].mxu1 %vm469_vm10, %v447_v34 }
 0x152   : > { %1021 = vmatprep.mubr.msk.bf16.mxu1 %vm1497_vm0, %v1488_v0  ;;  %752 = vmatprep.mubr.bf16.mxu0 %v1496_v9 }
 0x158   : > { %v467_v35 = vpop.permute.xlu0 %466 }
 0x15c   : > { %v582_v37 = vpop.permute.xlu0 %581 }
 0x15d   : > { %v587_v44 = vsel %vm383_vm5, %v582_v37, %v584_v36 }
 0x224   : > { %v517_v38 = vpop.f32.mrb[0].mxu0  ;;  %v558_v39 = vpop.f32.mrb[0].mxu1 }
 0x225   : > { %v518_v40 = vadd.f32 %v517_v38, %v467_v35  ;;  %v519_v41 = vpop.f32.mrb[1].mxu0  ;;  %v1009_v42 = vpop.f32.mrb[1].mxu1  ;;  %v559_v49 = vadd.f32 %v558_v39, %v467_v35 }
 0x226   : > { %v521_v43 = vpop.f32.mrb[2].mxu0  ;;  %v561_v45 = vpop.f32.mrb[2].mxu1  ;;  %v520_v50 = vadd.f32 %v519_v41, %v467_v35 }
 0x227   : > { %v564_v46 = vmax.f32 %v518_v40, 0.0  ;;  %v522_v47 = vpop.f32.mrb[3].mxu0  ;;  %v1010_v48 = vpop.f32.mrb[3].mxu1  ;;  %v566_v9 = vmax.f32 %v559_v49, 0.0 }
 0x228   : > { %v565_v53 = vmax.f32 %v520_v50, 0.0 }
 0x229   : > { %v592_v51 = vmul.f32 %v587_v44, %v564_v46  ;;  %v594_v56 = vmul.f32 %v586_v52, %v566_v9 }
 0x22a   : > { %v593_v55 = vmul.f32 %v588_v54, %v565_v53 }
 0x22b   : > { %609 = vrot.lane.b32.xlu1 %v592_v51, %s1489_s28  ;;  %598 = vrot.lane.b32.xlu0 %v592_v51, %s1490_s12 }
 0x22c   : > { %v1191_v57 = vpack.i.bf16 %v594_v56, %v593_v55  ;;  %v1226_v58 = vpack.i.bf16 %v593_v55, %v592_v51 }
 0x22f   : > { %631 = vrot.lane.b32.xlu1 %v592_v51, %s1493_s11  ;;  %620 = vrot.lane.b32.xlu0 %v592_v51, %s1491_s19 }
 0x233   : > { %653 = vrot.lane.b32.xlu1 %v592_v51, %s1495_s16  ;;  %642 = vrot.lane.b32.xlu0 %v592_v51, %s1492_s25 }
 0x237   : > { %1192 = vrot.lane.b32.xlu1 %v1191_v57, %s1490_s12  ;;  %664 = vrot.lane.b32.xlu0 %v592_v51, %s1494_s29  ;;  %s821_s12 = scalar_lea.sflag [#allocation4], %s1766_s17 }
 0x23b   : > { %1197 = vrot.lane.b32.xlu1 %v1191_v57, %s1489_s28  ;;  %1202 = vrot.lane.b32.xlu0 %v1191_v57, %s1491_s19  ;;  %s1906_s28 = scalar_lea.hbm %s1956_s6, %s1026_s20  ;;  %s1499_s19 = smov [#allocation13]  }
 0x23f   : > { %1207 = vrot.lane.b32.xlu1 %v1191_v57, %s1493_s11  ;;  %1212 = vrot.lane.b32.xlu0 %v1191_v57, %s1492_s25  ;;  %s1406_s25 = sshll.u32 %s1499_s19, 4  ;;  %s1407_s25 = int_to_ptr.vmem [resolvable:$false] %s1406_s25 }
 0x240   : > { %s1408_s11 = scalar_lea.vmem %s1407_s25, 384  ;;  %p1409_p1 = scmp.lt.s32.totalorder %s1908_s10, %s1407_s25 }
 0x241   : > { %p1410_p3 = scmp.lt.s32.totalorder %s1408_s11, %s1402_s27 }
 0x243   : > { %1217 = vrot.lane.b32.xlu1 %v1191_v57, %s1495_s16  ;;  %1222 = vrot.lane.b32.xlu0 %v1191_v57, %s1494_s29  ;;  %p1411_p2 = por %p1410_p3, %p1409_p1 }
 0x245   : > { %p1412_p0 = pnand %p1411_p2, %p1405_p13 }
 0x247   : > { %1227 = vrot.lane.b32.xlu1 %v1226_v58, %s1498_s13  ;;  %679 = vrot.lane.b32.xlu0 %v594_v56, %s1498_s13 }
 0x24b   : > { %705 = vperm.xlu1 %1231, %v702_v59  }
 0x29d   : > { %v610_v60 = vpop.permute.xlu1 %609  ;;  %v599_v61 = vpop.permute.xlu0 %598 }
 0x2a1   : > { %v632_v62 = vpop.permute.xlu1 %631  ;;  %v621_v63 = vpop.permute.xlu0 %620 }
 0x2a5   : > { %v654_v1 = vpop.permute.xlu1 %653  ;;  %v643_v2 = vpop.permute.xlu0 %642 }
 0x2a9   : > { %v1193_v3 = vpop.permute.xlu1 %1192  ;;  %v665_v4 = vpop.permute.xlu0 %664 }
 0x2aa   : > { %v1195_v5 = vunpack.i.h.bf16 %v1193_v3  ;;  %v1194_v6 = vunpack.i.l.bf16 %v1193_v3 }
 0x2ac   : > { %v689_v7 = vpack.c.bf16 %v1195_v5, %v594_v56  ;;  %v604_v8 = vsel %vm347_vm1, %v599_v61, %v1194_v6  ;;  %v605_v10 = vsel %vm347_vm1, %v1194_v6, %v1195_v5  ;;  %v686_v61 = vld [vmem:[#allocation10] sm:$0xf] }
 0x2ad   : > { %v687_v11 = vpack.c.bf16 %v604_v8, %v592_v51  ;;  %v1198_v12 = vpop.permute.xlu1 %1197  ;;  %v1203_v13 = vpop.permute.xlu0 %1202  ;;  %v688_v14 = vpack.c.bf16 %v605_v10, %v593_v55 }
 0x2ae   : > { %v1200_v15 = vunpack.i.h.bf16 %v1198_v12  ;;  %v1199_v16 = vunpack.i.l.bf16 %v1198_v12  ;;  %v1205_v17 = vunpack.i.h.bf16 %v1203_v13  ;;  %v1204_v18 = vunpack.i.l.bf16 %v1203_v13  ;;  %1012 = vmatpush3.bf16.msra.mxu1 %v689_v7 }
 0x2af   : > { %720 = vmatprep.subr.bf16.mxu0 %v688_v14  ;;  %1013 = vmatprep.subr.bf16.mxu1 %v1488_v0 }
 0x2b0   : > { %v615_v19 = vsel %vm359_vm3, %v610_v60, %v1199_v16  ;;  %v692_v20 = vpack.c.bf16 %v1205_v17, %v1200_v15  ;;  %v626_v21 = vsel %vm371_vm2, %v621_v63, %v1204_v18  ;;  %721 = vmatpush1.bf16.msra.mxu0 %v687_v11  ;;  %v616_v22 = vsel %vm359_vm3, %v1199_v16, %v1200_v15 }
 0x2b1   : > { %v690_v23 = vpack.c.bf16 %v626_v21, %v615_v19  ;;  %v1208_v24 = vpop.permute.xlu1 %1207  ;;  %v1213_v25 = vpop.permute.xlu0 %1212  ;;  %v627_v26 = vsel %vm371_vm2, %v1204_v18, %v1205_v17 }
 0x2b2   : > { %v1210_v27 = vunpack.i.h.bf16 %v1208_v24  ;;  %v1209_v28 = vunpack.i.l.bf16 %v1208_v24  ;;  %v1215_v29 = vunpack.i.h.bf16 %v1213_v25  ;;  %v1214_v30 = vunpack.i.l.bf16 %v1213_v25  ;;  %1014 = vmatpush3.bf16.msra.mxu1 %v692_v20 }
 0x2b3   : > { %v691_v31 = vpack.c.bf16 %v627_v26, %v616_v22  ;;  %1015 = vmatprep.subr.bf16.mxu1 %v1488_v0 }
 0x2b4   : > { %v637_v32 = vsel %vm383_vm5, %v632_v62, %v1209_v28  ;;  %v695_v33 = vpack.c.bf16 %v1215_v29, %v1210_v27  ;;  %v648_v34 = vsel %vm395_vm4, %v643_v2, %v1214_v30  ;;  %v638_v35 = vsel %vm383_vm5, %v1209_v28, %v1210_v27 }
 0x2b5   : > { %v693_v36 = vpack.c.bf16 %v648_v34, %v637_v32  ;;  %722 = vmatprep.subr.bf16.mxu0 %v691_v31  ;;  %v1218_v37 = vpop.permute.xlu1 %1217  ;;  %v1223_v38 = vpop.permute.xlu0 %1222  ;;  %v649_v39 = vsel %vm395_vm4, %v1214_v30, %v1215_v29 }
 0x2b6   : > { %723 = vmatpush1.bf16.msra.mxu0 %v690_v23  ;;  %v1220_v40 = vunpack.i.h.bf16 %v1218_v37  ;;  %v1219_v41 = vunpack.i.l.bf16 %v1218_v37  ;;  %v1225_v42 = vunpack.i.h.bf16 %v1223_v38  ;;  %v1224_v43 = vunpack.i.l.bf16 %v1223_v38  ;;  %1016 = vmatpush3.bf16.msra.mxu1 %v695_v33 }
 0x2b7   : > { %v694_v44 = vpack.c.bf16 %v649_v39, %v638_v35  ;;  %1017 = vmatprep.subr.bf16.mxu1 %v1488_v0 }
 0x2b8   : > { %v659_v45 = vsel %vm410_vm6, %v654_v1, %v1219_v41  ;;  %v698_v46 = vpack.c.bf16 %v1225_v42, %v1220_v40  ;;  %v670_v47 = vsel %vm425_vm7, %v665_v4, %v1224_v43  ;;  %v660_v48 = vsel %vm410_vm6, %v1219_v41, %v1220_v40 }
 0x2b9   : > { %v696_v49 = vpack.c.bf16 %v670_v47, %v659_v45  ;;  %724 = vmatprep.subr.bf16.mxu0 %v694_v44  ;;  %v1228_v50 = vpop.permute.xlu1 %1227  ;;  %v680_v51 = vpop.permute.xlu0 %679  ;;  %v671_v52 = vsel %vm425_vm7, %v1224_v43, %v1225_v42 }
 0x2ba   : > { %725 = vmatpush1.bf16.msra.mxu0 %v693_v36  ;;  %v1230_v9 = vunpack.i.h.bf16 %v1228_v50  ;;  %v1229_v53 = vunpack.i.l.bf16 %v1228_v50  ;;  %v701_v54 = vpack.c.bf16 %v680_v51, %v680_v51  ;;  %1018 = vmatpush3.bf16.msra.mxu1 %v698_v46  ;;  %v697_v55 = vpack.c.bf16 %v671_v52, %v660_v48 }
 0x2bb   : > { %1019 = vmatprep.subr.bf16.mxu1 %v1488_v0 }
 0x2bc   : > { %v682_v56 = vsel %vm440_vm8, %v1230_v9, %v680_v51  ;;  %v718_v57 = vsel %vm473_vm9, %v701_v54, 0  ;;  %726 = vmatprep.subr.bf16.mxu0 %v697_v55  ;;  %v681_v58 = vsel %vm440_vm8, %v1229_v53, %v1230_v9 }
 0x2bd   : > { %v700_v59 = vpack.c.bf16 %v682_v56, %v682_v56  ;;  %v699_v60 = vpack.c.bf16 %v681_v58, %v681_v58 }
 0x2be   : > { %727 = vmatpush1.bf16.msra.mxu0 %v696_v49  ;;  %1020 = vmatpush3.bf16.msra.mxu1 %v718_v57 }
 0x2bf   : > { %974 = vmatprep.subr.msk.bf16.mxu0 %vm473_vm9, %v700_v59  ;;  %v712_v62 = vsel %vm473_vm9, %v699_v60, 0 }
 0x2c1   : > { %1022 = vmatmul.mubr.msk.bf16.vlgmr.msra.gmra.mrb[4].mxu1 %vm469_vm10, %v686_v61 }
 0x2c2   : > { %729 = vmatpush1.bf16.msra.mxu0 %v712_v62 }
 0x2c5   : > { %975 = vmatmul.mubr.msk.bf16.vlgmr.msra.gmra.mrb[4].mxu0 %vm469_vm10, %v686_v61 }
 0x2ca   : > { %v706_v0 = vpop.permute.xlu1 %705 }
 0x394   : > { %v795_v63 = vpop.f32.mrb[4].mxu1 }
 0x395   : > { %v1023_v1 = vpop.f32.mrb[5].mxu1  ;;  %v796_v2 = vadd.f32 %v795_v63, %v706_v0 }
 0x396   : > { %v798_v3 = vpop.f32.mrb[6].mxu1 }
 0x397   : > { %v803_v4 = vmax.f32 %v796_v2, 0.0  ;;  %v1024_v5 = vpop.f32.mrb[7].mxu1 }
 0x398   : > { %v754_v6 = vpop.f32.mrb[4].mxu0 }
 0x399   : > { %v984_v7 = vpack.c.bf16 %v803_v4, %v803_v4  ;;  %v755_v8 = vadd.f32 %v754_v6, %v706_v0  ;;  %v756_v10 = vpop.f32.mrb[5].mxu0 }
 0x39a   : > { %v757_v11 = vadd.f32 %v756_v10, %v706_v0  ;;  %v758_v12 = vpop.f32.mrb[6].mxu0 }
 0x39b   : > { %v801_v13 = vmax.f32 %v755_v8, 0.0  ;;  %v759_v14 = vpop.f32.mrb[7].mxu0  ;;  %819 = vst.msk [vmem:[%s330_s7 + $0x8] sm:$0xf] %vm818_vm11, %v984_v7 }
 0x39c   : > { %v802_v15 = vmax.f32 %v757_v11, 0.0 }
 0x39e   : > { %v983_v16 = vpack.c.bf16 %v802_v15, %v801_v13 }
 0x3a0   : > { %817 = vst [vmem:[%s330_s7] sm:$0xff] %v983_v16 }
 0x3a1   : > { %1415 = shalt.err (!%p1412_p0)
}
 0x3a2   : > { %s1416_s17 = scalar_lea.hbm %s1906_s28, 192  ;;  %s1420_s13 = scalar_lea.hbm %s1956_s6, 384 }
 0x3a3   : > { %p1417_p6 = scmp.ne.s32.totalorder %s1906_s28, %s1416_s17  ;;  %p1421_p8 = scmp.lt.u32.totalorder %s1906_s28, %s1956_s6 }
 0x3a4   : > { %p1422_p5 = scmp.lt.u32.totalorder %s1420_s13, %s1416_s17  ;;  %p1424_p7 = scmp.lt.u32.totalorder %s1416_s17, %s1906_s28 }
 0x3a5   : > { %p1418_p4 = pnand %p1417_p6, %p1975_p10 }
 0x3a6   : > { %p1423_p9 = por %p1422_p5, %p1421_p8 }
 0x3a7   : > { %p1419_p11 = pneg %p1418_p4 }
 0x3a8   : > { %p1425_p12 = por %p1424_p7, %p1423_p9 }
 0x3aa   : > { %p1426_p13 = pnand %p1425_p12, %p1419_p11 }
 0x3ac   : > { %1429 = shalt.err (!%p1426_p13)
}
 0x3ad   : > { %1049 = dma.vmem_to_hbm [thread:$0]  (%p1975_p10), %s1908_s10, 192, %s1906_s28, %s821_s12  }
 0x3ae PF: > { %s847_s7 = sand.u32 1, %s1468_s21   ;;  %p1976_p1 = scmp.ne.s32.totalorder %s1966_s30, 0 }
 0x3af   : > { %p1977_p3 = scmp.ge.s32.totalorder %s1480_s24, 2  ;;  %s848_s14 = scalar_lea.sflag [#allocation4], %s847_s7 }
 0x3b1   : > { %p1072_p2 = pnand %p1977_p3, %p1976_p1 }
 0x3b3   : > { %1463 = dma.done.wait (!%p1072_p2), %s848_s14, 192  }
 0x3b4   : > { %1465 = vsyncadd (!%p1072_p2), %s848_s14, 4294967104  ;;  %p22_p0 = scmp.ge.s32.totalorder %s1696_s9, 4   ;;  %s1978_s21 = smov %s1472_s22 }
 0x3b5   : > { %s1979_s22 = smov %s1476_s23  ;;  %s1980_s23 = smov %s1708_s8 }
 0x3b6   : > { %s1981_s24 = smov %s1696_s9  ;;  %24 = sbr.rel (!%p22_p0) target bundleno = 8 (0x8), region = 109 }
 0x3bd   :  { %853 = vsyncpa [#allocation3], 1 }
 0x3be   :  { %855 = vsyncpa [#allocation3 + $0x1], 1 }
 0x3bf   :  { %856 = vsyncpa [#allocation6], 1 }
 0x3c0   :  { %857 = vsyncpa [#allocation9], 1 }
 0x3c1   :  { %858 = vsyncpa [#allocation12], 1 }
 0x3c2   :  { %859 = vsyncpa [#allocation4], 1 }
 0x3c3   :  { %861 = vsyncpa [#allocation4 + $0x1], 1 }

// kernel: _lambda_.6
= control target key start
LH: loop header
LB: loop body
LE: loop exit
PB: predicated region body
PF: predicated region fallthrough
CT: control target
= control target key end

     0   :  { %11 = vsyncpa [#allocation3], 0  ;;  %s1656_s0 = inlined_call_operand.hbm [shape: bf16[2,8,144], index: 0, kind: input, shape index: {}]   ;;  %s1657_s1 = inlined_call_operand.hbm [shape: f32[1,144], index: 1, kind: input, shape index: {}]   ;;  %s1658_s2 = inlined_call_operand.hbm [shape: bf16[16,72], index: 2, kind: input, shape index: {}]   ;;  %s1659_s3 = inlined_call_operand.hbm [shape: f32[16,1], index: 3, kind: input, shape index: {}]   ;;  %s1660_s4 = inlined_call_operand.hbm [shape: bf16[16,144], index: 4, kind: input, shape index: {}]   ;;  %s1661_s5 = inlined_call_operand.hbm [shape: f32[16,1], index: 5, kind: input, shape index: {}]   ;;  %s1662_s6 = inlined_call_operand.hbm [shape: bf16[2,16,100], index: 6, kind: output, shape index: {}]  }
   0x1   :  { %13 = vsyncpa [#allocation3 + $0x1], 0 }
   0x2   :  { %14 = vsyncpa [#allocation6], 0 }
   0x3   :  { %15 = vsyncpa [#allocation9], 0 }
   0x4   :  { %16 = vsyncpa [#allocation12], 0 }
   0x5   :  { %17 = vsyncpa [#allocation4], 0 }
   0x6   :  { %19 = vsyncpa [#allocation4 + $0x1], 0  ;;  %s1315_s21 = smov 0   ;;  %s1317_s22 = smov 0  }
   0x7   :  { %s1319_s23 = smov 0   ;;  %s1321_s24 = smov 0  }
   0x8 LB: > { %s1256_s25 = smov [#allocation5]   ;;  %s1336_s27 = sadd.s32 4294967295, %s1254_s24   ;;  %s1254_s24 = sphi %s1321_s24, %s1693_s24   ;;  %s1250_s23 = sphi %s1319_s23, %s1692_s23   ;;  %s1246_s22 = sphi %s1317_s22, %s1691_s22   ;;  %s1242_s21 = sphi %s1315_s21, %s1690_s21  }
   0x9   : > { %s200_s26 = sshll.u32 %s1256_s25, 4  ;;  %p762_p0 = scmp.ge.s32.totalorder %s1254_s24, 1  ;;  %s201_s26 = int_to_ptr.vmem [resolvable:$true] %s200_s26 }
   0xa   : > { %p1663_p1 = scmp.eq.s32.totalorder %s1336_s27, 0  ;;  %p187_p2 = scmp.lt.s32.totalorder %s1254_s24, 3 }
   0xb   : > { %s1257_s29 = smov [#allocation8]   ;;  %s1258_s8 = smov [#allocation7]  }
   0xc   : > { %p1341_p3 = pnand %p762_p0, %p187_p2  ;;  %s223_s30 = sshll.u32 %s1257_s29, 4  ;;  %s1348_s30 = int_to_ptr.vmem [resolvable:$true] %s223_s30 }
   0xd   : > { %s210_s9 = sshll.u32 %s1258_s8, 4  ;;  %s1006_s12 = scalar_lea.hbm %s1657_s1, 32  ;;  %s1356_s9 = int_to_ptr.vmem [resolvable:$true] %s210_s9 }
   0xe   : > { %s1670_s28 = scalar_select %p1341_p3, 1, 0 }
   0xf   : > { %p840_p5 = pneg %p1341_p3  ;;  %p1007_p7 = scmp.ne.s32.totalorder %s1657_s1, %s1006_s12 }
  0x10   : > { %p1013_p11 = scmp.lt.u32.totalorder %s1006_s12, %s1657_s1 }
  0x11   : > { %p1352_p6 = pnand %p840_p5, %p1663_p1 }
  0x13   : > { %p1366_p8 = pneg %p1352_p6 }
  0x15   : > { %p1009_p9 = pnand %p1366_p8, %p1007_p7 }
  0x17   : > { %p1010_p10 = pneg %p1009_p9 }
  0x19   : > { %p1015_p12 = pnand %p1013_p11, %p1010_p10 }
  0x1b   : > { %1018 = shalt.err (!%p1015_p12)
}
  0x1c   : > { %s1019_s18 = scalar_lea.vmem %s201_s26, 32  ;;  %p1027_p5 = scmp.lt.s32.totalorder %s201_s26, %s201_s26 }
  0x1d   : > { %p1020_p13 = scmp.ne.s32.totalorder %s201_s26, %s1019_s18  ;;  %p1028_p4 = scmp.lt.s32.totalorder %s1019_s18, %s1019_s18 }
  0x1f   : > { %p1022_p0 = pnand %p1020_p13, %p1366_p8  ;;  %p1029_p1 = por %p1028_p4, %p1027_p5 }
  0x21   : > { %p1023_p2 = pneg %p1022_p0 }
  0x23   : > { %p1030_p3 = pnand %p1029_p1, %p1023_p2 }
  0x25   : > { %1033 = shalt.err (!%p1030_p3)
}
  0x26   : > { %843 = dma.hbm_to_vmem [thread:$0]  (!%p1352_p6), %s1657_s1, 32, %s201_s26, [#allocation6]  }
  0x27   : > { %s1034_s8 = scalar_lea.hbm %s1659_s3, 256 }
  0x28   : > { %p1035_p7 = scmp.ne.s32.totalorder %s1659_s3, %s1034_s8  ;;  %p1041_p1 = scmp.lt.u32.totalorder %s1034_s8, %s1659_s3 }
  0x2a   : > { %p1037_p9 = pnand %p1035_p7, %p1366_p8 }
  0x2c   : > { %p1038_p4 = pneg %p1037_p9 }
  0x2e   : > { %p1043_p3 = pnand %p1041_p1, %p1038_p4 }
  0x30   : > { %1046 = shalt.err (!%p1043_p3)
}
  0x31   : > { %s1047_s26 = scalar_lea.vmem %s1348_s30, 256  ;;  %p1055_p13 = scmp.lt.s32.totalorder %s1348_s30, %s1348_s30 }
  0x32   : > { %p1048_p10 = scmp.ne.s32.totalorder %s1348_s30, %s1047_s26  ;;  %p1056_p0 = scmp.lt.s32.totalorder %s1047_s26, %s1047_s26 }
  0x34   : > { %p1050_p11 = pnand %p1048_p10, %p1366_p8  ;;  %p1057_p2 = por %p1056_p0, %p1055_p13 }
  0x36   : > { %p1051_p12 = pneg %p1050_p11 }
  0x38   : > { %p1058_p5 = pnand %p1057_p2, %p1051_p12 }
  0x3a   : > { %1061 = shalt.err (!%p1058_p5)
}
  0x3b   : > { %s1665_s14 = smov 128   ;;  %s1667_s16 = smov 8  }
  0x3c   : > { %849 = dma.hbm_to_vmem [thread:$0]  (!%p1352_p6), %s1659_s3, 256, %s1348_s30, [#allocation9], %s1665_s14, %s1665_s14, %s1667_s16  }
  0x3d   : > { %s1062_s25 = scalar_lea.hbm %s1658_s2, 128 }
  0x3e   : > { %p1063_p7 = scmp.ne.s32.totalorder %s1658_s2, %s1062_s25  ;;  %p1069_p1 = scmp.lt.u32.totalorder %s1062_s25, %s1658_s2 }
  0x40   : > { %p1065_p9 = pnand %p1063_p7, %p1366_p8 }
  0x42   : > { %p1066_p4 = pneg %p1065_p9 }
  0x44   : > { %p1071_p3 = pnand %p1069_p1, %p1066_p4 }
  0x46   : > { %1074 = shalt.err (!%p1071_p3)
}
  0x47   : > { %s1075_s30 = scalar_lea.vmem %s1356_s9, 128  ;;  %p1083_p13 = scmp.lt.s32.totalorder %s1356_s9, %s1356_s9 }
  0x48   : > { %p1076_p10 = scmp.ne.s32.totalorder %s1356_s9, %s1075_s30  ;;  %p1084_p0 = scmp.lt.s32.totalorder %s1075_s30, %s1075_s30 }
  0x4a   : > { %p1078_p11 = pnand %p1076_p10, %p1366_p8  ;;  %p1085_p2 = por %p1084_p0, %p1083_p13 }
  0x4c   : > { %p1079_p12 = pneg %p1078_p11 }
  0x4e   : > { %p1086_p5 = pnand %p1085_p2, %p1079_p12 }
  0x50   : > { %1089 = shalt.err (!%p1086_p5)
}
  0x51   : > { %s1261_s12 = smov 64   ;;  %s1262_s13 = smov 4  }
  0x52   : > { %846 = dma.hbm_to_vmem [thread:$0]  (!%p1352_p6), %s1658_s2, 128, %s1356_s9, [#allocation6], %s1261_s12, %s1261_s12, %s1262_s13  }
  0x53   : > { %s1263_s18 = smov [#allocation10]   ;;  %s1264_s20 = smov [#allocation11]  }
  0x54   : > { %s236_s19 = sshll.u32 %s1263_s18, 4  ;;  %s249_s25 = sshll.u32 %s1264_s20, 4  ;;  %s237_s19 = int_to_ptr.vmem [resolvable:$true] %s236_s19  ;;  %s250_s25 = int_to_ptr.vmem [resolvable:$true] %s249_s25 }
  0x55   : > { %s1090_s10 = scalar_lea.hbm %s1660_s4, 256 }
  0x56   : > { %p1091_p7 = scmp.ne.s32.totalorder %s1660_s4, %s1090_s10  ;;  %p1097_p1 = scmp.lt.u32.totalorder %s1090_s10, %s1660_s4 }
  0x58   : > { %p1093_p9 = pnand %p1091_p7, %p1366_p8 }
  0x5a   : > { %p1094_p4 = pneg %p1093_p9 }
  0x5c   : > { %p1099_p3 = pnand %p1097_p1, %p1094_p4 }
  0x5e   : > { %1102 = shalt.err (!%p1099_p3)
}
  0x5f   : > { %s1103_s9 = scalar_lea.vmem %s237_s19, 256  ;;  %p1111_p13 = scmp.lt.s32.totalorder %s237_s19, %s237_s19 }
  0x60   : > { %p1104_p10 = scmp.ne.s32.totalorder %s237_s19, %s1103_s9  ;;  %p1112_p0 = scmp.lt.s32.totalorder %s1103_s9, %s1103_s9 }
  0x62   : > { %p1106_p11 = pnand %p1104_p10, %p1366_p8  ;;  %p1113_p2 = por %p1112_p0, %p1111_p13 }
  0x64   : > { %p1107_p12 = pneg %p1106_p11 }
  0x66   : > { %p1114_p5 = pnand %p1113_p2, %p1107_p12 }
  0x68   : > { %1117 = shalt.err (!%p1114_p5)
}
  0x69   : > { %s1673_s12 = smov 8   ;;  %s1674_s13 = smov 128  }
  0x6a   : > { %852 = dma.hbm_to_vmem [thread:$0]  (!%p1352_p6), %s1660_s4, 256, %s237_s19, [#allocation9], %s1674_s13, %s1674_s13, %s1673_s12  }
  0x6b   : > { %s1118_s18 = scalar_lea.hbm %s1661_s5, 256 }
  0x6c   : > { %p1119_p7 = scmp.ne.s32.totalorder %s1661_s5, %s1118_s18  ;;  %p1125_p1 = scmp.lt.u32.totalorder %s1118_s18, %s1661_s5 }
  0x6e   : > { %p1121_p9 = pnand %p1119_p7, %p1366_p8 }
  0x70   : > { %p1122_p4 = pneg %p1121_p9 }
  0x72   : > { %p1127_p3 = pnand %p1125_p1, %p1122_p4 }
  0x74   : > { %1130 = shalt.err (!%p1127_p3)
}
  0x75   : > { %s1131_s11 = scalar_lea.vmem %s250_s25, 256  ;;  %p1139_p13 = scmp.lt.s32.totalorder %s250_s25, %s250_s25 }
  0x76   : > { %p1132_p10 = scmp.ne.s32.totalorder %s250_s25, %s1131_s11  ;;  %p1140_p0 = scmp.lt.s32.totalorder %s1131_s11, %s1131_s11 }
  0x78   : > { %p1134_p11 = pnand %p1132_p10, %p1366_p8  ;;  %p1141_p2 = por %p1140_p0, %p1139_p13 }
  0x7a   : > { %p1135_p12 = pneg %p1134_p11 }
  0x7c   : > { %p1142_p5 = pnand %p1141_p2, %p1135_p12 }
  0x7e   : > { %1145 = shalt.err (!%p1142_p5)
}
  0x7f   : > { %855 = dma.hbm_to_vmem [thread:$0]  (!%p1352_p6), %s1661_s5, 256, %s250_s25, [#allocation12], %s1674_s13, %s1674_s13, %s1673_s12  }
  0x80   : > { %s761_s7 = sadd.s32 4294967294, %s1254_s24   ;;  %s1475_s15 = sadd.s32 1, %s1254_s24  }
  0x81   : > { %s32_s9 = sadd.s32 1, %s1250_s23  ;;  %s29_s14 = ssub.s32 %s1254_s24, %s1475_s15 }
  0x82   : > { %p39_p8 = scmp.ne.s32.totalorder %s1250_s23, %s1246_s22  ;;  %p30_p7 = scmp.eq.s32.totalorder %s29_s14, 0 }
  0x83   : > { %p40_p9 = scmp.eq.s32.totalorder %s1254_s24, 0  ;;  %p45_p4 = scmp.ne.s32.totalorder %s1246_s22, %s1242_s21 }
  0x84   : > { %p174_p1 = scmp.eq.s32.totalorder %s1336_s27, 1  ;;  %p1675_p10 = scmp.eq.s32.totalorder %s1336_s27, 0 }
  0x85   : > { %s1487_s16 = scalar_select %p30_p7, %s1250_s23, %s32_s9  }
  0x86   : > { %p41_p3 = por %p40_p9, %p39_p8  ;;  %p1491_p11 = por %p1675_p10, %p45_p4 }
  0x87   : > { %p1495_p6 = por %p174_p1, %p39_p8  ;;  %p180_p12 = scmp.eq.s32.totalorder %s761_s7, 1 }
  0x88   : > { %p869_p13 = scmp.lt.s32.totalorder %s1254_s24, 2  ;;  %s263_s12 = sand.u32 1, %s1250_s23  }
  0x89   : > { %s1677_s25 = scalar_select %p1495_p6, 1, 0 }
  0x8a   : > { %p1501_p0 = por %p180_p12, %p45_p4  ;;  %s769_s17 = sshll.u32 %s263_s12, 3 }
  0x8b   : > { %s792_s18 = sshll.u32 %s1254_s24, 7  ;;  %s267_s10 = scalar_lea.vmem [#allocation2], %s769_s17 }
  0x8c   : > { %s1678_s13 = scalar_select %p1501_p0, 1, 0 }
  0x8d   : > { %s1509_s8 = scalar_lea.hbm %s1656_s0, %s792_s18  ;;  %s275_s11 = sshll.u32 %s267_s10, 4  ;;  %s1515_s11 = int_to_ptr.vmem [resolvable:$true] %s275_s11 }
  0x8e   : > { %p1511_p2 = pnand %p869_p13, %p41_p3  ;;  %s264_s30 = scalar_lea.sflag [#allocation3], %s263_s12 }
  0x8f   : > { %s1146_s7 = scalar_lea.hbm %s1509_s8, 128  ;;  %s1151_s17 = scalar_lea.hbm %s1656_s0, 256 }
  0x90   : > { %p1147_p5 = scmp.ne.s32.totalorder %s1509_s8, %s1146_s7  ;;  %p1148_p8 = pneg %p1511_p2 }
  0x91   : > { %p1152_p4 = scmp.lt.u32.totalorder %s1509_s8, %s1656_s0  ;;  %p1153_p1 = scmp.lt.u32.totalorder %s1151_s17, %s1146_s7 }
  0x92   : > { %p1149_p7 = pnand %p1148_p8, %p1147_p5  ;;  %p1155_p10 = scmp.lt.u32.totalorder %s1146_s7, %s1509_s8 }
  0x93   : > { %p1154_p3 = por %p1153_p1, %p1152_p4 }
  0x94   : > { %p1150_p9 = pneg %p1149_p7 }
  0x95   : > { %p1156_p12 = por %p1155_p10, %p1154_p3 }
  0x97   : > { %p1157_p13 = pnand %p1156_p12, %p1150_p9 }
  0x99   : > { %1160 = shalt.err (!%p1157_p13)
}
  0x9a   : > { %s1161_s12 = scalar_lea.vmem %s1515_s11, 128  ;;  %s1265_s29 = smov [#allocation2]  }
  0x9b   : > { %p1162_p5 = scmp.ne.s32.totalorder %s1515_s11, %s1161_s12  ;;  %s1166_s10 = sshll.u32 %s1265_s29, 4  ;;  %s1167_s10 = int_to_ptr.vmem [resolvable:$false] %s1166_s10 }
  0x9c   : > { %s1168_s9 = scalar_lea.vmem %s1167_s10, 256  ;;  %p1169_p6 = scmp.lt.s32.totalorder %s1515_s11, %s1167_s10 }
  0x9d   : > { %p1164_p7 = pnand %p1162_p5, %p1148_p8  ;;  %p1170_p4 = scmp.lt.s32.totalorder %s1168_s9, %s1161_s12 }
  0x9f   : > { %p1165_p0 = pneg %p1164_p7  ;;  %p1171_p1 = por %p1170_p4, %p1169_p6 }
  0xa1   : > { %p1172_p3 = pnand %p1171_p1, %p1165_p0 }
  0xa3   : > { %1175 = shalt.err (!%p1172_p3)
}
  0xa4   : > { %859 = dma.hbm_to_vmem [thread:$0]  (!%p1511_p2), %s1509_s8, 128, %s1515_s11, %s264_s30  }
  0xa5   : > { %p1680_p9 = scmp.ne.s32.totalorder %s1670_s28, 0 }
  0xa6   : > { %s1545_s7 = sand.u32 (!%p1680_p9), 1, %s1246_s22  }
  0xa7   : > { %284 = sbr.rel (%p1680_p9) target bundleno = 934 (0x3a6), region = 44  ;;  %s773_s14 = sshll.u32 (!%p1680_p9), %s1545_s7, 3 }
  0xa8   : > { %s287_s17 = scalar_lea.sflag (!%p1680_p9), [#allocation3], %s1545_s7  ;;  %s290_s18 = scalar_lea.vmem (!%p1680_p9), [#allocation2], %s773_s14 }
  0xae   : > { %1221 = dma.done.wait (%p1491_p11), %s287_s17, 128  }
  0xaf   : > { %1223 = vsyncadd (%p1491_p11), %s287_s17, 4294967168  ;;  %p1681_p6 = scmp.eq.s32.totalorder %s1336_s27, 0 }
  0xb1   : > { %1225 = dma.done.wait (%p1681_p6), [#allocation6], 160   ;;  %p1682_p0 = pmov %p1681_p6 }
  0xb3   : > { %1227 = vsyncadd (%p1682_p0), [#allocation6], 4294967136  ;;  %p1683_p2 = pmov %p1682_p0 }
  0xb4   : > { %p1684_p8 = pmov %p1682_p0 }
  0xb5   : > { %1229 = dma.done.wait (%p1683_p2), [#allocation9], 512  }
  0xb6   : > { %1231 = vsyncadd (%p1684_p8), [#allocation9], 4294966784  ;;  %p1685_p10 = pmov %p1682_p0 }
  0xb7   : > { %p1686_p12 = pmov %p1682_p0 }
  0xb8   : > { %1233 = dma.done.wait (%p1685_p10), [#allocation12], 256  }
  0xb9   : > { %1235 = vsyncadd (%p1686_p12), [#allocation12], 4294967040  ;;  %v1266_v0 = vmov 0.0   ;;  %v340_v1 = vld [vmem:[%s290_s18] sm:$0xff]  ;;  %s1267_s28 = smov 127   ;;  %s1268_s26 = smov 126   ;;  %v470_v5 = vlaneseq }
  0xba   : > { %802 = vmatprep.subr.bf16.mxu0 %v1266_v0  ;;  %v341_v2 = vunpack.c.l.bf16 %v340_v1  ;;  %v342_v3 = vunpack.c.h.bf16 %v340_v1  ;;  %s1269_s8 = smov 118   ;;  %s1270_s11 = smov 117   ;;  %vm1273_vm0 = vmmov 0   ;;  %v1276_v6 = vmov 0   ;;  %v401_v7 = vld [vmem:[#allocation8 + $0x8] sm:$0xff]  ;;  %v400_v8 = vld [vmem:[#allocation8] sm:$0xff] }
  0xbb   : > { %s1271_s19 = smov 116   ;;  %s1272_s30 = smov 108   ;;  %812 = vmatprep.mubr.msk.bf16.mxu0 %vm1273_vm0, %v1266_v0  ;;  %961 = vset.pattern.permute.xlu1 %v1276_v6  ;;  %v471_v9 = vshrl.u32 %v470_v5, 7  ;;  %v468_v10 = vld [vmem:[#allocation5] sm:$0x3]  ;;  %vm355_vm1 = vcmask 965632  }
  0xbc   : > { %344 = vrot.lane.b32.xlu0 %v341_v2, %s1267_s28  ;;  %347 = vrot.lane.b32.xlu1 %v341_v2, %s1268_s26  ;;  %v930_v4 = vpack.i.bf16 %v342_v3, %v341_v2  ;;  %s1274_s20 = smov 107   ;;  %s1275_s12 = smov 106   ;;  %vm362_vm2 = vcmask 957440   ;;  %vm369_vm3 = vcmask 949248   ;;  %vm376_vm4 = vcmask 883712   ;;  %v1002_v47 = vld [vmem:[#allocation7] sm:$0xff]  }
  0xbd   : > { %960 = vset.pattern.permute.xlu0 %v1276_v6  ;;  %572 = vmatprep.subr.bf16.mxu1 %v1276_v6  ;;  %v472_v11 = vsub.s32 0, %v471_v9  ;;  %v476_v12 = vsub.s32 1, %v471_v9  ;;  %vm383_vm5 = vcmask 875520   ;;  %vm390_vm6 = vcmask 867328   ;;  %v548_v1 = vld [vmem:[#allocation11 + $0x8] sm:$0xff]  ;;  %s795_s29 = sshll.u32 %s1336_s27, 7 }
  0xbe   : > { %vm421_vm7 = vcmask 1043456   ;;  %vm417_vm8 = vcmask 588800   ;;  %v1005_v3 = vld [vmem:[#allocation10 + $0x4] ss:$8 sps:$4 sm:$0xff]   ;;  %vm568_vm9 = vcmask 130048   ;;  %s338_s10 = scalar_lea.vmem [#allocation13], %s773_s14 }
  0xbf   : > { %v473_v13 = vrot.slane %v468_v10, %v472_v11  ;;  %v477_v14 = vrot.slane %v468_v10, %v476_v12  ;;  %784 = vmatprep.mubr.msk.bf16.mxu1 %vm568_vm9, %v1005_v3  ;;  %s640_s9 = sshll.u32 %s338_s10, 4  ;;  %vm623_vm10 = vcmask 814080   ;;  %s627_s27 = scalar_lea.sflag [#allocation4], %s1545_s7  ;;  %s1612_s9 = int_to_ptr.vmem [resolvable:$true] %s640_s9 }
  0xc0   : > { %931 = vrot.lane.b32.xlu0 %v930_v4, %s1269_s8  ;;  %936 = vrot.lane.b32.xlu1 %v930_v4, %s1270_s11  ;;  %p1687_p13 = scmp.ne.s32.totalorder %s1677_s25, 0  ;;  %s1277_s14 = smov [#allocation13]  }
  0xc4   : > { %941 = vrot.lane.b32.xlu0 %v930_v4, %s1271_s19  ;;  %946 = vrot.lane.b32.xlu1 %v930_v4, %s1272_s30 }
  0xc8   : > { %951 = vrot.lane.b32.xlu0 %v930_v4, %s1274_s20  ;;  %956 = vrot.lane.b32.xlu1 %v930_v4, %s1275_s12 }
  0xcc   : > { %409 = vperm.xlu1 %961, %v401_v7   ;;  %404 = vperm.xlu0 %960, %v400_v8  }
  0xd0   : > { %478 = vrot.lane.b32.xlu1 %v473_v13, %s1270_s11  ;;  %480 = vrot.lane.b32.xlu0 %v477_v14, %s1270_s11 }
 0x12e   : > { %v345_v15 = vpop.permute.xlu0 %344  ;;  %v348_v16 = vpop.permute.xlu1 %347 }
 0x12f   : > { %v395_v17 = vpack.c.bf16 %v345_v15, %v341_v2  ;;  %v547_v2 = vld [vmem:[#allocation11] sm:$0xff] }
 0x131   : > { %803 = vmatpush3.bf16.msra.mxu0 %v395_v17 }
 0x132   : > { %v932_v18 = vpop.permute.xlu0 %931  ;;  %v937_v19 = vpop.permute.xlu1 %936  ;;  %804 = vmatprep.subr.bf16.mxu0 %v1266_v0 }
 0x133   : > { %v934_v20 = vunpack.i.h.bf16 %v932_v18  ;;  %v933_v21 = vunpack.i.l.bf16 %v932_v18  ;;  %v939_v22 = vunpack.i.h.bf16 %v937_v19  ;;  %v938_v23 = vunpack.i.l.bf16 %v937_v19 }
 0x135   : > { %v356_v24 = vsel %vm355_vm1, %v933_v21, %v934_v20  ;;  %v363_v28 = vsel %vm362_vm2, %v938_v23, %v939_v22 }
 0x136   : > { %v942_v25 = vpop.permute.xlu0 %941  ;;  %v396_v26 = vpack.c.bf16 %v356_v24, %v348_v16  ;;  %v947_v27 = vpop.permute.xlu1 %946 }
 0x137   : > { %v944_v29 = vunpack.i.h.bf16 %v942_v25  ;;  %v943_v30 = vunpack.i.l.bf16 %v942_v25  ;;  %v949_v31 = vunpack.i.h.bf16 %v947_v27  ;;  %v948_v32 = vunpack.i.l.bf16 %v947_v27 }
 0x138   : > { %805 = vmatpush3.bf16.msra.mxu0 %v396_v26 }
 0x139   : > { %806 = vmatprep.subr.bf16.mxu0 %v1266_v0  ;;  %v370_v33 = vsel %vm369_vm3, %v943_v30, %v944_v29  ;;  %v377_v37 = vsel %vm376_vm4, %v948_v32, %v949_v31 }
 0x13a   : > { %v952_v34 = vpop.permute.xlu0 %951  ;;  %v397_v35 = vpack.c.bf16 %v370_v33, %v363_v28  ;;  %v957_v36 = vpop.permute.xlu1 %956 }
 0x13b   : > { %v954_v38 = vunpack.i.h.bf16 %v952_v34  ;;  %v953_v39 = vunpack.i.l.bf16 %v952_v34  ;;  %v959_v40 = vunpack.i.h.bf16 %v957_v36  ;;  %v958_v41 = vunpack.i.l.bf16 %v957_v36 }
 0x13c   : > { %807 = vmatpush3.bf16.msra.mxu0 %v397_v35 }
 0x13d   : > { %808 = vmatprep.subr.bf16.mxu0 %v1266_v0  ;;  %v384_v42 = vsel %vm383_vm5, %v953_v39, %v954_v38  ;;  %v391_v43 = vsel %vm390_vm6, %v958_v41, %v959_v40 }
 0x13e   : > { %v398_v44 = vpack.c.bf16 %v384_v42, %v377_v37  ;;  %v399_v45 = vpack.c.bf16 %v391_v43, %v391_v43  ;;  %v1003_v37 = vld [vmem:[#allocation10] ss:$8 sps:$4 sm:$0xff]  }
 0x140   : > { %809 = vmatpush3.bf16.msra.mxu0 %v398_v44  ;;  %v423_v46 = vsel %vm421_vm7, %v399_v45, 0 }
 0x141   : > { %810 = vmatprep.subr.bf16.mxu0 %v1266_v0 }
 0x144   : > { %811 = vmatpush3.bf16.msra.mxu0 %v423_v46 }
 0x147   : > { %813 = vmatmul.mubr.msk.bf16.vlgmr.msra.gmra.mrb[0].mxu0 %vm417_vm8, %v1002_v47 }
 0x14b   : > { %v410_v48 = vpop.permute.xlu1 %409  ;;  %v405_v49 = vpop.permute.xlu0 %404 }
 0x14f   : > { %v479_v51 = vpop.permute.xlu1 %478  ;;  %v481_v54 = vpop.permute.xlu0 %480 }
 0x150   : > { %v482_v59 = vsel %vm362_vm2, %v479_v51, %v481_v54 }
 0x21a   : > { %v459_v50 = vpop.f32.mrb[0].mxu0 }
 0x21b   : > { %v460_v52 = vadd.f32 %v459_v50, %v405_v49  ;;  %v814_v53 = vpop.f32.mrb[1].mxu0 }
 0x21c   : > { %v462_v55 = vpop.f32.mrb[2].mxu0 }
 0x21d   : > { %v466_v56 = vmax.f32 %v460_v52, 0.0  ;;  %v463_v57 = vadd.f32 %v462_v55, %v410_v48  ;;  %v815_v58 = vpop.f32.mrb[3].mxu0 }
 0x21f   : > { %v467_v60 = vmax.f32 %v463_v57, 0.0  ;;  %v484_v61 = vmul.f32 %v482_v59, %v466_v56 }
 0x221   : > { %v485_v62 = vmul.f32 %v482_v59, %v467_v60 }
 0x223   : > { %v967_v63 = vpack.i.bf16 %v485_v62, %v484_v61  ;;  %v538_v0 = vpack.c.bf16 %v485_v62, %v484_v61 }
 0x225   : > { %968 = vrot.lane.b32.xlu0 %v967_v63, %s1268_s26  ;;  %963 = vrot.lane.b32.xlu1 %v967_v63, %s1267_s28  ;;  %s1610_s28 = scalar_lea.hbm %s1662_s6, %s795_s29  ;;  %s1176_s26 = scalar_lea.vmem %s1612_s9, 128 }
 0x226   : > { %573 = vmatpush1.bf16.msra.mxu1 %v538_v0  ;;  %p1177_p11 = scmp.ne.s32.totalorder %s1612_s9, %s1176_s26 }
 0x227   : > { %574 = vmatprep.subr.bf16.mxu1 %v1276_v6 }
 0x228   : > { %p1178_p5 = pnand %p1177_p11, %p1687_p13 }
 0x229   : > { %978 = vrot.lane.b32.xlu0 %v967_v63, %s1270_s11  ;;  %973 = vrot.lane.b32.xlu1 %v967_v63, %s1269_s8  ;;  %s1180_s8 = sshll.u32 %s1277_s14, 4  ;;  %s1181_s8 = int_to_ptr.vmem [resolvable:$false] %s1180_s8 }
 0x22a   : > { %p1179_p7 = pneg %p1178_p5  ;;  %s1182_s11 = scalar_lea.vmem %s1181_s8, 256 }
 0x22b   : > { %p1183_p4 = scmp.lt.s32.totalorder %s1612_s9, %s1181_s8  ;;  %p1184_p1 = scmp.lt.s32.totalorder %s1182_s11, %s1176_s26 }
 0x22d   : > { %988 = vrot.lane.b32.xlu0 %v967_v63, %s1272_s30  ;;  %983 = vrot.lane.b32.xlu1 %v967_v63, %s1271_s19  ;;  %p1185_p3 = por %p1184_p1, %p1183_p4 }
 0x22f   : > { %p1186_p9 = pnand %p1185_p3, %p1179_p7 }
 0x231   : > { %998 = vrot.lane.b32.xlu0 %v967_v63, %s1275_s12  ;;  %993 = vrot.lane.b32.xlu1 %v967_v63, %s1274_s20 }
 0x235   : > { %556 = vperm.xlu0 %960, %v548_v1   ;;  %551 = vperm.xlu1 %961, %v547_v2  }
 0x297   : > { %v969_v4 = vpop.permute.xlu0 %968  ;;  %v964_v5 = vpop.permute.xlu1 %963 }
 0x298   : > { %v966_v7 = vunpack.i.h.bf16 %v964_v5  ;;  %v965_v8 = vunpack.i.l.bf16 %v964_v5  ;;  %v971_v9 = vunpack.i.h.bf16 %v969_v4  ;;  %v970_v10 = vunpack.i.l.bf16 %v969_v4 }
 0x29a   : > { %v539_v11 = vpack.c.bf16 %v966_v7, %v965_v8  ;;  %v540_v13 = vpack.c.bf16 %v971_v9, %v970_v10 }
 0x29b   : > { %v974_v12 = vpop.permute.xlu1 %973  ;;  %v979_v16 = vpop.permute.xlu0 %978 }
 0x29c   : > { %575 = vmatpush1.bf16.msra.mxu1 %v539_v11  ;;  %v976_v14 = vunpack.i.h.bf16 %v974_v12  ;;  %v975_v15 = vunpack.i.l.bf16 %v974_v12  ;;  %v981_v17 = vunpack.i.h.bf16 %v979_v16  ;;  %v980_v18 = vunpack.i.l.bf16 %v979_v16 }
 0x29d   : > { %576 = vmatprep.subr.bf16.mxu1 %v1276_v6 }
 0x29e   : > { %v541_v19 = vpack.c.bf16 %v976_v14, %v975_v15  ;;  %v542_v21 = vpack.c.bf16 %v981_v17, %v980_v18 }
 0x29f   : > { %v984_v20 = vpop.permute.xlu1 %983  ;;  %v989_v24 = vpop.permute.xlu0 %988 }
 0x2a0   : > { %577 = vmatpush1.bf16.msra.mxu1 %v540_v13  ;;  %v986_v22 = vunpack.i.h.bf16 %v984_v20  ;;  %v985_v23 = vunpack.i.l.bf16 %v984_v20  ;;  %v991_v25 = vunpack.i.h.bf16 %v989_v24  ;;  %v990_v26 = vunpack.i.l.bf16 %v989_v24 }
 0x2a1   : > { %578 = vmatprep.subr.bf16.mxu1 %v1276_v6 }
 0x2a2   : > { %v543_v27 = vpack.c.bf16 %v986_v22, %v985_v23  ;;  %v544_v29 = vpack.c.bf16 %v991_v25, %v990_v26 }
 0x2a3   : > { %v994_v28 = vpop.permute.xlu1 %993  ;;  %v999_v32 = vpop.permute.xlu0 %998 }
 0x2a4   : > { %579 = vmatpush1.bf16.msra.mxu1 %v541_v19  ;;  %v996_v30 = vunpack.i.h.bf16 %v994_v28  ;;  %v995_v31 = vunpack.i.l.bf16 %v994_v28  ;;  %v1001_v33 = vunpack.i.h.bf16 %v999_v32  ;;  %v1000_v34 = vunpack.i.l.bf16 %v999_v32 }
 0x2a5   : > { %580 = vmatprep.subr.bf16.mxu1 %v1276_v6 }
 0x2a6   : > { %v545_v35 = vpack.c.bf16 %v996_v30, %v995_v31  ;;  %v546_v36 = vpack.c.bf16 %v1001_v33, %v1000_v34 }
 0x2a8   : > { %581 = vmatpush1.bf16.msra.mxu1 %v542_v21 }
 0x2a9   : > { %582 = vmatprep.subr.bf16.mxu1 %v1276_v6 }
 0x2ac   : > { %583 = vmatpush1.bf16.msra.mxu1 %v543_v27 }
 0x2ad   : > { %584 = vmatprep.subr.bf16.mxu1 %v1276_v6 }
 0x2b0   : > { %585 = vmatpush1.bf16.msra.mxu1 %v544_v29 }
 0x2b1   : > { %586 = vmatprep.subr.bf16.mxu1 %v1276_v6 }
 0x2b4   : > { %587 = vmatpush1.bf16.msra.mxu1 %v545_v35  ;;  %v552_v38 = vpop.permute.xlu1 %551  ;;  %v557_v42 = vpop.permute.xlu0 %556 }
 0x2b5   : > { %588 = vmatprep.subr.bf16.mxu1 %v1276_v6 }
 0x2b8   : > { %589 = vmatpush1.bf16.msra.mxu1 %v546_v36 }
 0x2bb   : > { %605 = vmatmul.mubr.bf16.vlgmr.msra.gmra.mrb[0].mxu1 %v1003_v37 }
 0x38e   : > { %v606_v39 = vpop.f32.mrb[0].mxu1 }
 0x38f   : > { %v607_v40 = vadd.f32 %v606_v39, %v552_v38  ;;  %v608_v41 = vpop.f32.mrb[1].mxu1 }
 0x390   : > { %v609_v43 = vpop.f32.mrb[2].mxu1 }
 0x391   : > { %v613_v44 = vmax.f32 %v607_v40, 0.0  ;;  %v610_v45 = vadd.f32 %v609_v43, %v557_v42  ;;  %v611_v46 = vpop.f32.mrb[3].mxu1 }
 0x393   : > { %v793_v6 = vpack.c.bf16 %v613_v44, %v613_v44  ;;  %v614_v47 = vmax.f32 %v610_v45, 0.0 }
 0x395   : > { %624 = vst.msk [vmem:[%s338_s10] sm:$0xf] %vm623_vm10, %v793_v6  ;;  %v794_v48 = vpack.c.bf16 %v614_v47, %v614_v47 }
 0x397   : > { %625 = vst.msk [vmem:[%s338_s10 + $0x4] sm:$0xf] %vm623_vm10, %v794_v48 }
 0x398   : > { %1189 = shalt.err (!%p1186_p9)
}
 0x399   : > { %s1190_s19 = scalar_lea.hbm %s1610_s28, 128  ;;  %s1194_s12 = scalar_lea.hbm %s1662_s6, 256 }
 0x39a   : > { %p1191_p6 = scmp.ne.s32.totalorder %s1610_s28, %s1190_s19  ;;  %p1195_p8 = scmp.lt.u32.totalorder %s1610_s28, %s1662_s6 }
 0x39b   : > { %p1196_p10 = scmp.lt.u32.totalorder %s1194_s12, %s1190_s19  ;;  %p1198_p11 = scmp.lt.u32.totalorder %s1190_s19, %s1610_s28 }
 0x39c   : > { %p1192_p0 = pnand %p1191_p6, %p1687_p13 }
 0x39d   : > { %p1197_p12 = por %p1196_p10, %p1195_p8 }
 0x39e   : > { %p1193_p2 = pneg %p1192_p0 }
 0x39f   : > { %p1199_p5 = por %p1198_p11, %p1197_p12 }
 0x3a1   : > { %p1200_p7 = pnand %p1199_p5, %p1193_p2 }
 0x3a3   : > { %1203 = shalt.err (!%p1200_p7)
}
 0x3a4   : > { %s1278_s17 = smov 64   ;;  %s1279_s18 = smov 4  }
 0x3a5   : > { %838 = dma.vmem_to_hbm [thread:$0]  (%p1687_p13), %s1612_s9, 128, %s1610_s28, %s627_s27, %s1278_s17, %s1278_s17, %s1279_s18  }
 0x3a6 PF: > { %s655_s26 = sand.u32 1, %s1242_s21   ;;  %p1688_p4 = scmp.ne.s32.totalorder %s1678_s13, 0 }
 0x3a7   : > { %p1689_p1 = scmp.ge.s32.totalorder %s1254_s24, 2  ;;  %s656_s14 = scalar_lea.sflag [#allocation4], %s655_s26 }
 0x3a9   : > { %p861_p3 = pnand %p1689_p1, %p1688_p4 }
 0x3ab   : > { %1237 = dma.done.wait (!%p861_p3), %s656_s14, 128  }
 0x3ac   : > { %1239 = vsyncadd (!%p861_p3), %s656_s14, 4294967168  ;;  %p22_p9 = scmp.ge.s32.totalorder %s1475_s15, 4   ;;  %s1690_s21 = smov %s1246_s22 }
 0x3ad   : > { %s1691_s22 = smov %s1250_s23  ;;  %s1692_s23 = smov %s1487_s16 }
 0x3ae   : > { %s1693_s24 = smov %s1475_s15  ;;  %24 = sbr.rel (!%p22_p9) target bundleno = 8 (0x8), region = 109 }
 0x3b5   :  { %661 = vsyncpa [#allocation3], 1 }
 0x3b6   :  { %663 = vsyncpa [#allocation3 + $0x1], 1 }
 0x3b7   :  { %664 = vsyncpa [#allocation6], 1 }
 0x3b8   :  { %665 = vsyncpa [#allocation9], 1 }
 0x3b9   :  { %666 = vsyncpa [#allocation12], 1 }
 0x3ba   :  { %667 = vsyncpa [#allocation4], 1 }
 0x3bb   :  { %669 = vsyncpa [#allocation4 + $0x1], 1 }

// kernel: _lambda_.7
= control target key start
LH: loop header
LB: loop body
LE: loop exit
PB: predicated region body
PF: predicated region fallthrough
CT: control target
= control target key end

     0   :  { %11 = vsyncpa [#allocation3], 0  ;;  %s1970_s0 = inlined_call_operand.hbm [shape: bf16[2,16,64], index: 0, kind: input, shape index: {}]   ;;  %s1971_s1 = inlined_call_operand.hbm [shape: f32[1,64], index: 1, kind: input, shape index: {}]   ;;  %s1972_s2 = inlined_call_operand.hbm [shape: bf16[32,144], index: 2, kind: input, shape index: {}]   ;;  %s1973_s3 = inlined_call_operand.hbm [shape: f32[32,1], index: 3, kind: input, shape index: {}]   ;;  %s1974_s4 = inlined_call_operand.hbm [shape: bf16[32,288], index: 4, kind: input, shape index: {}]   ;;  %s1975_s5 = inlined_call_operand.hbm [shape: f32[32,1], index: 5, kind: input, shape index: {}]   ;;  %s1976_s6 = inlined_call_operand.hbm [shape: bf16[2,32,36], index: 6, kind: output, shape index: {}]  }
   0x1   :  { %13 = vsyncpa [#allocation3 + $0x1], 0 }
   0x2   :  { %14 = vsyncpa [#allocation6], 0 }
   0x3   :  { %15 = vsyncpa [#allocation9], 0 }
   0x4   :  { %16 = vsyncpa [#allocation12], 0 }
   0x5   :  { %17 = vsyncpa [#allocation4], 0 }
   0x6   :  { %19 = vsyncpa [#allocation4 + $0x1], 0  ;;  %s1620_s21 = smov 0   ;;  %s1622_s22 = smov 0  }
   0x7   :  { %s1624_s23 = smov 0   ;;  %s1626_s24 = smov 0  }
   0x8 LB: > { %s1561_s25 = smov [#allocation5]   ;;  %s1641_s27 = sadd.s32 4294967295, %s1559_s24   ;;  %s1559_s24 = sphi %s1626_s24, %s2001_s24   ;;  %s1555_s23 = sphi %s1624_s23, %s2000_s23   ;;  %s1551_s22 = sphi %s1622_s22, %s1999_s22   ;;  %s1547_s21 = sphi %s1620_s21, %s1998_s21  }
   0x9   : > { %s200_s26 = sshll.u32 %s1561_s25, 4  ;;  %p970_p0 = scmp.ge.s32.totalorder %s1559_s24, 1  ;;  %s1646_s26 = int_to_ptr.vmem [resolvable:$true] %s200_s26 }
   0xa   : > { %p1977_p1 = scmp.eq.s32.totalorder %s1641_s27, 0  ;;  %p187_p2 = scmp.lt.s32.totalorder %s1559_s24, 3 }
   0xb   : > { %s1562_s29 = smov [#allocation8]   ;;  %s1563_s8 = smov [#allocation7]  }
   0xc   : > { %p1648_p3 = pnand %p970_p0, %p187_p2  ;;  %s223_s30 = sshll.u32 %s1562_s29, 4  ;;  %s1661_s30 = int_to_ptr.vmem [resolvable:$true] %s223_s30 }
   0xd   : > { %s210_s9 = sshll.u32 %s1563_s8, 4  ;;  %s1311_s12 = scalar_lea.hbm %s1971_s1, 16  ;;  %s1663_s9 = int_to_ptr.vmem [resolvable:$true] %s210_s9 }
   0xe   : > { %s1980_s28 = scalar_select %p1648_p3, 1, 0 }
   0xf   : > { %p1083_p5 = pneg %p1648_p3  ;;  %p1312_p7 = scmp.ne.s32.totalorder %s1971_s1, %s1311_s12 }
  0x10   : > { %p1318_p11 = scmp.lt.u32.totalorder %s1311_s12, %s1971_s1 }
  0x11   : > { %p1657_p6 = pnand %p1083_p5, %p1977_p1 }
  0x13   : > { %p1673_p8 = pneg %p1657_p6 }
  0x15   : > { %p1314_p9 = pnand %p1673_p8, %p1312_p7 }
  0x17   : > { %p1315_p10 = pneg %p1314_p9 }
  0x19   : > { %p1320_p12 = pnand %p1318_p11, %p1315_p10 }
  0x1b   : > { %1323 = shalt.err (!%p1320_p12)
}
  0x1c   : > { %s1324_s18 = scalar_lea.vmem %s1646_s26, 16  ;;  %s1331_s19 = scalar_lea.vmem %s1646_s26, 32 }
  0x1d   : > { %p1325_p13 = scmp.ne.s32.totalorder %s1646_s26, %s1324_s18  ;;  %p1332_p5 = scmp.lt.s32.totalorder %s1646_s26, %s1646_s26 }
  0x1e   : > { %p1333_p7 = scmp.lt.s32.totalorder %s1331_s19, %s1324_s18 }
  0x1f   : > { %p1327_p0 = pnand %p1325_p13, %p1673_p8 }
  0x20   : > { %p1334_p9 = por %p1333_p7, %p1332_p5 }
  0x21   : > { %p1328_p2 = pneg %p1327_p0 }
  0x23   : > { %p1335_p4 = pnand %p1334_p9, %p1328_p2 }
  0x25   : > { %1338 = shalt.err (!%p1335_p4)
}
  0x26   : > { %1086 = dma.hbm_to_vmem [thread:$0]  (!%p1657_p6), %s1971_s1, 16, %s1646_s26, [#allocation6]  }
  0x27   : > { %s1339_s10 = scalar_lea.hbm %s1973_s3, 512 }
  0x28   : > { %p1340_p10 = scmp.ne.s32.totalorder %s1973_s3, %s1339_s10  ;;  %p1346_p4 = scmp.lt.u32.totalorder %s1339_s10, %s1973_s3 }
  0x2a   : > { %p1342_p11 = pnand %p1340_p10, %p1673_p8 }
  0x2c   : > { %p1343_p12 = pneg %p1342_p11 }
  0x2e   : > { %p1348_p13 = pnand %p1346_p4, %p1343_p12 }
  0x30   : > { %1351 = shalt.err (!%p1348_p13)
}
  0x31   : > { %s1352_s26 = scalar_lea.vmem %s1661_s30, 512  ;;  %p1360_p7 = scmp.lt.s32.totalorder %s1661_s30, %s1661_s30 }
  0x32   : > { %p1353_p0 = scmp.ne.s32.totalorder %s1661_s30, %s1352_s26  ;;  %p1361_p9 = scmp.lt.s32.totalorder %s1352_s26, %s1352_s26 }
  0x34   : > { %p1355_p2 = pnand %p1353_p0, %p1673_p8  ;;  %p1362_p10 = por %p1361_p9, %p1360_p7 }
  0x36   : > { %p1356_p5 = pneg %p1355_p2 }
  0x38   : > { %p1363_p11 = pnand %p1362_p10, %p1356_p5 }
  0x3a   : > { %1366 = shalt.err (!%p1363_p11)
}
  0x3b   : > { %s1564_s16 = smov 128   ;;  %s1565_s17 = smov 8  }
  0x3c   : > { %1092 = dma.hbm_to_vmem [thread:$0]  (!%p1657_p6), %s1973_s3, 512, %s1661_s30, [#allocation9], %s1564_s16, %s1564_s16, %s1565_s17  }
  0x3d   : > { %s1367_s29 = scalar_lea.hbm %s1972_s2, 512 }
  0x3e   : > { %p1368_p12 = scmp.ne.s32.totalorder %s1972_s2, %s1367_s29  ;;  %p1374_p0 = scmp.lt.u32.totalorder %s1367_s29, %s1972_s2 }
  0x40   : > { %p1370_p4 = pnand %p1368_p12, %p1673_p8 }
  0x42   : > { %p1371_p13 = pneg %p1370_p4 }
  0x44   : > { %p1376_p2 = pnand %p1374_p0, %p1371_p13 }
  0x46   : > { %1379 = shalt.err (!%p1376_p2)
}
  0x47   : > { %s1380_s30 = scalar_lea.vmem %s1663_s9, 512  ;;  %p1388_p10 = scmp.lt.s32.totalorder %s1663_s9, %s1663_s9 }
  0x48   : > { %p1381_p5 = scmp.ne.s32.totalorder %s1663_s9, %s1380_s30  ;;  %p1389_p11 = scmp.lt.s32.totalorder %s1380_s30, %s1380_s30 }
  0x4a   : > { %p1383_p7 = pnand %p1381_p5, %p1673_p8  ;;  %p1390_p12 = por %p1389_p11, %p1388_p10 }
  0x4c   : > { %p1384_p9 = pneg %p1383_p7 }
  0x4e   : > { %p1391_p4 = pnand %p1390_p12, %p1384_p9 }
  0x50   : > { %1394 = shalt.err (!%p1391_p4)
}
  0x51   : > { %1089 = dma.hbm_to_vmem [thread:$0]  (!%p1657_p6), %s1972_s2, 512, %s1663_s9, [#allocation6], %s1564_s16, %s1564_s16, %s1565_s17  }
  0x52   : > { %s1566_s26 = smov [#allocation10]   ;;  %s1395_s25 = scalar_lea.hbm %s1974_s4, 768 }
  0x53   : > { %s236_s18 = sshll.u32 %s1566_s26, 4  ;;  %p1396_p13 = scmp.ne.s32.totalorder %s1974_s4, %s1395_s25  ;;  %s237_s18 = int_to_ptr.vmem [resolvable:$true] %s236_s18 }
  0x54   : > { %p1402_p5 = scmp.lt.u32.totalorder %s1395_s25, %s1974_s4 }
  0x55   : > { %p1398_p0 = pnand %p1396_p13, %p1673_p8 }
  0x57   : > { %p1399_p2 = pneg %p1398_p0 }
  0x59   : > { %p1404_p7 = pnand %p1402_p5, %p1399_p2 }
  0x5b   : > { %1407 = shalt.err (!%p1404_p7)
}
  0x5c   : > { %s1408_s9 = scalar_lea.vmem %s237_s18, 768  ;;  %p1416_p12 = scmp.lt.s32.totalorder %s237_s18, %s237_s18 }
  0x5d   : > { %p1409_p9 = scmp.ne.s32.totalorder %s237_s18, %s1408_s9  ;;  %p1417_p4 = scmp.lt.s32.totalorder %s1408_s9, %s1408_s9 }
  0x5f   : > { %p1411_p10 = pnand %p1409_p9, %p1673_p8  ;;  %p1418_p1 = por %p1417_p4, %p1416_p12 }
  0x61   : > { %p1412_p11 = pneg %p1411_p10 }
  0x63   : > { %p1419_p3 = pnand %p1418_p1, %p1412_p11 }
  0x65   : > { %1422 = shalt.err (!%p1419_p3)
}
  0x66   : > { %s1567_s12 = smov 192   ;;  %s1568_s30 = smov 12  }
  0x67   : > { %1095 = dma.hbm_to_vmem [thread:$0]  (!%p1657_p6), %s1974_s4, 768, %s237_s18, [#allocation9], %s1567_s12, %s1567_s12, %s1568_s30  }
  0x68   : > { %s1569_s26 = smov [#allocation11]   ;;  %s1423_s29 = scalar_lea.hbm %s1975_s5, 512 }
  0x69   : > { %s249_s19 = sshll.u32 %s1569_s26, 4  ;;  %p1424_p1 = scmp.ne.s32.totalorder %s1975_s5, %s1423_s29  ;;  %s250_s19 = int_to_ptr.vmem [resolvable:$true] %s249_s19 }
  0x6a   : > { %p1430_p0 = scmp.lt.u32.totalorder %s1423_s29, %s1975_s5 }
  0x6b   : > { %p1426_p3 = pnand %p1424_p1, %p1673_p8 }
  0x6d   : > { %p1427_p13 = pneg %p1426_p3 }
  0x6f   : > { %p1432_p2 = pnand %p1430_p0, %p1427_p13 }
  0x71   : > { %1435 = shalt.err (!%p1432_p2)
}
  0x72   : > { %s1436_s18 = scalar_lea.vmem %s250_s19, 512  ;;  %p1444_p10 = scmp.lt.s32.totalorder %s250_s19, %s250_s19 }
  0x73   : > { %p1437_p5 = scmp.ne.s32.totalorder %s250_s19, %s1436_s18  ;;  %p1445_p11 = scmp.lt.s32.totalorder %s1436_s18, %s1436_s18 }
  0x75   : > { %p1439_p7 = pnand %p1437_p5, %p1673_p8  ;;  %p1446_p12 = por %p1445_p11, %p1444_p10 }
  0x77   : > { %p1440_p9 = pneg %p1439_p7 }
  0x79   : > { %p1447_p4 = pnand %p1446_p12, %p1440_p9 }
  0x7b   : > { %1450 = shalt.err (!%p1447_p4)
}
  0x7c   : > { %1098 = dma.hbm_to_vmem [thread:$0]  (!%p1657_p6), %s1975_s5, 512, %s250_s19, [#allocation12], %s1564_s16, %s1564_s16, %s1565_s17  }
  0x7d   : > { %s969_s7 = sadd.s32 4294967294, %s1559_s24   ;;  %s1788_s15 = sadd.s32 1, %s1559_s24  }
  0x7e   : > { %s32_s13 = sadd.s32 1, %s1555_s23  ;;  %s29_s14 = ssub.s32 %s1559_s24, %s1788_s15 }
  0x7f   : > { %p39_p8 = scmp.ne.s32.totalorder %s1555_s23, %s1551_s22  ;;  %p30_p1 = scmp.eq.s32.totalorder %s29_s14, 0 }
  0x80   : > { %p40_p3 = scmp.eq.s32.totalorder %s1559_s24, 0  ;;  %p45_p13 = scmp.ne.s32.totalorder %s1551_s22, %s1547_s21 }
  0x81   : > { %p174_p0 = scmp.eq.s32.totalorder %s1641_s27, 1  ;;  %p1983_p5 = scmp.eq.s32.totalorder %s1641_s27, 0 }
  0x82   : > { %s1800_s26 = scalar_select %p30_p1, %s1555_s23, %s32_s13  }
  0x83   : > { %p41_p2 = por %p40_p3, %p39_p8  ;;  %p1804_p7 = por %p1983_p5, %p45_p13 }
  0x84   : > { %p1808_p6 = por %p174_p0, %p39_p8  ;;  %p180_p9 = scmp.eq.s32.totalorder %s969_s7, 1 }
  0x85   : > { %p1112_p10 = scmp.lt.s32.totalorder %s1559_s24, 2  ;;  %s263_s17 = sand.u32 1, %s1555_s23  }
  0x86   : > { %s1985_s16 = scalar_select %p1808_p6, 1, 0 }
  0x87   : > { %p1814_p11 = por %p180_p9, %p45_p13  ;;  %s977_s25 = sshll.u32 %s263_s17, 3 }
  0x88   : > { %s1013_s29 = sshll.u32 %s1559_s24, 7  ;;  %s267_s9 = scalar_lea.vmem [#allocation2], %s977_s25 }
  0x89   : > { %s1986_s19 = scalar_select %p1814_p11, 1, 0 }
  0x8a   : > { %s1822_s11 = scalar_lea.hbm %s1970_s0, %s1013_s29  ;;  %s274_s18 = sshll.u32 %s267_s9, 4  ;;  %s1828_s18 = int_to_ptr.vmem [resolvable:$true] %s274_s18 }
  0x8b   : > { %p1824_p12 = pnand %p1112_p10, %p41_p2  ;;  %s1830_s30 = scalar_lea.sflag [#allocation3], %s263_s17 }
  0x8c   : > { %s1451_s7 = scalar_lea.hbm %s1822_s11, 128  ;;  %s1456_s25 = scalar_lea.hbm %s1970_s0, 256 }
  0x8d   : > { %p1452_p4 = scmp.ne.s32.totalorder %s1822_s11, %s1451_s7  ;;  %p1453_p8 = pneg %p1824_p12 }
  0x8e   : > { %p1457_p13 = scmp.lt.u32.totalorder %s1822_s11, %s1970_s0  ;;  %p1458_p0 = scmp.lt.u32.totalorder %s1456_s25, %s1451_s7 }
  0x8f   : > { %p1454_p1 = pnand %p1453_p8, %p1452_p4  ;;  %p1460_p5 = scmp.lt.u32.totalorder %s1451_s7, %s1822_s11 }
  0x90   : > { %p1459_p2 = por %p1458_p0, %p1457_p13 }
  0x91   : > { %p1455_p3 = pneg %p1454_p1 }
  0x92   : > { %p1461_p9 = por %p1460_p5, %p1459_p2 }
  0x94   : > { %p1462_p10 = pnand %p1461_p9, %p1455_p3 }
  0x96   : > { %1465 = shalt.err (!%p1462_p10)
}
  0x97   : > { %s1466_s17 = scalar_lea.vmem %s1828_s18, 128  ;;  %s1570_s10 = smov [#allocation2]  }
  0x98   : > { %p1467_p4 = scmp.ne.s32.totalorder %s1828_s18, %s1466_s17  ;;  %s1471_s9 = sshll.u32 %s1570_s10, 4  ;;  %s1472_s9 = int_to_ptr.vmem [resolvable:$false] %s1471_s9 }
  0x99   : > { %s1473_s13 = scalar_lea.vmem %s1472_s9, 256  ;;  %p1474_p6 = scmp.lt.s32.totalorder %s1828_s18, %s1472_s9 }
  0x9a   : > { %p1469_p1 = pnand %p1467_p4, %p1453_p8  ;;  %p1475_p13 = scmp.lt.s32.totalorder %s1473_s13, %s1466_s17 }
  0x9c   : > { %p1470_p11 = pneg %p1469_p1  ;;  %p1476_p0 = por %p1475_p13, %p1474_p6 }
  0x9e   : > { %p1477_p2 = pnand %p1476_p0, %p1470_p11 }
  0xa0   : > { %1480 = shalt.err (!%p1477_p2)
}
  0xa1   : > { %s1571_s7 = smov 64   ;;  %s1572_s14 = smov 4  }
  0xa2   : > { %1102 = dma.hbm_to_vmem [thread:$0]  (!%p1824_p12), %s1822_s11, 128, %s1828_s18, %s1830_s30, %s1571_s7, %s1571_s7, %s1572_s14  }
  0xa3   : > { %p1988_p8 = scmp.ne.s32.totalorder %s1980_s28, 0 }
  0xa4   : > { %s1861_s25 = sand.u32 (!%p1988_p8), 1, %s1551_s22  }
  0xa5   : > { %286 = sbr.rel (%p1988_p8) target bundleno = 967 (0x3c7), region = 44  ;;  %s981_s29 = sshll.u32 (!%p1988_p8), %s1861_s25, 3 }
  0xa6   : > { %s289_s8 = scalar_lea.sflag (!%p1988_p8), [#allocation3], %s1861_s25  ;;  %s292_s17 = scalar_lea.vmem (!%p1988_p8), [#allocation2], %s981_s29 }
  0xac   : > { %1526 = dma.done.wait (%p1804_p7), %s289_s8, 128  }
  0xad   : > { %1528 = vsyncadd (%p1804_p7), %s289_s8, 4294967168  ;;  %p1989_p6 = scmp.eq.s32.totalorder %s1641_s27, 0 }
  0xaf   : > { %1530 = dma.done.wait (%p1989_p6), [#allocation6], 528   ;;  %p1990_p11 = pmov %p1989_p6 }
  0xb0   : > { %p1991_p12 = pmov %p1989_p6 }
  0xb1   : > { %1532 = vsyncadd (%p1990_p11), [#allocation6], 4294966768 }
  0xb2   : > { %1534 = dma.done.wait (%p1991_p12), [#allocation9], 1280   ;;  %p1992_p3 = pmov %p1989_p6 }
  0xb4   : > { %1536 = vsyncadd (%p1992_p3), [#allocation9], 4294966016  ;;  %p1993_p5 = pmov %p1992_p3 }
  0xb5   : > { %p1994_p9 = pmov %p1992_p3 }
  0xb6   : > { %1538 = dma.done.wait (%p1993_p5), [#allocation12], 512  }
  0xb7   : > { %1540 = vsyncadd (%p1994_p9), [#allocation12], 4294966784  ;;  %v1573_v0 = vmov 0   ;;  %v342_v1 = vld [vmem:[%s292_s17] sm:$0xff]   ;;  %s1574_s28 = smov 127   ;;  %s1575_s20 = smov 122  }
  0xb8   : > { %458 = vmatprep.subr.bf16.mxu0 %v1573_v0  ;;  %1214 = vset.pattern.permute.xlu1 %v1573_v0  ;;  %v344_v2 = vunpack.c.l.bf16 %v342_v1  ;;  %v345_v3 = vunpack.c.h.bf16 %v342_v1  ;;  %s1576_s11 = smov 126   ;;  %s1577_s18 = smov 121   ;;  %v1298_v5 = vld [vmem:[#allocation7 + $0x4] ss:$8 sps:$4 sm:$0xff]   ;;  %vm451_vm0 = vcmask 130048   ;;  %v411_v8 = vld [vmem:[#allocation8 + $0x10] sm:$0xff] }
  0xb9   : > { %1213 = vset.pattern.permute.xlu0 %v1573_v0  ;;  %459 = vmatpush1.bf16.msra.mxu0 %v342_v1  ;;  %s1578_s12 = smov 120   ;;  %s1579_s30 = smov 116   ;;  %v410_v6 = vld [vmem:[#allocation8 + $0x8] sm:$0xff]  ;;  %v409_v7 = vld [vmem:[#allocation8] sm:$0xff]  ;;  %v412_v9 = vld [vmem:[#allocation8 + $0x18] sm:$0xff]  ;;  %vm704_vm1 = vcmask 261120  }
  0xba   : > { %v1173_v4 = vpack.i.bf16 %v345_v3, %v344_v2  ;;  %460 = vmatprep.subr.bf16.mxu0 %v1573_v0  ;;  %s1580_s10 = smov 115   ;;  %s1581_s9 = smov 114   ;;  %993 = vmatprep.mubr.msk.bf16.mxu0 %vm451_vm0, %v1298_v5  ;;  %v995_v10 = vld [vmem:[#allocation5] ss:$0 sm:$0xff]  ;;  %v1296_v43 = vld [vmem:[#allocation7] ss:$8 sps:$4 sm:$0xff]  }
  0xbb   : > { %v1299_v44 = vld [vmem:[#allocation7 + $0x14] ss:$8 sps:$4 sm:$0xff]   ;;  %v1301_v45 = vld [vmem:[#allocation7 + $0x10] ss:$8 sps:$4 sm:$0xff]   ;;  %s987_s13 = sshll.u32 %s1861_s25, 4  ;;  %vm829_vm2 = vcmask 289792  }
  0xbc   : > { %1174 = vrot.lane.b32.xlu0 %v1173_v4, %s1574_s28  ;;  %1184 = vrot.lane.b32.xlu1 %v1173_v4, %s1575_s20  ;;  %s340_s7 = scalar_lea.vmem [#allocation13], %s987_s13  ;;  %s1018_s29 = sshll.u32 %s1641_s27, 8 }
  0xbd   : > { %s848_s14 = sshll.u32 %s340_s7, 4  ;;  %s835_s27 = scalar_lea.sflag [#allocation4], %s1861_s25  ;;  %s1921_s14 = int_to_ptr.vmem [resolvable:$true] %s848_s14 }
  0xbe   : > { %p1995_p10 = scmp.ne.s32.totalorder %s1985_s16, 0 }
  0xc0   : > { %1179 = vrot.lane.b32.xlu0 %v1173_v4, %s1576_s11  ;;  %1189 = vrot.lane.b32.xlu1 %v1173_v4, %s1577_s18 }
  0xc4   : > { %1194 = vrot.lane.b32.xlu0 %v1173_v4, %s1578_s12  ;;  %1199 = vrot.lane.b32.xlu1 %v1173_v4, %s1579_s30 }
  0xc8   : > { %1204 = vrot.lane.b32.xlu0 %v1173_v4, %s1580_s10  ;;  %1209 = vrot.lane.b32.xlu1 %v1173_v4, %s1581_s9 }
  0xcc   : > { %420 = vperm.xlu1 %1214, %v410_v6   ;;  %415 = vperm.xlu0 %1213, %v409_v7  }
  0xd0   : > { %425 = vperm.xlu1 %1214, %v411_v8   ;;  %430 = vperm.xlu0 %1213, %v412_v9  }
  0xd4   : > { %517 = vrot.lane.b32.xlu1 %v995_v10, %s1577_s18 }
 0x12e   : > { %v1175_v11 = vpop.permute.xlu0 %1174  ;;  %v1185_v12 = vpop.permute.xlu1 %1184 }
 0x12f   : > { %v1177_v13 = vunpack.i.h.bf16 %v1175_v11  ;;  %v1176_v14 = vunpack.i.l.bf16 %v1175_v11  ;;  %v1187_v19 = vunpack.i.h.bf16 %v1185_v12  ;;  %v1186_v20 = vunpack.i.l.bf16 %v1185_v12  ;;  %v1304_v11 = vld [vmem:[#allocation10 + $0x4] ss:$12 sps:$4 sm:$0xff]  }
 0x130   : > { %743 = vmatprep.mubr.bf16.mxu1 %v1304_v11  ;;  %v650_v12 = vld [vmem:[#allocation11] sm:$0xff] }
 0x131   : > { %v401_v15 = vpack.c.bf16 %v1177_v13, %v1176_v14  ;;  %v403_v23 = vpack.c.bf16 %v1187_v19, %v1186_v20  ;;  %v652_v13 = vld [vmem:[#allocation11 + $0x10] sm:$0xff]  ;;  %v651_v14 = vld [vmem:[#allocation11 + $0x8] sm:$0xff] }
 0x132   : > { %v1180_v16 = vpop.permute.xlu0 %1179  ;;  %v1190_v21 = vpop.permute.xlu1 %1189 }
 0x133   : > { %v1182_v17 = vunpack.i.h.bf16 %v1180_v16  ;;  %v1181_v18 = vunpack.i.l.bf16 %v1180_v16  ;;  %461 = vmatpush1.bf16.msra.mxu0 %v401_v15  ;;  %v1192_v24 = vunpack.i.h.bf16 %v1190_v21  ;;  %v1191_v25 = vunpack.i.l.bf16 %v1190_v21  ;;  %v653_v15 = vld [vmem:[#allocation11 + $0x18] sm:$0xff] }
 0x134   : > { %462 = vmatprep.subr.bf16.mxu0 %v1573_v0 }
 0x135   : > { %v402_v22 = vpack.c.bf16 %v1182_v17, %v1181_v18  ;;  %v404_v27 = vpack.c.bf16 %v1192_v24, %v1191_v25 }
 0x136   : > { %v1195_v26 = vpop.permute.xlu0 %1194  ;;  %v1200_v30 = vpop.permute.xlu1 %1199 }
 0x137   : > { %463 = vmatpush1.bf16.msra.mxu0 %v402_v22  ;;  %v1197_v28 = vunpack.i.h.bf16 %v1195_v26  ;;  %v1196_v29 = vunpack.i.l.bf16 %v1195_v26  ;;  %v1202_v32 = vunpack.i.h.bf16 %v1200_v30  ;;  %v1201_v33 = vunpack.i.l.bf16 %v1200_v30 }
 0x138   : > { %464 = vmatprep.subr.bf16.mxu0 %v1573_v0 }
 0x139   : > { %v405_v31 = vpack.c.bf16 %v1197_v28, %v1196_v29  ;;  %v406_v35 = vpack.c.bf16 %v1202_v32, %v1201_v33 }
 0x13a   : > { %v1205_v34 = vpop.permute.xlu0 %1204  ;;  %v1210_v38 = vpop.permute.xlu1 %1209 }
 0x13b   : > { %465 = vmatpush1.bf16.msra.mxu0 %v403_v23  ;;  %v1207_v36 = vunpack.i.h.bf16 %v1205_v34  ;;  %v1206_v37 = vunpack.i.l.bf16 %v1205_v34  ;;  %v1212_v40 = vunpack.i.h.bf16 %v1210_v38  ;;  %v1211_v41 = vunpack.i.l.bf16 %v1210_v38 }
 0x13c   : > { %466 = vmatprep.subr.bf16.mxu0 %v1573_v0 }
 0x13d   : > { %v407_v39 = vpack.c.bf16 %v1207_v36, %v1206_v37  ;;  %v408_v42 = vpack.c.bf16 %v1212_v40, %v1211_v41 }
 0x13f   : > { %467 = vmatpush1.bf16.msra.mxu0 %v404_v27 }
 0x140   : > { %468 = vmatprep.subr.bf16.mxu0 %v1573_v0 }
 0x143   : > { %469 = vmatpush1.bf16.msra.mxu0 %v405_v31 }
 0x144   : > { %470 = vmatprep.subr.bf16.mxu0 %v1573_v0 }
 0x147   : > { %471 = vmatpush1.bf16.msra.mxu0 %v406_v35 }
 0x148   : > { %472 = vmatprep.subr.bf16.mxu0 %v1573_v0 }
 0x14b   : > { %473 = vmatpush1.bf16.msra.mxu0 %v407_v39  ;;  %v421_v46 = vpop.permute.xlu1 %420  ;;  %v416_v48 = vpop.permute.xlu0 %415 }
 0x14c   : > { %474 = vmatprep.subr.bf16.mxu0 %v1573_v0 }
 0x14f   : > { %475 = vmatpush1.bf16.msra.mxu0 %v408_v42  ;;  %v426_v47 = vpop.permute.xlu1 %425  ;;  %v431_v0 = vpop.permute.xlu0 %430 }
 0x152   : > { %491 = vmatmul.mubr.bf16.vlgmr.msra.gmra.mrb[0].mxu0 %v1296_v43 }
 0x153   : > { %994 = vmatprep.mubr.msk.bf16.mxu0 %vm451_vm0, %v1299_v44  ;;  %v518_v56 = vpop.permute.xlu1 %517 }
 0x15a   : > { %499 = vmatmul.mubr.bf16.gmra.mrb[4].mxu0 %v1301_v45 }
 0x225   : > { %v492_v49 = vpop.f32.mrb[0].mxu0 }
 0x226   : > { %v493_v50 = vadd.f32 %v492_v49, %v416_v48  ;;  %v494_v51 = vpop.f32.mrb[1].mxu0 }
 0x227   : > { %v495_v52 = vpop.f32.mrb[2].mxu0 }
 0x228   : > { %v507_v53 = vmax.f32 %v493_v50, 0.0  ;;  %v496_v54 = vadd.f32 %v495_v52, %v421_v46  ;;  %v497_v55 = vpop.f32.mrb[3].mxu0 }
 0x22a   : > { %v508_v57 = vmax.f32 %v496_v54, 0.0  ;;  %v520_v58 = vmul.f32 %v518_v56, %v507_v53 }
 0x22c   : > { %v521_v59 = vmul.f32 %v518_v56, %v508_v57 }
 0x22d   : > { %v500_v60 = vpop.f32.mrb[4].mxu0 }
 0x22e   : > { %v501_v61 = vadd.f32 %v500_v60, %v426_v47  ;;  %v502_v62 = vpop.f32.mrb[5].mxu0  ;;  %v1215_v63 = vpack.i.bf16 %v521_v59, %v520_v58  ;;  %v632_v5 = vpack.c.bf16 %v521_v59, %v520_v58 }
 0x22f   : > { %v503_v1 = vpop.f32.mrb[6].mxu0 }
 0x230   : > { %v509_v2 = vmax.f32 %v501_v61, 0.0  ;;  %v504_v3 = vadd.f32 %v503_v1, %v431_v0  ;;  %v505_v4 = vpop.f32.mrb[7].mxu0  ;;  %1216 = vrot.lane.b32.xlu0 %v1215_v63, %s1577_s18 }
 0x232   : > { %v510_v6 = vmax.f32 %v504_v3, 0.0  ;;  %v522_v7 = vmul.f32 %v518_v56, %v509_v2 }
 0x234   : > { %v523_v8 = vmul.f32 %v518_v56, %v510_v6  ;;  %1226 = vrot.lane.b32.xlu0 %v1215_v63, %s1578_s12 }
 0x236   : > { %v1220_v9 = vpack.i.bf16 %v523_v8, %v522_v7  ;;  %v633_v10 = vpack.c.bf16 %v523_v8, %v522_v7 }
 0x238   : > { %1221 = vrot.lane.b32.xlu1 %v1220_v9, %s1577_s18  ;;  %1236 = vrot.lane.b32.xlu0 %v1220_v9, %s1578_s12 }
 0x23c   : > { %1231 = vrot.lane.b32.xlu1 %v1215_v63, %s1574_s28  ;;  %1241 = vrot.lane.b32.xlu0 %v1215_v63, %s1579_s30 }
 0x240   : > { %1246 = vrot.lane.b32.xlu1 %v1220_v9, %s1574_s28  ;;  %1256 = vrot.lane.b32.xlu0 %v1220_v9, %s1579_s30  ;;  %s1926_s28 = scalar_lea.hbm %s1976_s6, %s1018_s29 }
 0x244   : > { %1251 = vrot.lane.b32.xlu1 %v1215_v63, %s1576_s11  ;;  %1261 = vrot.lane.b32.xlu0 %v1215_v63, %s1580_s10 }
 0x248   : > { %1266 = vrot.lane.b32.xlu1 %v1220_v9, %s1576_s11  ;;  %1276 = vrot.lane.b32.xlu0 %v1220_v9, %s1580_s10  ;;  %s1582_s11 = smov [#allocation13]  }
 0x249   : > { %s1485_s18 = sshll.u32 %s1582_s11, 4  ;;  %s1486_s18 = int_to_ptr.vmem [resolvable:$false] %s1485_s18 }
 0x24a   : > { %s1487_s12 = scalar_lea.vmem %s1486_s18, 512  ;;  %p1488_p13 = scmp.lt.s32.totalorder %s1921_s14, %s1486_s18 }
 0x24c   : > { %1271 = vrot.lane.b32.xlu1 %v1215_v63, %s1575_s20  ;;  %1286 = vrot.lane.b32.xlu0 %v1215_v63, %s1581_s9 }
 0x250   : > { %1281 = vrot.lane.b32.xlu1 %v1220_v9, %s1575_s20  ;;  %656 = vperm.xlu0 %1213, %v650_v12   ;;  %s1481_s20 = scalar_lea.vmem %s1921_s14, 256 }
 0x251   : > { %p1482_p7 = scmp.ne.s32.totalorder %s1921_s14, %s1481_s20  ;;  %p1489_p0 = scmp.lt.s32.totalorder %s1487_s12, %s1481_s20 }
 0x253   : > { %p1483_p4 = pnand %p1482_p7, %p1995_p10  ;;  %p1490_p2 = por %p1489_p0, %p1488_p13 }
 0x254   : > { %1291 = vrot.lane.b32.xlu1 %v1220_v9, %s1581_s9  ;;  %666 = vperm.xlu0 %1213, %v652_v13  }
 0x255   : > { %p1484_p1 = pneg %p1483_p4 }
 0x257   : > { %p1491_p8 = pnand %p1490_p2, %p1484_p1 }
 0x258   : > { %661 = vperm.xlu1 %1214, %v651_v14  }
 0x25c   : > { %671 = vperm.xlu1 %1214, %v653_v15   ;;  %v1302_v15 = vld [vmem:[#allocation10] ss:$12 sps:$4 sm:$0xff]  }
 0x2a2   : > { %v1217_v16 = vpop.permute.xlu0 %1216 }
 0x2a3   : > { %v1219_v17 = vunpack.i.h.bf16 %v1217_v16  ;;  %v1218_v18 = vunpack.i.l.bf16 %v1217_v16  ;;  %v1305_v16 = vld [vmem:[#allocation10 + $0x1c] ss:$12 sps:$4 sm:$0xff]  }
 0x2a5   : > { %v640_v19 = vpack.c.bf16 %v1219_v17, %v1218_v18  ;;  %v1307_v18 = vld [vmem:[#allocation10 + $0x18] ss:$12 sps:$4 sm:$0xff]  }
 0x2a6   : > { %v1227_v20 = vpop.permute.xlu0 %1226 }
 0x2a7   : > { %1019 = vmatprep.subr.bf16.mxu1 %v640_v19  ;;  %v1229_v23 = vunpack.i.h.bf16 %v1227_v20  ;;  %v1228_v24 = vunpack.i.l.bf16 %v1227_v20  ;;  %v1308_v19 = vld [vmem:[#allocation10 + $0x8] ss:$12 sps:$4 sm:$0xff]   ;;  %v1309_v20 = vld [vmem:[#allocation10 + $0x20] ss:$12 sps:$4 sm:$0xff]  }
 0x2a8   : > { %1020 = vmatpush3.bf16.msra.mxu1 %v632_v5 }
 0x2a9   : > { %v642_v32 = vpack.c.bf16 %v1229_v23, %v1228_v24 }
 0x2aa   : > { %v1222_v21 = vpop.permute.xlu1 %1221  ;;  %v1237_v22 = vpop.permute.xlu0 %1236 }
 0x2ab   : > { %v1224_v25 = vunpack.i.h.bf16 %v1222_v21  ;;  %v1223_v26 = vunpack.i.l.bf16 %v1222_v21  ;;  %v1239_v28 = vunpack.i.h.bf16 %v1237_v22  ;;  %v1238_v29 = vunpack.i.l.bf16 %v1237_v22 }
 0x2ad   : > { %v641_v27 = vpack.c.bf16 %v1224_v25, %v1223_v26  ;;  %v643_v36 = vpack.c.bf16 %v1239_v28, %v1238_v29 }
 0x2ae   : > { %v1232_v30 = vpop.permute.xlu1 %1231  ;;  %v1242_v31 = vpop.permute.xlu0 %1241 }
 0x2af   : > { %v1234_v33 = vunpack.i.h.bf16 %v1232_v30  ;;  %v1233_v34 = vunpack.i.l.bf16 %v1232_v30  ;;  %1021 = vmatprep.subr.bf16.mxu1 %v641_v27  ;;  %v1244_v39 = vunpack.i.h.bf16 %v1242_v31  ;;  %v1243_v40 = vunpack.i.l.bf16 %v1242_v31 }
 0x2b0   : > { %1022 = vmatpush3.bf16.msra.mxu1 %v633_v10 }
 0x2b1   : > { %v634_v35 = vpack.c.bf16 %v1234_v33, %v1233_v34  ;;  %1023 = vmatprep.subr.bf16.mxu1 %v642_v32  ;;  %v644_v48 = vpack.c.bf16 %v1244_v39, %v1243_v40 }
 0x2b2   : > { %v1247_v37 = vpop.permute.xlu1 %1246  ;;  %v1257_v38 = vpop.permute.xlu0 %1256 }
 0x2b3   : > { %v1249_v41 = vunpack.i.h.bf16 %v1247_v37  ;;  %v1248_v42 = vunpack.i.l.bf16 %v1247_v37  ;;  %v1259_v44 = vunpack.i.h.bf16 %v1257_v38  ;;  %v1258_v45 = vunpack.i.l.bf16 %v1257_v38 }
 0x2b4   : > { %1024 = vmatpush3.bf16.msra.mxu1 %v634_v35 }
 0x2b5   : > { %v635_v43 = vpack.c.bf16 %v1249_v41, %v1248_v42  ;;  %1025 = vmatprep.subr.bf16.mxu1 %v643_v36  ;;  %v645_v52 = vpack.c.bf16 %v1259_v44, %v1258_v45 }
 0x2b6   : > { %v1252_v46 = vpop.permute.xlu1 %1251  ;;  %v1262_v47 = vpop.permute.xlu0 %1261 }
 0x2b7   : > { %v1254_v49 = vunpack.i.h.bf16 %v1252_v46  ;;  %v1253_v50 = vunpack.i.l.bf16 %v1252_v46  ;;  %v1264_v55 = vunpack.i.h.bf16 %v1262_v47  ;;  %v1263_v56 = vunpack.i.l.bf16 %v1262_v47 }
 0x2b8   : > { %1026 = vmatpush3.bf16.msra.mxu1 %v635_v43 }
 0x2b9   : > { %v636_v51 = vpack.c.bf16 %v1254_v49, %v1253_v50  ;;  %1027 = vmatprep.subr.bf16.mxu1 %v644_v48  ;;  %v646_v63 = vpack.c.bf16 %v1264_v55, %v1263_v56 }
 0x2ba   : > { %v1267_v53 = vpop.permute.xlu1 %1266  ;;  %v1277_v54 = vpop.permute.xlu0 %1276 }
 0x2bb   : > { %v1269_v57 = vunpack.i.h.bf16 %v1267_v53  ;;  %v1268_v58 = vunpack.i.l.bf16 %v1267_v53  ;;  %v1279_v60 = vunpack.i.h.bf16 %v1277_v54  ;;  %v1278_v61 = vunpack.i.l.bf16 %v1277_v54 }
 0x2bc   : > { %1028 = vmatpush3.bf16.msra.mxu1 %v636_v51 }
 0x2bd   : > { %v637_v59 = vpack.c.bf16 %v1269_v57, %v1268_v58  ;;  %1029 = vmatprep.subr.bf16.mxu1 %v645_v52  ;;  %v647_v4 = vpack.c.bf16 %v1279_v60, %v1278_v61 }
 0x2be   : > { %v1272_v62 = vpop.permute.xlu1 %1271  ;;  %v1287_v2 = vpop.permute.xlu0 %1286 }
 0x2bf   : > { %v1274_v0 = vunpack.i.h.bf16 %v1272_v62  ;;  %v1273_v1 = vunpack.i.l.bf16 %v1272_v62  ;;  %v1289_v6 = vunpack.i.h.bf16 %v1287_v2  ;;  %v1288_v7 = vunpack.i.l.bf16 %v1287_v2 }
 0x2c0   : > { %1030 = vmatpush3.bf16.msra.mxu1 %v637_v59 }
 0x2c1   : > { %v638_v3 = vpack.c.bf16 %v1274_v0, %v1273_v1  ;;  %1031 = vmatprep.subr.bf16.mxu1 %v646_v63  ;;  %v648_v12 = vpack.c.bf16 %v1289_v6, %v1288_v7 }
 0x2c2   : > { %v1282_v5 = vpop.permute.xlu1 %1281 }
 0x2c3   : > { %v1284_v8 = vunpack.i.h.bf16 %v1282_v5  ;;  %v1283_v9 = vunpack.i.l.bf16 %v1282_v5 }
 0x2c4   : > { %1032 = vmatpush3.bf16.msra.mxu1 %v638_v3 }
 0x2c5   : > { %v639_v10 = vpack.c.bf16 %v1284_v8, %v1283_v9  ;;  %1033 = vmatprep.subr.bf16.mxu1 %v647_v4 }
 0x2c6   : > { %v1292_v11 = vpop.permute.xlu1 %1291 }
 0x2c7   : > { %v1294_v13 = vunpack.i.h.bf16 %v1292_v11  ;;  %v1293_v14 = vunpack.i.l.bf16 %v1292_v11 }
 0x2c8   : > { %1034 = vmatpush3.bf16.msra.mxu1 %v639_v10 }
 0x2c9   : > { %1051 = vmatprep.subr.bf16.mxu1 %v648_v12  ;;  %v649_v17 = vpack.c.bf16 %v1294_v13, %v1293_v14 }
 0x2cb   : > { %744 = vmatmul.mubr.bf16.vlgmr.msra.gmra.mrb[0].mxu1 %v1302_v15 }
 0x2cc   : > { %1052 = vmatpush3.bf16.msra.mxu1 %v648_v12  ;;  %751 = vmatprep.mubr.bf16.mxu1 %v1305_v16 }
 0x2cd   : > { %1053 = vmatprep.subr.bf16.mxu1 %v649_v17 }
 0x2cf   : > { %v657_v27 = vpop.permute.xlu0 %656 }
 0x2d0   : > { %1054 = vmatpush3.bf16.msra.mxu1 %v649_v17 }
 0x2d3   : > { %752 = vmatmul.mubr.bf16.gmra.mrb[4].mxu1 %v1307_v18  ;;  %v667_v35 = vpop.permute.xlu0 %666 }
 0x2d4   : > { %1055 = vmatprep.mubr.msk.bf16.mxu1 %vm704_vm1, %v1308_v19 }
 0x2d7   : > { %v662_v30 = vpop.permute.xlu1 %661 }
 0x2db   : > { %1056 = vmatmul.mubr.msk.bf16.vlgmr.msra.gmra.mrb[8].mxu1 %vm704_vm1, %v1309_v20  ;;  %v672_v37 = vpop.permute.xlu1 %671 }
 0x39e   : > { %v1035_v21 = vpop.f32.mrb[0].mxu1 }
 0x39f   : > { %v1036_v22 = vpop.f32.mrb[1].mxu1 }
 0x3a0   : > { %v1037_v23 = vadd.f32 %v1036_v22, %v1035_v21  ;;  %v1038_v24 = vpop.f32.mrb[2].mxu1 }
 0x3a1   : > { %v1039_v25 = vpop.f32.mrb[3].mxu1 }
 0x3a2   : > { %v1040_v26 = vadd.f32 %v1039_v25, %v1038_v24  ;;  %v746_v39 = vadd.f32 %v1037_v23, %v657_v27 }
 0x3a4   : > { %v749_v45 = vadd.f32 %v1040_v26, %v662_v30 }
 0x3a6   : > { %v1041_v28 = vpop.f32.mrb[4].mxu1 }
 0x3a7   : > { %v1042_v29 = vpop.f32.mrb[5].mxu1 }
 0x3a8   : > { %v1043_v31 = vadd.f32 %v1042_v29, %v1041_v28  ;;  %v1044_v32 = vpop.f32.mrb[6].mxu1 }
 0x3a9   : > { %v1045_v33 = vpop.f32.mrb[7].mxu1 }
 0x3aa   : > { %v1046_v34 = vadd.f32 %v1045_v33, %v1044_v32  ;;  %v754_v36 = vadd.f32 %v1043_v31, %v667_v35 }
 0x3ac   : > { %v757_v42 = vadd.f32 %v1046_v34, %v672_v37 }
 0x3ae   : > { %v1057_v38 = vpop.f32.mrb[8].mxu1 }
 0x3af   : > { %v803_v40 = vadd.f32 %v1057_v38, %v754_v36  ;;  %v794_v41 = vpop.f32.mrb[9].mxu1 }
 0x3b0   : > { %v795_v43 = vadd.f32 %v794_v41, %v746_v39  ;;  %v1058_v44 = vpop.f32.mrb[10].mxu1 }
 0x3b1   : > { %v811_v46 = vmax.f32 %v803_v40, 0.0  ;;  %v806_v47 = vadd.f32 %v1058_v44, %v757_v42  ;;  %v797_v48 = vpop.f32.mrb[11].mxu1 }
 0x3b2   : > { %v809_v49 = vmax.f32 %v795_v43, 0.0  ;;  %v798_v50 = vadd.f32 %v797_v48, %v749_v45 }
 0x3b3   : > { %v1016_v51 = vpack.c.bf16 %v811_v46, %v811_v46  ;;  %v812_v52 = vmax.f32 %v806_v47, 0.0 }
 0x3b4   : > { %v1014_v53 = vpack.c.bf16 %v809_v49, %v809_v49  ;;  %v810_v54 = vmax.f32 %v798_v50, 0.0 }
 0x3b5   : > { %832 = vst.msk [vmem:[%s340_s7 + $0x8] sm:$0xf] %vm829_vm2, %v1016_v51  ;;  %v1017_v55 = vpack.c.bf16 %v812_v52, %v812_v52 }
 0x3b6   : > { %830 = vst.msk [vmem:[%s340_s7] sm:$0xf] %vm829_vm2, %v1014_v53  ;;  %v1015_v56 = vpack.c.bf16 %v810_v54, %v810_v54 }
 0x3b7   : > { %833 = vst.msk [vmem:[%s340_s7 + $0xc] sm:$0xf] %vm829_vm2, %v1017_v55 }
 0x3b8   : > { %831 = vst.msk [vmem:[%s340_s7 + $0x4] sm:$0xf] %vm829_vm2, %v1015_v56 }
 0x3b9   : > { %1494 = shalt.err (!%p1491_p8)
}
 0x3ba   : > { %s1495_s30 = scalar_lea.hbm %s1926_s28, 256  ;;  %s1499_s13 = scalar_lea.hbm %s1976_s6, 512 }
 0x3bb   : > { %p1496_p6 = scmp.ne.s32.totalorder %s1926_s28, %s1495_s30  ;;  %p1500_p3 = scmp.lt.u32.totalorder %s1926_s28, %s1976_s6 }
 0x3bc   : > { %p1501_p5 = scmp.lt.u32.totalorder %s1499_s13, %s1495_s30  ;;  %p1503_p7 = scmp.lt.u32.totalorder %s1495_s30, %s1926_s28 }
 0x3bd   : > { %p1497_p11 = pnand %p1496_p6, %p1995_p10 }
 0x3be   : > { %p1502_p9 = por %p1501_p5, %p1500_p3 }
 0x3bf   : > { %p1498_p12 = pneg %p1497_p11 }
 0x3c0   : > { %p1504_p4 = por %p1503_p7, %p1502_p9 }
 0x3c2   : > { %p1505_p1 = pnand %p1504_p4, %p1498_p12 }
 0x3c4   : > { %1508 = shalt.err (!%p1505_p1)
}
 0x3c5   : > { %s1583_s8 = smov 64   ;;  %s1584_s17 = smov 4  }
 0x3c6   : > { %1081 = dma.vmem_to_hbm [thread:$0]  (%p1995_p10), %s1921_s14, 256, %s1926_s28, %s835_s27, %s1583_s8, %s1583_s8, %s1584_s17  }
 0x3c7 PF: > { %s863_s20 = sand.u32 1, %s1547_s21   ;;  %p1996_p13 = scmp.ne.s32.totalorder %s1986_s19, 0 }
 0x3c8   : > { %p1997_p0 = scmp.ge.s32.totalorder %s1559_s24, 2  ;;  %s864_s11 = scalar_lea.sflag [#allocation4], %s863_s20 }
 0x3ca   : > { %p1104_p2 = pnand %p1997_p0, %p1996_p13 }
 0x3cc   : > { %1542 = dma.done.wait (!%p1104_p2), %s864_s11, 256  }
 0x3cd   : > { %1544 = vsyncadd (!%p1104_p2), %s864_s11, 4294967040  ;;  %p22_p8 = scmp.ge.s32.totalorder %s1788_s15, 4   ;;  %s1998_s21 = smov %s1551_s22 }
 0x3ce   : > { %s1999_s22 = smov %s1555_s23  ;;  %s2000_s23 = smov %s1800_s26 }
 0x3cf   : > { %s2001_s24 = smov %s1788_s15  ;;  %24 = sbr.rel (!%p22_p8) target bundleno = 8 (0x8), region = 109 }
 0x3d6   :  { %869 = vsyncpa [#allocation3], 1 }
 0x3d7   :  { %871 = vsyncpa [#allocation3 + $0x1], 1 }
 0x3d8   :  { %872 = vsyncpa [#allocation6], 1 }
 0x3d9   :  { %873 = vsyncpa [#allocation9], 1 }
 0x3da   :  { %874 = vsyncpa [#allocation12], 1 }
 0x3db   :  { %875 = vsyncpa [#allocation4], 1 }
 0x3dc   :  { %877 = vsyncpa [#allocation4 + $0x1], 1 }

// kernel: _lambda_.8
= control target key start
LH: loop header
LB: loop body
LE: loop exit
PB: predicated region body
PF: predicated region fallthrough
CT: control target
= control target key end

     0   :  { %s2667_s0 = inlined_call_operand.hbm [shape: bf16[2,32,166], index: 0, kind: input, shape index: {}]   ;;  %s2668_s1 = inlined_call_operand.hbm [shape: f32[1,166], index: 1, kind: input, shape index: {}]   ;;  %s2669_s2 = inlined_call_operand.hbm [shape: bf16[16,288], index: 2, kind: input, shape index: {}]   ;;  %s2670_s3 = inlined_call_operand.hbm [shape: f32[16,1], index: 3, kind: input, shape index: {}]   ;;  %s2671_s4 = inlined_call_operand.hbm [shape: bf16[16,144], index: 4, kind: input, shape index: {}]   ;;  %s2672_s5 = inlined_call_operand.hbm [shape: f32[16,1], index: 5, kind: input, shape index: {}]   ;;  %s2673_s6 = inlined_call_operand.hbm [shape: bf16[16,144], index: 6, kind: input, shape index: {}]   ;;  %s2674_s7 = inlined_call_operand.hbm [shape: f32[16,1], index: 7, kind: input, shape index: {}]   ;;  %s2675_s8 = inlined_call_operand.hbm [shape: bf16[2,16,100], index: 8, kind: output, shape index: {}]  }
   0x1   :  { %2683 = sst [smem:[#allocation23_spill]] %s2668_s1 }
   0x2   :  { %2684 = sst [smem:[#allocation24_spill]] %s2669_s2 }
   0x3   :  { %13 = vsyncpa [#allocation3], 0 }
   0x4   :  { %15 = vsyncpa [#allocation3 + $0x1], 0 }
   0x5   :  { %16 = vsyncpa [#allocation6], 0 }
   0x6   :  { %17 = vsyncpa [#allocation9], 0 }
   0x7   :  { %18 = vsyncpa [#allocation12], 0 }
   0x8   :  { %19 = vsyncpa [#allocation15], 0 }
   0x9   :  { %20 = vsyncpa [#allocation4], 0 }
   0xa   :  { %22 = vsyncpa [#allocation4 + $0x1], 0  ;;  %s2176_s27 = smov 0   ;;  %s2178_s28 = smov 0  }
   0xb   :  { %s2180_s29 = smov 0   ;;  %s2182_s30 = smov 0  }
   0xc LB: > { %s2107_s9 = smov [#allocation5]   ;;  %s2197_s11 = sadd.s32 4294967295, %s2105_s30   ;;  %s2105_s30 = sphi %s2182_s30, %s2712_s30   ;;  %s2101_s29 = sphi %s2180_s29, %s2711_s29   ;;  %s2097_s28 = sphi %s2178_s28, %s2710_s28   ;;  %s2093_s27 = sphi %s2176_s27, %s2709_s27  }
   0xd   : > { %s245_s10 = sshll.u32 %s2107_s9, 4  ;;  %p1324_p0 = scmp.ge.s32.totalorder %s2105_s30, 1  ;;  %s246_s10 = int_to_ptr.vmem [resolvable:$true] %s245_s10 }
   0xe   : > { %p2676_p1 = scmp.eq.s32.totalorder %s2197_s11, 0  ;;  %p232_p2 = scmp.lt.s32.totalorder %s2105_s30, 3 }
   0xf   : > { %s2108_s13 = smov [#allocation8]   ;;  %s2109_s16 = smov [#allocation11]  }
  0x10   : > { %p2202_p3 = pnand %p1324_p0, %p232_p2  ;;  %s268_s14 = sshll.u32 %s2108_s13, 4  ;;  %s2209_s14 = int_to_ptr.vmem [resolvable:$true] %s268_s14 }
  0x11   : > { %s294_s17 = sshll.u32 %s2109_s16, 4  ;;  %s2687_s1 = sld [smem:[#allocation23_spill]]  ;;  %s2217_s17 = int_to_ptr.vmem [resolvable:$true] %s294_s17 }
  0x12   : > { %s2685_s12 = scalar_select %p2202_p3, 1, 0 }
  0x13   : > { %p1411_p5 = pneg %p2202_p3 }
  0x15   : > { %p2213_p6 = pnand %p1411_p5, %p2676_p1 }
  0x17   : > { %s1797_s20 = scalar_lea.hbm %s2687_s1, 32  ;;  %p2227_p8 = pneg %p2213_p6 }
  0x18   : > { %p1798_p7 = scmp.ne.s32.totalorder %s2687_s1, %s1797_s20  ;;  %p1804_p11 = scmp.lt.u32.totalorder %s1797_s20, %s2687_s1 }
  0x1a   : > { %p1800_p9 = pnand %p2227_p8, %p1798_p7 }
  0x1c   : > { %p1801_p10 = pneg %p1800_p9 }
  0x1e   : > { %p1806_p12 = pnand %p1804_p11, %p1801_p10 }
  0x20   : > { %1809 = shalt.err (!%p1806_p12)
}
  0x21   : > { %s1810_s26 = scalar_lea.vmem %s246_s10, 32  ;;  %p1818_p5 = scmp.lt.s32.totalorder %s246_s10, %s246_s10 }
  0x22   : > { %p1811_p13 = scmp.ne.s32.totalorder %s246_s10, %s1810_s26  ;;  %p1819_p4 = scmp.lt.s32.totalorder %s1810_s26, %s1810_s26 }
  0x24   : > { %p1813_p0 = pnand %p1811_p13, %p2227_p8  ;;  %p1820_p1 = por %p1819_p4, %p1818_p5 }
  0x26   : > { %p1814_p2 = pneg %p1813_p0 }
  0x28   : > { %p1821_p3 = pnand %p1820_p1, %p1814_p2 }
  0x2a   : > { %1824 = shalt.err (!%p1821_p3)
}
  0x2b   : > { %1414 = dma.hbm_to_vmem [thread:$0]  (!%p2213_p6), %s2687_s1, 32, %s246_s10, [#allocation6]  }
  0x2c   : > { %s1825_s19 = scalar_lea.hbm %s2670_s3, 256 }
  0x2d   : > { %p1826_p7 = scmp.ne.s32.totalorder %s2670_s3, %s1825_s19  ;;  %p1832_p1 = scmp.lt.u32.totalorder %s1825_s19, %s2670_s3 }
  0x2f   : > { %p1828_p9 = pnand %p1826_p7, %p2227_p8 }
  0x31   : > { %p1829_p4 = pneg %p1828_p9 }
  0x33   : > { %p1834_p3 = pnand %p1832_p1, %p1829_p4 }
  0x35   : > { %1837 = shalt.err (!%p1834_p3)
}
  0x36   : > { %s1838_s10 = scalar_lea.vmem %s2209_s14, 256  ;;  %p1846_p13 = scmp.lt.s32.totalorder %s2209_s14, %s2209_s14 }
  0x37   : > { %p1839_p10 = scmp.ne.s32.totalorder %s2209_s14, %s1838_s10  ;;  %p1847_p0 = scmp.lt.s32.totalorder %s1838_s10, %s1838_s10 }
  0x39   : > { %p1841_p11 = pnand %p1839_p10, %p2227_p8  ;;  %p1848_p2 = por %p1847_p0, %p1846_p13 }
  0x3b   : > { %p1842_p12 = pneg %p1841_p11 }
  0x3d   : > { %p1849_p5 = pnand %p1848_p2, %p1842_p12 }
  0x3f   : > { %1852 = shalt.err (!%p1849_p5)
}
  0x40   : > { %s2678_s25 = smov 128   ;;  %s2680_s26 = smov 8  }
  0x41   : > { %1420 = dma.hbm_to_vmem [thread:$0]  (!%p2213_p6), %s2670_s3, 256, %s2209_s14, [#allocation9], %s2678_s25, %s2678_s25, %s2680_s26  }
  0x42   : > { %s1853_s19 = scalar_lea.hbm %s2672_s5, 256 }
  0x43   : > { %p1854_p7 = scmp.ne.s32.totalorder %s2672_s5, %s1853_s19  ;;  %p1860_p1 = scmp.lt.u32.totalorder %s1853_s19, %s2672_s5 }
  0x45   : > { %p1856_p9 = pnand %p1854_p7, %p2227_p8 }
  0x47   : > { %p1857_p4 = pneg %p1856_p9 }
  0x49   : > { %p1862_p3 = pnand %p1860_p1, %p1857_p4 }
  0x4b   : > { %1865 = shalt.err (!%p1862_p3)
}
  0x4c   : > { %s1866_s14 = scalar_lea.vmem %s2217_s17, 256  ;;  %p1874_p13 = scmp.lt.s32.totalorder %s2217_s17, %s2217_s17 }
  0x4d   : > { %p1867_p10 = scmp.ne.s32.totalorder %s2217_s17, %s1866_s14  ;;  %p1875_p0 = scmp.lt.s32.totalorder %s1866_s14, %s1866_s14 }
  0x4f   : > { %p1869_p11 = pnand %p1867_p10, %p2227_p8  ;;  %p1876_p2 = por %p1875_p0, %p1874_p13 }
  0x51   : > { %p1870_p12 = pneg %p1869_p11 }
  0x53   : > { %p1877_p5 = pnand %p1876_p2, %p1870_p12 }
  0x55   : > { %1880 = shalt.err (!%p1877_p5)
}
  0x56   : > { %1426 = dma.hbm_to_vmem [thread:$0]  (!%p2213_p6), %s2672_s5, 256, %s2217_s17, [#allocation12], %s2678_s25, %s2678_s25, %s2680_s26  }
  0x57   : > { %s2112_s13 = smov [#allocation7]   ;;  %s2689_s2 = sld [smem:[#allocation24_spill]] }
  0x58   : > { %s255_s16 = sshll.u32 %s2112_s13, 4  ;;  %s256_s16 = int_to_ptr.vmem [resolvable:$true] %s255_s16 }
  0x5d   : > { %s1881_s20 = scalar_lea.hbm %s2689_s2, 384 }
  0x5e   : > { %p1882_p7 = scmp.ne.s32.totalorder %s2689_s2, %s1881_s20  ;;  %p1888_p1 = scmp.lt.u32.totalorder %s1881_s20, %s2689_s2 }
  0x60   : > { %p1884_p9 = pnand %p1882_p7, %p2227_p8 }
  0x62   : > { %p1885_p4 = pneg %p1884_p9 }
  0x64   : > { %p1890_p3 = pnand %p1888_p1, %p1885_p4 }
  0x66   : > { %1893 = shalt.err (!%p1890_p3)
}
  0x67   : > { %s1894_s17 = scalar_lea.vmem %s256_s16, 384  ;;  %p1902_p13 = scmp.lt.s32.totalorder %s256_s16, %s256_s16 }
  0x68   : > { %p1895_p10 = scmp.ne.s32.totalorder %s256_s16, %s1894_s17  ;;  %p1903_p0 = scmp.lt.s32.totalorder %s1894_s17, %s1894_s17 }
  0x6a   : > { %p1897_p11 = pnand %p1895_p10, %p2227_p8  ;;  %p1904_p2 = por %p1903_p0, %p1902_p13 }
  0x6c   : > { %p1898_p12 = pneg %p1897_p11 }
  0x6e   : > { %p1905_p5 = pnand %p1904_p2, %p1898_p12 }
  0x70   : > { %1908 = shalt.err (!%p1905_p5)
}
  0x71   : > { %s2113_s10 = smov 192   ;;  %s2114_s9 = smov 12  }
  0x72   : > { %1417 = dma.hbm_to_vmem [thread:$0]  (!%p2213_p6), %s2689_s2, 384, %s256_s16, [#allocation6], %s2113_s10, %s2113_s10, %s2114_s9  }
  0x73   : > { %s2115_s19 = smov [#allocation10]   ;;  %s2116_s21 = smov [#allocation13]  }
  0x74   : > { %s281_s20 = sshll.u32 %s2115_s19, 4  ;;  %s307_s22 = sshll.u32 %s2116_s21, 4  ;;  %s282_s20 = int_to_ptr.vmem [resolvable:$true] %s281_s20  ;;  %s2313_s22 = int_to_ptr.vmem [resolvable:$true] %s307_s22 }
  0x75   : > { %s1909_s17 = scalar_lea.hbm %s2671_s4, 256 }
  0x76   : > { %p1910_p7 = scmp.ne.s32.totalorder %s2671_s4, %s1909_s17  ;;  %p1916_p1 = scmp.lt.u32.totalorder %s1909_s17, %s2671_s4 }
  0x78   : > { %p1912_p9 = pnand %p1910_p7, %p2227_p8 }
  0x7a   : > { %p1913_p4 = pneg %p1912_p9 }
  0x7c   : > { %p1918_p3 = pnand %p1916_p1, %p1913_p4 }
  0x7e   : > { %1921 = shalt.err (!%p1918_p3)
}
  0x7f   : > { %s1922_s10 = scalar_lea.vmem %s282_s20, 256  ;;  %p1930_p13 = scmp.lt.s32.totalorder %s282_s20, %s282_s20 }
  0x80   : > { %p1923_p10 = scmp.ne.s32.totalorder %s282_s20, %s1922_s10  ;;  %p1931_p0 = scmp.lt.s32.totalorder %s1922_s10, %s1922_s10 }
  0x82   : > { %p1925_p11 = pnand %p1923_p10, %p2227_p8  ;;  %p1932_p2 = por %p1931_p0, %p1930_p13 }
  0x84   : > { %p1926_p12 = pneg %p1925_p11 }
  0x86   : > { %p1933_p5 = pnand %p1932_p2, %p1926_p12 }
  0x88   : > { %1936 = shalt.err (!%p1933_p5)
}
  0x89   : > { %s2690_s25 = smov 8   ;;  %s2691_s26 = smov 128  }
  0x8a   : > { %1423 = dma.hbm_to_vmem [thread:$0]  (!%p2213_p6), %s2671_s4, 256, %s282_s20, [#allocation9], %s2691_s26, %s2691_s26, %s2690_s25  }
  0x8b   : > { %s1937_s24 = scalar_lea.hbm %s2673_s6, 256 }
  0x8c   : > { %p1938_p7 = scmp.ne.s32.totalorder %s2673_s6, %s1937_s24  ;;  %p1944_p1 = scmp.lt.u32.totalorder %s1937_s24, %s2673_s6 }
  0x8e   : > { %p1940_p9 = pnand %p1938_p7, %p2227_p8 }
  0x90   : > { %p1941_p4 = pneg %p1940_p9 }
  0x92   : > { %p1946_p3 = pnand %p1944_p1, %p1941_p4 }
  0x94   : > { %1949 = shalt.err (!%p1946_p3)
}
  0x95   : > { %s1950_s20 = scalar_lea.vmem %s2313_s22, 256  ;;  %p1958_p13 = scmp.lt.s32.totalorder %s2313_s22, %s2313_s22 }
  0x96   : > { %p1951_p10 = scmp.ne.s32.totalorder %s2313_s22, %s1950_s20  ;;  %p1959_p0 = scmp.lt.s32.totalorder %s1950_s20, %s1950_s20 }
  0x98   : > { %p1953_p11 = pnand %p1951_p10, %p2227_p8  ;;  %p1960_p2 = por %p1959_p0, %p1958_p13 }
  0x9a   : > { %p1954_p12 = pneg %p1953_p11 }
  0x9c   : > { %p1961_p5 = pnand %p1960_p2, %p1954_p12 }
  0x9e   : > { %1964 = shalt.err (!%p1961_p5)
}
  0x9f   : > { %1429 = dma.hbm_to_vmem [thread:$0]  (!%p2213_p6), %s2673_s6, 256, %s2313_s22, [#allocation12], %s2691_s26, %s2691_s26, %s2690_s25  }
  0xa0   : > { %s2117_s18 = smov [#allocation14]   ;;  %s1965_s14 = scalar_lea.hbm %s2674_s7, 256 }
  0xa1   : > { %s320_s19 = sshll.u32 %s2117_s18, 4  ;;  %p1966_p7 = scmp.ne.s32.totalorder %s2674_s7, %s1965_s14  ;;  %s321_s19 = int_to_ptr.vmem [resolvable:$true] %s320_s19 }
  0xa2   : > { %p1972_p1 = scmp.lt.u32.totalorder %s1965_s14, %s2674_s7 }
  0xa3   : > { %p1968_p9 = pnand %p1966_p7, %p2227_p8 }
  0xa5   : > { %p1969_p4 = pneg %p1968_p9 }
  0xa7   : > { %p1974_p3 = pnand %p1972_p1, %p1969_p4 }
  0xa9   : > { %1977 = shalt.err (!%p1974_p3)
}
  0xaa   : > { %s1978_s22 = scalar_lea.vmem %s321_s19, 256  ;;  %p1986_p13 = scmp.lt.s32.totalorder %s321_s19, %s321_s19 }
  0xab   : > { %p1979_p10 = scmp.ne.s32.totalorder %s321_s19, %s1978_s22  ;;  %p1987_p0 = scmp.lt.s32.totalorder %s1978_s22, %s1978_s22 }
  0xad   : > { %p1981_p11 = pnand %p1979_p10, %p2227_p8  ;;  %p1988_p2 = por %p1987_p0, %p1986_p13 }
  0xaf   : > { %p1982_p12 = pneg %p1981_p11 }
  0xb1   : > { %p1989_p5 = pnand %p1988_p2, %p1982_p12 }
  0xb3   : > { %1992 = shalt.err (!%p1989_p5)
}
  0xb4   : > { %1432 = dma.hbm_to_vmem [thread:$0]  (!%p2213_p6), %s2674_s7, 256, %s321_s19, [#allocation15], %s2691_s26, %s2691_s26, %s2690_s25  }
  0xb5   : > { %s1323_s15 = sadd.s32 4294967294, %s2105_s30   ;;  %s2385_s23 = sadd.s32 1, %s2105_s30  }
  0xb6   : > { %s35_s18 = sadd.s32 1, %s2101_s29  ;;  %s32_s21 = ssub.s32 %s2105_s30, %s2385_s23 }
  0xb7   : > { %p42_p8 = scmp.ne.s32.totalorder %s2101_s29, %s2097_s28  ;;  %p33_p7 = scmp.eq.s32.totalorder %s32_s21, 0 }
  0xb8   : > { %p43_p9 = scmp.eq.s32.totalorder %s2105_s30, 0  ;;  %p48_p4 = scmp.ne.s32.totalorder %s2097_s28, %s2093_s27 }
  0xb9   : > { %p219_p1 = scmp.eq.s32.totalorder %s2197_s11, 1  ;;  %p2692_p10 = scmp.eq.s32.totalorder %s2197_s11, 0 }
  0xba   : > { %s2397_s24 = scalar_select %p33_p7, %s2101_s29, %s35_s18  }
  0xbb   : > { %p44_p3 = por %p43_p9, %p42_p8  ;;  %p2401_p11 = por %p2692_p10, %p48_p4 }
  0xbc   : > { %p2405_p6 = por %p219_p1, %p42_p8  ;;  %p225_p12 = scmp.eq.s32.totalorder %s1323_s15, 1 }
  0xbd   : > { %p1448_p13 = scmp.lt.s32.totalorder %s2105_s30, 2  ;;  %s334_s17 = sand.u32 1, %s2101_s29  }
  0xbe   : > { %s2694_s19 = scalar_select %p2405_p6, 1, 0 }
  0xbf   : > { %p2411_p0 = por %p225_p12, %p48_p4  ;;  %s1333_s16 = sshll.u32 %s334_s17, 5 }
  0xc0   : > { %s1367_s20 = sshll.u32 %s2105_s30, 9  ;;  %s338_s18 = scalar_lea.vmem [#allocation2], %s1333_s16 }
  0xc1   : > { %s2695_s13 = scalar_select %p2411_p0, 1, 0 }
  0xc2   : > { %s2419_s9 = scalar_lea.hbm %s2667_s0, %s1367_s20  ;;  %s345_s21 = sshll.u32 %s338_s18, 4  ;;  %s2425_s21 = int_to_ptr.vmem [resolvable:$true] %s345_s21 }
  0xc3   : > { %p2421_p2 = pnand %p1448_p13, %p44_p3  ;;  %s2427_s1 = scalar_lea.sflag [#allocation3], %s334_s17 }
  0xc4   : > { %s1993_s2 = scalar_lea.hbm %s2419_s9, 512  ;;  %s1998_s22 = scalar_lea.hbm %s2667_s0, 1024 }
  0xc5   : > { %p1994_p5 = scmp.ne.s32.totalorder %s2419_s9, %s1993_s2  ;;  %p1995_p8 = pneg %p2421_p2 }
  0xc6   : > { %p1999_p4 = scmp.lt.u32.totalorder %s2419_s9, %s2667_s0  ;;  %p2000_p1 = scmp.lt.u32.totalorder %s1998_s22, %s1993_s2 }
  0xc7   : > { %p1996_p7 = pnand %p1995_p8, %p1994_p5  ;;  %p2002_p10 = scmp.lt.u32.totalorder %s1993_s2, %s2419_s9 }
  0xc8   : > { %p2001_p3 = por %p2000_p1, %p1999_p4 }
  0xc9   : > { %p1997_p9 = pneg %p1996_p7 }
  0xca   : > { %p2003_p12 = por %p2002_p10, %p2001_p3 }
  0xcc   : > { %p2004_p13 = pnand %p2003_p12, %p1997_p9 }
  0xce   : > { %2007 = shalt.err (!%p2004_p13)
}
  0xcf   : > { %s2008_s17 = scalar_lea.vmem %s2425_s21, 512  ;;  %s2118_s16 = smov [#allocation2]  }
  0xd0   : > { %p2009_p5 = scmp.ne.s32.totalorder %s2425_s21, %s2008_s17  ;;  %s2013_s20 = sshll.u32 %s2118_s16, 4  ;;  %s2014_s20 = int_to_ptr.vmem [resolvable:$false] %s2013_s20 }
  0xd1   : > { %s2015_s10 = scalar_lea.vmem %s2014_s20, 1024  ;;  %p2016_p6 = scmp.lt.s32.totalorder %s2425_s21, %s2014_s20 }
  0xd2   : > { %p2011_p7 = pnand %p2009_p5, %p1995_p8  ;;  %p2017_p4 = scmp.lt.s32.totalorder %s2015_s10, %s2008_s17 }
  0xd4   : > { %p2012_p0 = pneg %p2011_p7  ;;  %p2018_p1 = por %p2017_p4, %p2016_p6 }
  0xd6   : > { %p2019_p3 = pnand %p2018_p1, %p2012_p0 }
  0xd8   : > { %2022 = shalt.err (!%p2019_p3)
}
  0xd9   : > { %1436 = dma.hbm_to_vmem [thread:$0]  (!%p2421_p2), %s2419_s9, 512, %s2425_s21, %s2427_s1, %s2691_s26, %s2691_s26, %s2690_s25  }
  0xda   : > { %p2697_p8 = scmp.ne.s32.totalorder %s2685_s12, 0 }
  0xdb   : > { %s2461_s2 = sand.u32 (!%p2697_p8), 1, %s2097_s28  }
  0xdc   : > { %357 = sbr.rel (%p2697_p8) target bundleno = 1414 (0x586), region = 52  ;;  %s1337_s22 = sshll.u32 (!%p2697_p8), %s2461_s2, 5 }
  0xdd   : > { %s360_s18 = scalar_lea.sflag (!%p2697_p8), [#allocation3], %s2461_s2  ;;  %s363_s17 = scalar_lea.vmem (!%p2697_p8), [#allocation2], %s1337_s22 }
  0xe3   : > { %2068 = dma.done.wait (%p2401_p11), %s360_s18, 512  }
  0xe4   : > { %2070 = vsyncadd (%p2401_p11), %s360_s18, 4294966784  ;;  %p2698_p6 = scmp.eq.s32.totalorder %s2197_s11, 0 }
  0xe6   : > { %2072 = dma.done.wait (%p2698_p6), [#allocation6], 416   ;;  %p2699_p0 = pmov %p2698_p6 }
  0xe8   : > { %2074 = vsyncadd (%p2699_p0), [#allocation6], 4294966880  ;;  %p2700_p2 = pmov %p2699_p0 }
  0xe9   : > { %p2701_p9 = pmov %p2699_p0 }
  0xea   : > { %2076 = dma.done.wait (%p2700_p2), [#allocation9], 512  }
  0xeb   : > { %2078 = vsyncadd (%p2701_p9), [#allocation9], 4294966784  ;;  %p2702_p10 = pmov %p2699_p0 }
  0xec   : > { %p2703_p12 = pmov %p2699_p0 }
  0xed   : > { %2080 = dma.done.wait (%p2702_p10), [#allocation12], 512  }
  0xee   : > { %2082 = vsyncadd (%p2703_p12), [#allocation12], 4294966784  ;;  %p2704_p11 = pmov %p2699_p0 }
  0xef   : > { %p2705_p13 = pmov %p2699_p0 }
  0xf0   : > { %2084 = dma.done.wait (%p2704_p11), [#allocation15], 256  }
  0xf1   : > { %2086 = vsyncadd (%p2705_p13), [#allocation15], 4294967040  ;;  %v427_v0 = vld [vmem:[%s363_s17 + $0x10] sm:$0xff]  ;;  %v425_v1 = vld [vmem:[%s363_s17] sm:$0xff]  ;;  %s2119_s1 = smov 127   ;;  %s2120_s12 = smov 126   ;;  %v836_v24 = vlaneseq }
  0xf2   : > { %v428_v2 = vld [vmem:[%s363_s17 + $0x18] sm:$0xff]  ;;  %v433_v3 = vunpack.c.l.bf16 %v427_v0  ;;  %v434_v4 = vunpack.c.h.bf16 %v427_v0  ;;  %v429_v5 = vunpack.c.l.bf16 %v425_v1  ;;  %v430_v6 = vunpack.c.h.bf16 %v425_v1  ;;  %v426_v7 = vld [vmem:[%s363_s17 + $0x8] sm:$0xff]  ;;  %s2121_s25 = smov 118   ;;  %s2122_s26 = smov 117   ;;  %v834_v26 = vld [vmem:[#allocation5] sm:$0x3] }
  0xf3   : > { %v435_v8 = vunpack.c.l.bf16 %v428_v2  ;;  %v436_v9 = vunpack.c.h.bf16 %v428_v2  ;;  %v431_v10 = vunpack.c.l.bf16 %v426_v7  ;;  %v432_v11 = vunpack.c.h.bf16 %v426_v7  ;;  %s2123_s14 = smov 116   ;;  %s2124_s9 = smov 108   ;;  %v1789_v20 = vld [vmem:[#allocation7 + $0x4] ss:$12 sps:$4 sm:$0xff]   ;;  %v717_v23 = vld [vmem:[#allocation8] sm:$0xff] }
  0xf4   : > { %v1521_v12 = vpack.i.bf16 %v434_v4, %v433_v3  ;;  %v1511_v13 = vpack.i.bf16 %v430_v6, %v429_v5  ;;  %v1347_v16 = vcombine.high %v425_v1, %v426_v7  ;;  %v1346_v17 = vcombine.low %v425_v1, %v426_v7  ;;  %s2125_s21 = smov 107   ;;  %780 = vmatprep.mubr.bf16.mxu0 %v1789_v20  ;;  %s2126_s15 = smov 106   ;;  %v718_v22 = vld [vmem:[#allocation8 + $0x8] sm:$0xff] }
  0xf5   : > { %v1526_v14 = vpack.i.bf16 %v436_v9, %v435_v8  ;;  %v1516_v15 = vpack.i.bf16 %v432_v11, %v431_v10  ;;  %v1349_v18 = vcombine.high %v427_v0, %v428_v2  ;;  %v1348_v19 = vcombine.low %v427_v0, %v428_v2  ;;  %s1345_s16 = sshll.u32 %s2461_s2, 3  ;;  %s1370_s20 = sshll.u32 %s2197_s11, 7 }
  0xf6   : > { %1522 = vrot.lane.b32.xlu1 %v1521_v12, %s2119_s1  ;;  %1512 = vrot.lane.b32.xlu0 %v1511_v13, %s2119_s1  ;;  %v2127_v21 = vmov 0   ;;  %v837_v25 = vshrl.u32 %v836_v24, 7  ;;  %vm461_vm0 = vcmask 1039360   ;;  %vm490_vm1 = vcmask 1031168   ;;  %s423_s10 = scalar_lea.vmem [#allocation16], %s1345_s16  ;;  %p2706_p7 = scmp.ne.s32.totalorder %s2694_s19, 0 }
  0xf7   : > { %748 = vmatprep.subr.bf16.mxu0 %v1347_v16  ;;  %1672 = vset.pattern.permute.xlu1 %v2127_v21  ;;  %vm519_vm2 = vcmask 965632   ;;  %vm548_vm3 = vcmask 957440   ;;  %vm577_vm4 = vcmask 949248   ;;  %vm606_vm5 = vcmask 883712   ;;  %s1183_s22 = sshll.u32 %s423_s10, 4  ;;  %s2623_s22 = int_to_ptr.vmem [resolvable:$true] %s1183_s22 }
  0xf8   : > { %749 = vmatpush1.bf16.msra.mxu0 %v1346_v17  ;;  %1671 = vset.pattern.permute.xlu0 %v2127_v21  ;;  %v838_v27 = vsub.s32 0, %v837_v25  ;;  %v842_v28 = vsub.s32 1, %v837_v25  ;;  %vm635_vm6 = vcmask 875520   ;;  %vm664_vm7 = vcmask 867328   ;;  %s2023_s11 = scalar_lea.vmem %s2623_s22, 128 }
  0xf9   : > { %750 = vmatprep.subr.bf16.mxu0 %v1349_v18  ;;  %979 = vmatprep.subr.bf16.mxu1 %v2127_v21  ;;  %vm744_vm8 = vcmask 261120   ;;  %vm975_vm9 = vcmask 130048   ;;  %vm1166_vm10 = vcmask 814080   ;;  %p2024_p5 = scmp.ne.s32.totalorder %s2623_s22, %s2023_s11 }
  0xfa   : > { %1527 = vrot.lane.b32.xlu1 %v1526_v14, %s2119_s1  ;;  %1517 = vrot.lane.b32.xlu0 %v1516_v15, %s2119_s1  ;;  %v2520_v29 = vrot.slane %v834_v26, %v838_v27  ;;  %v2522_v30 = vrot.slane %v834_v26, %v842_v28 }
  0xfb   : > { %p2025_p4 = pnand %p2024_p5, %p2706_p7 }
  0xfc   : > { %751 = vmatpush1.bf16.msra.mxu0 %v1348_v19 }
  0xfd   : > { %p2026_p1 = pneg %p2025_p4 }
  0xfe   : > { %1537 = vrot.lane.b32.xlu1 %v1516_v15, %s2120_s12  ;;  %1532 = vrot.lane.b32.xlu0 %v1511_v13, %s2120_s12 }
 0x102   : > { %1547 = vrot.lane.b32.xlu1 %v1526_v14, %s2120_s12  ;;  %1542 = vrot.lane.b32.xlu0 %v1521_v12, %s2120_s12 }
 0x106   : > { %1557 = vrot.lane.b32.xlu1 %v1516_v15, %s2121_s25  ;;  %1552 = vrot.lane.b32.xlu0 %v1511_v13, %s2121_s25 }
 0x10a   : > { %1567 = vrot.lane.b32.xlu1 %v1526_v14, %s2121_s25  ;;  %1562 = vrot.lane.b32.xlu0 %v1521_v12, %s2121_s25 }
 0x10e   : > { %1577 = vrot.lane.b32.xlu1 %v1516_v15, %s2122_s26  ;;  %1572 = vrot.lane.b32.xlu0 %v1511_v13, %s2122_s26 }
 0x112   : > { %1587 = vrot.lane.b32.xlu1 %v1526_v14, %s2122_s26  ;;  %1582 = vrot.lane.b32.xlu0 %v1521_v12, %s2122_s26 }
 0x116   : > { %1597 = vrot.lane.b32.xlu1 %v1516_v15, %s2123_s14  ;;  %1592 = vrot.lane.b32.xlu0 %v1511_v13, %s2123_s14 }
 0x11a   : > { %1607 = vrot.lane.b32.xlu1 %v1526_v14, %s2123_s14  ;;  %1602 = vrot.lane.b32.xlu0 %v1521_v12, %s2123_s14 }
 0x11e   : > { %1617 = vrot.lane.b32.xlu1 %v1516_v15, %s2124_s9  ;;  %1612 = vrot.lane.b32.xlu0 %v1511_v13, %s2124_s9 }
 0x122   : > { %1627 = vrot.lane.b32.xlu1 %v1526_v14, %s2124_s9  ;;  %1622 = vrot.lane.b32.xlu0 %v1521_v12, %s2124_s9 }
 0x126   : > { %1637 = vrot.lane.b32.xlu1 %v1516_v15, %s2125_s21  ;;  %1632 = vrot.lane.b32.xlu0 %v1511_v13, %s2125_s21 }
 0x12a   : > { %1647 = vrot.lane.b32.xlu1 %v1526_v14, %s2125_s21  ;;  %1642 = vrot.lane.b32.xlu0 %v1521_v12, %s2125_s21 }
 0x12e   : > { %1657 = vrot.lane.b32.xlu1 %v1516_v15, %s2126_s15  ;;  %1652 = vrot.lane.b32.xlu0 %v1511_v13, %s2126_s15 }
 0x132   : > { %1667 = vrot.lane.b32.xlu1 %v1526_v14, %s2126_s15  ;;  %1662 = vrot.lane.b32.xlu0 %v1521_v12, %s2126_s15 }
 0x136   : > { %726 = vperm.xlu1 %1672, %v718_v22   ;;  %721 = vperm.xlu0 %1671, %v717_v23  }
 0x13a   : > { %844 = vrot.lane.b32.xlu1 %v2520_v29, %s2122_s26  ;;  %846 = vrot.lane.b32.xlu0 %v2522_v30, %s2122_s26 }
 0x168   : > { %v1523_v31 = vpop.permute.xlu1 %1522  ;;  %v1513_v32 = vpop.permute.xlu0 %1512 }
 0x169   : > { %v1515_v33 = vunpack.i.h.bf16 %v1513_v32  ;;  %v1514_v34 = vunpack.i.l.bf16 %v1513_v32  ;;  %v1525_v35 = vunpack.i.h.bf16 %v1523_v31  ;;  %v1524_v36 = vunpack.i.l.bf16 %v1523_v31 }
 0x16b   : > { %v462_v44 = vsel %vm461_vm0, %v1514_v34, %v1515_v33  ;;  %v464_v50 = vsel %vm461_vm0, %v1524_v36, %v1525_v35 }
 0x16c   : > { %v1528_v37 = vpop.permute.xlu1 %1527  ;;  %v1518_v38 = vpop.permute.xlu0 %1517 }
 0x16d   : > { %v1530_v39 = vunpack.i.h.bf16 %v1528_v37  ;;  %v1529_v40 = vunpack.i.l.bf16 %v1528_v37  ;;  %v1520_v41 = vunpack.i.h.bf16 %v1518_v38  ;;  %v1519_v42 = vunpack.i.l.bf16 %v1518_v38 }
 0x16f   : > { %v686_v43 = vpack.c.bf16 %v1520_v41, %v1515_v33  ;;  %v463_v45 = vsel %vm461_vm0, %v1519_v42, %v1520_v41  ;;  %v688_v46 = vpack.c.bf16 %v1530_v39, %v1525_v35  ;;  %v465_v51 = vsel %vm461_vm0, %v1529_v40, %v1530_v39 }
 0x170   : > { %v685_v47 = vpack.c.bf16 %v463_v45, %v462_v44  ;;  %v1538_v48 = vpop.permute.xlu1 %1537  ;;  %v1533_v49 = vpop.permute.xlu0 %1532  ;;  %v687_v59 = vpack.c.bf16 %v465_v51, %v464_v50 }
 0x171   : > { %752 = vmatprep.subr.bf16.mxu0 %v686_v43  ;;  %v1540_v52 = vunpack.i.h.bf16 %v1538_v48  ;;  %v1539_v53 = vunpack.i.l.bf16 %v1538_v48  ;;  %v1535_v54 = vunpack.i.h.bf16 %v1533_v49  ;;  %v1534_v55 = vunpack.i.l.bf16 %v1533_v49 }
 0x172   : > { %753 = vmatpush1.bf16.msra.mxu0 %v685_v47 }
 0x173   : > { %754 = vmatprep.subr.bf16.mxu0 %v688_v46  ;;  %v690_v56 = vpack.c.bf16 %v1540_v52, %v1535_v54  ;;  %v491_v57 = vsel %vm490_vm1, %v1534_v55, %v1535_v54  ;;  %v492_v58 = vsel %vm490_vm1, %v1539_v53, %v1540_v52 }
 0x174   : > { %v1548_v60 = vpop.permute.xlu1 %1547  ;;  %v1543_v61 = vpop.permute.xlu0 %1542  ;;  %v689_v2 = vpack.c.bf16 %v492_v58, %v491_v57 }
 0x175   : > { %v1550_v62 = vunpack.i.h.bf16 %v1548_v60  ;;  %v1549_v63 = vunpack.i.l.bf16 %v1548_v60  ;;  %v1545_v0 = vunpack.i.h.bf16 %v1543_v61  ;;  %v1544_v1 = vunpack.i.l.bf16 %v1543_v61 }
 0x176   : > { %755 = vmatpush1.bf16.msra.mxu0 %v687_v59 }
 0x177   : > { %v692_v3 = vpack.c.bf16 %v1550_v62, %v1545_v0  ;;  %756 = vmatprep.subr.bf16.mxu0 %v690_v56  ;;  %v493_v4 = vsel %vm490_vm1, %v1544_v1, %v1545_v0  ;;  %v494_v5 = vsel %vm490_vm1, %v1549_v63, %v1550_v62 }
 0x178   : > { %v1558_v6 = vpop.permute.xlu1 %1557  ;;  %v1553_v7 = vpop.permute.xlu0 %1552  ;;  %v691_v12 = vpack.c.bf16 %v494_v5, %v493_v4 }
 0x179   : > { %v1560_v8 = vunpack.i.h.bf16 %v1558_v6  ;;  %v1559_v9 = vunpack.i.l.bf16 %v1558_v6  ;;  %v1555_v10 = vunpack.i.h.bf16 %v1553_v7  ;;  %v1554_v11 = vunpack.i.l.bf16 %v1553_v7 }
 0x17a   : > { %757 = vmatpush1.bf16.msra.mxu0 %v689_v2 }
 0x17b   : > { %v694_v13 = vpack.c.bf16 %v1560_v8, %v1555_v10  ;;  %758 = vmatprep.subr.bf16.mxu0 %v692_v3  ;;  %v520_v14 = vsel %vm519_vm2, %v1554_v11, %v1555_v10  ;;  %v521_v15 = vsel %vm519_vm2, %v1559_v9, %v1560_v8 }
 0x17c   : > { %v1568_v16 = vpop.permute.xlu1 %1567  ;;  %v1563_v17 = vpop.permute.xlu0 %1562  ;;  %v693_v23 = vpack.c.bf16 %v521_v15, %v520_v14 }
 0x17d   : > { %v1570_v18 = vunpack.i.h.bf16 %v1568_v16  ;;  %v1569_v19 = vunpack.i.l.bf16 %v1568_v16  ;;  %v1565_v20 = vunpack.i.h.bf16 %v1563_v17  ;;  %v1564_v22 = vunpack.i.l.bf16 %v1563_v17 }
 0x17e   : > { %759 = vmatpush1.bf16.msra.mxu0 %v691_v12 }
 0x17f   : > { %v696_v24 = vpack.c.bf16 %v1570_v18, %v1565_v20  ;;  %760 = vmatprep.subr.bf16.mxu0 %v694_v13  ;;  %v522_v25 = vsel %vm519_vm2, %v1564_v22, %v1565_v20  ;;  %v523_v26 = vsel %vm519_vm2, %v1569_v19, %v1570_v18 }
 0x180   : > { %v1578_v27 = vpop.permute.xlu1 %1577  ;;  %v1573_v28 = vpop.permute.xlu0 %1572  ;;  %v695_v35 = vpack.c.bf16 %v523_v26, %v522_v25 }
 0x181   : > { %v1580_v31 = vunpack.i.h.bf16 %v1578_v27  ;;  %v1579_v32 = vunpack.i.l.bf16 %v1578_v27  ;;  %v1575_v33 = vunpack.i.h.bf16 %v1573_v28  ;;  %v1574_v34 = vunpack.i.l.bf16 %v1573_v28 }
 0x182   : > { %761 = vmatpush1.bf16.msra.mxu0 %v693_v23 }
 0x183   : > { %v698_v36 = vpack.c.bf16 %v1580_v31, %v1575_v33  ;;  %762 = vmatprep.subr.bf16.mxu0 %v696_v24  ;;  %v549_v37 = vsel %vm548_vm3, %v1574_v34, %v1575_v33  ;;  %v550_v38 = vsel %vm548_vm3, %v1579_v32, %v1580_v31 }
 0x184   : > { %v1588_v39 = vpop.permute.xlu1 %1587  ;;  %v1583_v40 = vpop.permute.xlu0 %1582  ;;  %v697_v45 = vpack.c.bf16 %v550_v38, %v549_v37 }
 0x185   : > { %v1590_v41 = vunpack.i.h.bf16 %v1588_v39  ;;  %v1589_v42 = vunpack.i.l.bf16 %v1588_v39  ;;  %v1585_v43 = vunpack.i.h.bf16 %v1583_v40  ;;  %v1584_v44 = vunpack.i.l.bf16 %v1583_v40 }
 0x186   : > { %763 = vmatpush1.bf16.msra.mxu0 %v695_v35 }
 0x187   : > { %v700_v46 = vpack.c.bf16 %v1590_v41, %v1585_v43  ;;  %764 = vmatprep.subr.bf16.mxu0 %v698_v36  ;;  %v551_v47 = vsel %vm548_vm3, %v1584_v44, %v1585_v43  ;;  %v552_v48 = vsel %vm548_vm3, %v1589_v42, %v1590_v41 }
 0x188   : > { %v1598_v49 = vpop.permute.xlu1 %1597  ;;  %v1593_v50 = vpop.permute.xlu0 %1592  ;;  %v699_v55 = vpack.c.bf16 %v552_v48, %v551_v47 }
 0x189   : > { %v1600_v51 = vunpack.i.h.bf16 %v1598_v49  ;;  %v1599_v52 = vunpack.i.l.bf16 %v1598_v49  ;;  %v1595_v53 = vunpack.i.h.bf16 %v1593_v50  ;;  %v1594_v54 = vunpack.i.l.bf16 %v1593_v50 }
 0x18a   : > { %765 = vmatpush1.bf16.msra.mxu0 %v697_v45 }
 0x18b   : > { %v702_v56 = vpack.c.bf16 %v1600_v51, %v1595_v53  ;;  %766 = vmatprep.subr.bf16.mxu0 %v700_v46  ;;  %v578_v57 = vsel %vm577_vm4, %v1594_v54, %v1595_v53  ;;  %v579_v58 = vsel %vm577_vm4, %v1599_v52, %v1600_v51 }
 0x18c   : > { %v1608_v59 = vpop.permute.xlu1 %1607  ;;  %v1603_v60 = vpop.permute.xlu0 %1602  ;;  %v701_v1 = vpack.c.bf16 %v579_v58, %v578_v57 }
 0x18d   : > { %v1610_v61 = vunpack.i.h.bf16 %v1608_v59  ;;  %v1609_v62 = vunpack.i.l.bf16 %v1608_v59  ;;  %v1605_v63 = vunpack.i.h.bf16 %v1603_v60  ;;  %v1604_v0 = vunpack.i.l.bf16 %v1603_v60  ;;  %v1787_v60 = vld [vmem:[#allocation7] ss:$12 sps:$4 sm:$0xff]  }
 0x18e   : > { %767 = vmatpush1.bf16.msra.mxu0 %v699_v55 }
 0x18f   : > { %v704_v2 = vpack.c.bf16 %v1610_v61, %v1605_v63  ;;  %768 = vmatprep.subr.bf16.mxu0 %v702_v56  ;;  %v580_v3 = vsel %vm577_vm4, %v1604_v0, %v1605_v63  ;;  %v581_v4 = vsel %vm577_vm4, %v1609_v62, %v1610_v61 }
 0x190   : > { %v1618_v5 = vpop.permute.xlu1 %1617  ;;  %v1613_v6 = vpop.permute.xlu0 %1612  ;;  %v703_v11 = vpack.c.bf16 %v581_v4, %v580_v3 }
 0x191   : > { %v1620_v7 = vunpack.i.h.bf16 %v1618_v5  ;;  %v1619_v8 = vunpack.i.l.bf16 %v1618_v5  ;;  %v1615_v9 = vunpack.i.h.bf16 %v1613_v6  ;;  %v1614_v10 = vunpack.i.l.bf16 %v1613_v6  ;;  %v1790_v6 = vld [vmem:[#allocation7 + $0x8] ss:$12 sps:$4 sm:$0xff]  }
 0x192   : > { %769 = vmatpush1.bf16.msra.mxu0 %v701_v1 }
 0x193   : > { %v706_v12 = vpack.c.bf16 %v1620_v7, %v1615_v9  ;;  %770 = vmatprep.subr.bf16.mxu0 %v704_v2  ;;  %v607_v13 = vsel %vm606_vm5, %v1614_v10, %v1615_v9  ;;  %v608_v14 = vsel %vm606_vm5, %v1619_v8, %v1620_v7 }
 0x194   : > { %v1628_v15 = vpop.permute.xlu1 %1627  ;;  %v1623_v16 = vpop.permute.xlu0 %1622  ;;  %v705_v22 = vpack.c.bf16 %v608_v14, %v607_v13 }
 0x195   : > { %v1630_v17 = vunpack.i.h.bf16 %v1628_v15  ;;  %v1629_v18 = vunpack.i.l.bf16 %v1628_v15  ;;  %v1625_v19 = vunpack.i.h.bf16 %v1623_v16  ;;  %v1624_v20 = vunpack.i.l.bf16 %v1623_v16 }
 0x196   : > { %771 = vmatpush1.bf16.msra.mxu0 %v703_v11 }
 0x197   : > { %v708_v23 = vpack.c.bf16 %v1630_v17, %v1625_v19  ;;  %772 = vmatprep.subr.bf16.mxu0 %v706_v12  ;;  %v609_v24 = vsel %vm606_vm5, %v1624_v20, %v1625_v19  ;;  %v610_v25 = vsel %vm606_vm5, %v1629_v18, %v1630_v17 }
 0x198   : > { %v1638_v26 = vpop.permute.xlu1 %1637  ;;  %v1633_v27 = vpop.permute.xlu0 %1632  ;;  %v707_v34 = vpack.c.bf16 %v610_v25, %v609_v24 }
 0x199   : > { %v1640_v28 = vunpack.i.h.bf16 %v1638_v26  ;;  %v1639_v31 = vunpack.i.l.bf16 %v1638_v26  ;;  %v1635_v32 = vunpack.i.h.bf16 %v1633_v27  ;;  %v1634_v33 = vunpack.i.l.bf16 %v1633_v27 }
 0x19a   : > { %773 = vmatpush1.bf16.msra.mxu0 %v705_v22 }
 0x19b   : > { %v710_v35 = vpack.c.bf16 %v1640_v28, %v1635_v32  ;;  %774 = vmatprep.subr.bf16.mxu0 %v708_v23  ;;  %v636_v36 = vsel %vm635_vm6, %v1634_v33, %v1635_v32  ;;  %v637_v37 = vsel %vm635_vm6, %v1639_v31, %v1640_v28  ;;  %v1793_v31 = vld [vmem:[#allocation10 + $0x4] ss:$8 sps:$4 sm:$0xff]   ;;  %v955_v32 = vld [vmem:[#allocation11 + $0x8] sm:$0xff]  ;;  %v954_v33 = vld [vmem:[#allocation11] sm:$0xff] }
 0x19c   : > { %v1648_v38 = vpop.permute.xlu1 %1647  ;;  %v1643_v39 = vpop.permute.xlu0 %1642  ;;  %v709_v44 = vpack.c.bf16 %v637_v37, %v636_v36  ;;  %1356 = vmatprep.mubr.msk.bf16.mxu1 %vm975_vm9, %v1793_v31 }
 0x19d   : > { %v1650_v40 = vunpack.i.h.bf16 %v1648_v38  ;;  %v1649_v41 = vunpack.i.l.bf16 %v1648_v38  ;;  %v1645_v42 = vunpack.i.h.bf16 %v1643_v39  ;;  %v1644_v43 = vunpack.i.l.bf16 %v1643_v39 }
 0x19e   : > { %775 = vmatpush1.bf16.msra.mxu0 %v707_v34 }
 0x19f   : > { %v712_v45 = vpack.c.bf16 %v1650_v40, %v1645_v42  ;;  %776 = vmatprep.subr.bf16.mxu0 %v710_v35  ;;  %v638_v46 = vsel %vm635_vm6, %v1644_v43, %v1645_v42  ;;  %v639_v47 = vsel %vm635_vm6, %v1649_v41, %v1650_v40 }
 0x1a0   : > { %v1658_v48 = vpop.permute.xlu1 %1657  ;;  %v1653_v49 = vpop.permute.xlu0 %1652  ;;  %v711_v54 = vpack.c.bf16 %v639_v47, %v638_v46 }
 0x1a1   : > { %v1660_v50 = vunpack.i.h.bf16 %v1658_v48  ;;  %v1659_v51 = vunpack.i.l.bf16 %v1658_v48  ;;  %v1655_v52 = vunpack.i.h.bf16 %v1653_v49  ;;  %v1654_v53 = vunpack.i.l.bf16 %v1653_v49 }
 0x1a2   : > { %777 = vmatpush1.bf16.msra.mxu0 %v709_v44 }
 0x1a3   : > { %v666_v55 = vsel %vm664_vm7, %v1659_v51, %v1660_v50  ;;  %v714_v56 = vpack.c.bf16 %v1660_v50, %v1655_v52  ;;  %v665_v57 = vsel %vm664_vm7, %v1654_v53, %v1655_v52  ;;  %778 = vmatprep.subr.bf16.mxu0 %v712_v45 }
 0x1a4   : > { %v1668_v58 = vpop.permute.xlu1 %1667  ;;  %v1663_v59 = vpop.permute.xlu0 %1662  ;;  %v713_v1 = vpack.c.bf16 %v666_v55, %v665_v57 }
 0x1a5   : > { %v1670_v61 = vunpack.i.h.bf16 %v1668_v58  ;;  %v1669_v62 = vunpack.i.l.bf16 %v1668_v58  ;;  %v1665_v63 = vunpack.i.h.bf16 %v1663_v59  ;;  %v1664_v0 = vunpack.i.l.bf16 %v1663_v59 }
 0x1a6   : > { %779 = vmatpush1.bf16.msra.mxu0 %v711_v54 }
 0x1a7   : > { %791 = vmatprep.subr.bf16.mxu0 %v714_v56  ;;  %v668_v2 = vsel %vm664_vm7, %v1669_v62, %v1670_v61  ;;  %v716_v3 = vpack.c.bf16 %v1670_v61, %v1665_v63  ;;  %v667_v4 = vsel %vm664_vm7, %v1664_v0, %v1665_v63 }
 0x1a8   : > { %v715_v5 = vpack.c.bf16 %v668_v2, %v667_v4 }
 0x1a9   : > { %781 = vmatmul.mubr.bf16.vlgmr.msra.gmra.mrb[0].mxu0 %v1787_v60 }
 0x1aa   : > { %792 = vmatpush1.bf16.msra.mxu0 %v713_v1  ;;  %823 = vmatprep.mubr.bf16.mxu0 %v2127_v21 }
 0x1ab   : > { %793 = vmatprep.subr.bf16.mxu0 %v716_v3 }
 0x1ae   : > { %794 = vmatpush1.bf16.msra.mxu0 %v715_v5 }
 0x1b5   : > { %1353 = vmatmul.mubr.msk.bf16.vlgmr.msra.gmra.mrb[0].mxu0 %vm744_vm8, %v1790_v6  ;;  %v727_v7 = vpop.permute.xlu1 %726  ;;  %v722_v8 = vpop.permute.xlu0 %721 }
 0x1b9   : > { %v845_v9 = vpop.permute.xlu1 %844  ;;  %v847_v10 = vpop.permute.xlu0 %846 }
 0x1ba   : > { %v848_v12 = vsel %vm548_vm3, %v845_v9, %v847_v10 }
 0x288   : > { %v825_v11 = vpop.f32.mrb[0].mxu0 }
 0x289   : > { %v1371_v13 = vadd.f32 %v825_v11, %v722_v8  ;;  %v827_v14 = vpop.f32.mrb[1].mxu0 }
 0x28a   : > { %v1372_v15 = vadd.f32 %v827_v14, %v722_v8  ;;  %v829_v16 = vpop.f32.mrb[2].mxu0 }
 0x28b   : > { %v1373_v17 = vadd.f32 %v829_v16, %v727_v7  ;;  %v851_v18 = vmul.f32 %v1371_v13, %v848_v12  ;;  %v831_v19 = vpop.f32.mrb[3].mxu0 }
 0x28c   : > { %v852_v20 = vmul.f32 %v1372_v15, %v847_v10  ;;  %v1374_v22 = vadd.f32 %v831_v19, %v727_v7 }
 0x28d   : > { %v853_v23 = vmul.f32 %v1373_v17, %v848_v12 }
 0x28e   : > { %v854_v24 = vmul.f32 %v1374_v22, %v847_v10  ;;  %v1678_v25 = vpack.i.bf16 %v852_v20, %v851_v18 }
 0x28f   : > { %v1708_v26 = vpack.i.bf16 %v853_v23, %v851_v18  ;;  %v945_v27 = vpack.c.bf16 %v853_v23, %v851_v18 }
 0x290   : > { %v1713_v28 = vpack.i.bf16 %v854_v24, %v853_v23 }
 0x291   : > { %1709 = vrot.lane.b32.xlu0 %v1708_v26, %s2120_s12  ;;  %1674 = vrot.lane.b32.xlu1 %v1708_v26, %s2119_s1 }
 0x292   : > { %980 = vmatpush1.bf16.msra.mxu1 %v945_v27 }
 0x293   : > { %981 = vmatprep.subr.bf16.mxu1 %v2127_v21 }
 0x295   : > { %1714 = vrot.lane.b32.xlu0 %v1713_v28, %s2121_s25  ;;  %1679 = vrot.lane.b32.xlu1 %v1678_v25, %s2121_s25 }
 0x299   : > { %1719 = vrot.lane.b32.xlu0 %v1713_v28, %s2122_s26  ;;  %1684 = vrot.lane.b32.xlu1 %v1678_v25, %s2122_s26 }
 0x29d   : > { %1724 = vrot.lane.b32.xlu0 %v1713_v28, %s2123_s14  ;;  %1689 = vrot.lane.b32.xlu1 %v1678_v25, %s2123_s14 }
 0x2a1   : > { %1729 = vrot.lane.b32.xlu0 %v1713_v28, %s2124_s9  ;;  %1694 = vrot.lane.b32.xlu1 %v1678_v25, %s2124_s9 }
 0x2a5   : > { %1734 = vrot.lane.b32.xlu0 %v1713_v28, %s2125_s21  ;;  %1699 = vrot.lane.b32.xlu1 %v1678_v25, %s2125_s21 }
 0x2a9   : > { %1739 = vrot.lane.b32.xlu0 %v1713_v28, %s2126_s15  ;;  %1704 = vrot.lane.b32.xlu1 %v1678_v25, %s2126_s15 }
 0x2ad   : > { %963 = vperm.xlu0 %1671, %v955_v32   ;;  %958 = vperm.xlu1 %1672, %v954_v33   ;;  %v1791_v33 = vld [vmem:[#allocation10] ss:$8 sps:$4 sm:$0xff]  }
 0x2b1   : > { %1024 = vrot.lane.b32.xlu0 %v2522_v30, %s2126_s15  ;;  %1022 = vrot.lane.b32.xlu1 %v2520_v29, %s2126_s15 }
 0x303   : > { %v1710_v34 = vpop.permute.xlu0 %1709  ;;  %v1675_v35 = vpop.permute.xlu1 %1674 }
 0x304   : > { %v1677_v36 = vunpack.i.h.bf16 %v1675_v35  ;;  %v1676_v37 = vunpack.i.l.bf16 %v1675_v35  ;;  %v1712_v38 = vunpack.i.h.bf16 %v1710_v34  ;;  %v1711_v39 = vunpack.i.l.bf16 %v1710_v34 }
 0x306   : > { %v946_v40 = vpack.c.bf16 %v1677_v36, %v1676_v37  ;;  %v947_v30 = vpack.c.bf16 %v1712_v38, %v1711_v39 }
 0x307   : > { %v1715_v41 = vpop.permute.xlu0 %1714  ;;  %v1680_v42 = vpop.permute.xlu1 %1679 }
 0x308   : > { %v1717_v43 = vunpack.i.h.bf16 %v1715_v41  ;;  %v1716_v44 = vunpack.i.l.bf16 %v1715_v41  ;;  %v1682_v45 = vunpack.i.h.bf16 %v1680_v42  ;;  %v1681_v46 = vunpack.i.l.bf16 %v1680_v42  ;;  %982 = vmatpush1.bf16.msra.mxu1 %v946_v40 }
 0x309   : > { %983 = vmatprep.subr.bf16.mxu1 %v2127_v21 }
 0x30a   : > { %v879_v29 = vsel %vm519_vm2, %v1681_v46, %v1682_v45  ;;  %v880_v49 = vsel %vm519_vm2, %v1716_v44, %v1717_v43 }
 0x30b   : > { %v1720_v47 = vpop.permute.xlu0 %1719  ;;  %v1685_v48 = vpop.permute.xlu1 %1684  ;;  %v948_v54 = vpack.c.bf16 %v880_v49, %v879_v29  ;;  %v1092_v49 = vld [vmem:[#allocation14 + $0x8] sm:$0xff] }
 0x30c   : > { %v1722_v50 = vunpack.i.h.bf16 %v1720_v47  ;;  %v1721_v51 = vunpack.i.l.bf16 %v1720_v47  ;;  %v1687_v52 = vunpack.i.h.bf16 %v1685_v48  ;;  %v1686_v53 = vunpack.i.l.bf16 %v1685_v48  ;;  %984 = vmatpush1.bf16.msra.mxu1 %v947_v30 }
 0x30d   : > { %985 = vmatprep.subr.bf16.mxu1 %v2127_v21 }
 0x30e   : > { %v891_v57 = vsel %vm548_vm3, %v1686_v53, %v1687_v52  ;;  %v892_v58 = vsel %vm548_vm3, %v1721_v51, %v1722_v50  ;;  %v1091_v50 = vld [vmem:[#allocation14] sm:$0xff]  ;;  %v1794_v51 = vld [vmem:[#allocation13 + $0x4] ss:$8 sps:$4 sm:$0xff]  }
 0x30f   : > { %v1725_v55 = vpop.permute.xlu0 %1724  ;;  %v1690_v56 = vpop.permute.xlu1 %1689  ;;  %v949_v63 = vpack.c.bf16 %v892_v58, %v891_v57 }
 0x310   : > { %v1727_v59 = vunpack.i.h.bf16 %v1725_v55  ;;  %v1726_v60 = vunpack.i.l.bf16 %v1725_v55  ;;  %v1692_v61 = vunpack.i.h.bf16 %v1690_v56  ;;  %v1691_v62 = vunpack.i.l.bf16 %v1690_v56  ;;  %986 = vmatpush1.bf16.msra.mxu1 %v948_v54 }
 0x311   : > { %987 = vmatprep.subr.bf16.mxu1 %v2127_v21 }
 0x312   : > { %v903_v2 = vsel %vm577_vm4, %v1691_v62, %v1692_v61  ;;  %v904_v3 = vsel %vm577_vm4, %v1726_v60, %v1727_v59 }
 0x313   : > { %v1730_v0 = vpop.permute.xlu0 %1729  ;;  %v1695_v1 = vpop.permute.xlu1 %1694  ;;  %v950_v8 = vpack.c.bf16 %v904_v3, %v903_v2 }
 0x314   : > { %v1732_v4 = vunpack.i.h.bf16 %v1730_v0  ;;  %v1731_v5 = vunpack.i.l.bf16 %v1730_v0  ;;  %v1697_v6 = vunpack.i.h.bf16 %v1695_v1  ;;  %v1696_v7 = vunpack.i.l.bf16 %v1695_v1  ;;  %988 = vmatpush1.bf16.msra.mxu1 %v949_v63 }
 0x315   : > { %989 = vmatprep.subr.bf16.mxu1 %v2127_v21 }
 0x316   : > { %v915_v11 = vsel %vm606_vm5, %v1696_v7, %v1697_v6  ;;  %v916_v12 = vsel %vm606_vm5, %v1731_v5, %v1732_v4 }
 0x317   : > { %v1735_v9 = vpop.permute.xlu0 %1734  ;;  %v1700_v10 = vpop.permute.xlu1 %1699  ;;  %v951_v17 = vpack.c.bf16 %v916_v12, %v915_v11 }
 0x318   : > { %v1737_v13 = vunpack.i.h.bf16 %v1735_v9  ;;  %v1736_v14 = vunpack.i.l.bf16 %v1735_v9  ;;  %v1702_v15 = vunpack.i.h.bf16 %v1700_v10  ;;  %v1701_v16 = vunpack.i.l.bf16 %v1700_v10  ;;  %990 = vmatpush1.bf16.msra.mxu1 %v950_v8 }
 0x319   : > { %991 = vmatprep.subr.bf16.mxu1 %v2127_v21 }
 0x31a   : > { %v927_v20 = vsel %vm635_vm6, %v1701_v16, %v1702_v15  ;;  %v928_v22 = vsel %vm635_vm6, %v1736_v14, %v1737_v13 }
 0x31b   : > { %v1740_v18 = vpop.permute.xlu0 %1739  ;;  %v1705_v19 = vpop.permute.xlu1 %1704  ;;  %v952_v27 = vpack.c.bf16 %v928_v22, %v927_v20  ;;  %v1796_v20 = vld [vmem:[#allocation13] ss:$8 sps:$4 sm:$0xff]  }
 0x31c   : > { %v1742_v23 = vunpack.i.h.bf16 %v1740_v18  ;;  %v1741_v24 = vunpack.i.l.bf16 %v1740_v18  ;;  %v1707_v25 = vunpack.i.h.bf16 %v1705_v19  ;;  %v1706_v26 = vunpack.i.l.bf16 %v1705_v19  ;;  %992 = vmatpush1.bf16.msra.mxu1 %v951_v17 }
 0x31d   : > { %993 = vmatprep.subr.bf16.mxu1 %v2127_v21 }
 0x31e   : > { %v939_v28 = vsel %vm664_vm7, %v1706_v26, %v1707_v25  ;;  %v940_v31 = vsel %vm664_vm7, %v1741_v24, %v1742_v23 }
 0x31f   : > { %v953_v32 = vpack.c.bf16 %v940_v31, %v939_v28 }
 0x320   : > { %994 = vmatpush1.bf16.msra.mxu1 %v952_v27 }
 0x321   : > { %995 = vmatprep.subr.bf16.mxu1 %v2127_v21 }
 0x324   : > { %996 = vmatpush1.bf16.msra.mxu1 %v953_v32 }
 0x325   : > { %1115 = vmatprep.subr.bf16.mxu1 %v2127_v21 }
 0x327   : > { %1012 = vmatmul.mubr.bf16.vlgmr.msra.gmra.mrb[0].mxu1 %v1791_v33 }
 0x328   : > { %1359 = vmatprep.mubr.msk.bf16.mxu1 %vm975_vm9, %v1794_v51 }
 0x32c   : > { %v964_v34 = vpop.permute.xlu0 %963  ;;  %v959_v35 = vpop.permute.xlu1 %958 }
 0x330   : > { %v1025_v37 = vpop.permute.xlu0 %1024  ;;  %v1023_v40 = vpop.permute.xlu1 %1022 }
 0x331   : > { %v1026_v45 = vsel %vm664_vm7, %v1023_v40, %v1025_v37 }
 0x3fa   : > { %v1013_v36 = vpop.f32.mrb[0].mxu1 }
 0x3fb   : > { %v1014_v38 = vadd.f32 %v1013_v36, %v959_v35  ;;  %v1015_v39 = vpop.f32.mrb[1].mxu1 }
 0x3fc   : > { %v1016_v41 = vpop.f32.mrb[2].mxu1 }
 0x3fd   : > { %v1020_v42 = vmax.f32 %v1014_v38, 0.0  ;;  %v1017_v43 = vadd.f32 %v1016_v41, %v964_v34  ;;  %v1018_v44 = vpop.f32.mrb[3].mxu1 }
 0x3ff   : > { %v1021_v46 = vmax.f32 %v1017_v43, 0.0  ;;  %v1028_v30 = vmul.f32 %v1026_v45, %v1020_v42 }
 0x401   : > { %v1029_v47 = vmul.f32 %v1026_v45, %v1021_v46 }
 0x403   : > { %v1748_v48 = vpack.i.bf16 %v1029_v47, %v1028_v30  ;;  %v1082_v29 = vpack.c.bf16 %v1029_v47, %v1028_v30 }
 0x405   : > { %1749 = vrot.lane.b32.xlu0 %v1748_v48, %s2120_s12  ;;  %1744 = vrot.lane.b32.xlu1 %v1748_v48, %s2119_s1  ;;  %s2621_s1 = scalar_lea.hbm %s2675_s8, %s1370_s20  ;;  %s1170_s12 = scalar_lea.sflag [#allocation4], %s2461_s2 }
 0x406   : > { %1116 = vmatpush1.bf16.msra.mxu1 %v1082_v29 }
 0x407   : > { %1117 = vmatprep.subr.bf16.mxu1 %v2127_v21 }
 0x409   : > { %1759 = vrot.lane.b32.xlu0 %v1748_v48, %s2122_s26  ;;  %1754 = vrot.lane.b32.xlu1 %v1748_v48, %s2121_s25  ;;  %s2128_s25 = smov [#allocation16]  }
 0x40a   : > { %s2027_s26 = sshll.u32 %s2128_s25, 4  ;;  %s2028_s26 = int_to_ptr.vmem [resolvable:$false] %s2027_s26 }
 0x40b   : > { %p2030_p3 = scmp.lt.s32.totalorder %s2623_s22, %s2028_s26 }
 0x40d   : > { %1769 = vrot.lane.b32.xlu0 %v1748_v48, %s2124_s9  ;;  %1764 = vrot.lane.b32.xlu1 %v1748_v48, %s2123_s14  ;;  %s2029_s14 = scalar_lea.vmem %s2028_s26, 256 }
 0x40e   : > { %p2031_p8 = scmp.lt.s32.totalorder %s2029_s14, %s2023_s11 }
 0x410   : > { %p2032_p6 = por %p2031_p8, %p2030_p3 }
 0x411   : > { %1779 = vrot.lane.b32.xlu0 %v1748_v48, %s2126_s15  ;;  %1774 = vrot.lane.b32.xlu1 %v1748_v48, %s2125_s21 }
 0x412   : > { %p2033_p0 = pnand %p2032_p6, %p2026_p1 }
 0x415   : > { %1100 = vperm.xlu0 %1671, %v1092_v49   ;;  %1095 = vperm.xlu1 %1672, %v1091_v50  }
 0x477   : > { %v1750_v52 = vpop.permute.xlu0 %1749  ;;  %v1745_v53 = vpop.permute.xlu1 %1744 }
 0x478   : > { %v1747_v54 = vunpack.i.h.bf16 %v1745_v53  ;;  %v1746_v55 = vunpack.i.l.bf16 %v1745_v53  ;;  %v1752_v56 = vunpack.i.h.bf16 %v1750_v52  ;;  %v1751_v57 = vunpack.i.l.bf16 %v1750_v52 }
 0x47a   : > { %v1083_v58 = vpack.c.bf16 %v1747_v54, %v1746_v55  ;;  %v1084_v60 = vpack.c.bf16 %v1752_v56, %v1751_v57 }
 0x47b   : > { %v1755_v59 = vpop.permute.xlu1 %1754  ;;  %v1760_v63 = vpop.permute.xlu0 %1759 }
 0x47c   : > { %1118 = vmatpush1.bf16.msra.mxu1 %v1083_v58  ;;  %v1757_v61 = vunpack.i.h.bf16 %v1755_v59  ;;  %v1756_v62 = vunpack.i.l.bf16 %v1755_v59  ;;  %v1762_v0 = vunpack.i.h.bf16 %v1760_v63  ;;  %v1761_v1 = vunpack.i.l.bf16 %v1760_v63 }
 0x47d   : > { %1119 = vmatprep.subr.bf16.mxu1 %v2127_v21 }
 0x47e   : > { %v1085_v2 = vpack.c.bf16 %v1757_v61, %v1756_v62  ;;  %v1086_v4 = vpack.c.bf16 %v1762_v0, %v1761_v1 }
 0x47f   : > { %v1765_v3 = vpop.permute.xlu1 %1764  ;;  %v1770_v7 = vpop.permute.xlu0 %1769 }
 0x480   : > { %1120 = vmatpush1.bf16.msra.mxu1 %v1084_v60  ;;  %v1767_v5 = vunpack.i.h.bf16 %v1765_v3  ;;  %v1766_v6 = vunpack.i.l.bf16 %v1765_v3  ;;  %v1772_v8 = vunpack.i.h.bf16 %v1770_v7  ;;  %v1771_v9 = vunpack.i.l.bf16 %v1770_v7 }
 0x481   : > { %1121 = vmatprep.subr.bf16.mxu1 %v2127_v21 }
 0x482   : > { %v1087_v10 = vpack.c.bf16 %v1767_v5, %v1766_v6  ;;  %v1088_v12 = vpack.c.bf16 %v1772_v8, %v1771_v9 }
 0x483   : > { %v1775_v11 = vpop.permute.xlu1 %1774  ;;  %v1780_v15 = vpop.permute.xlu0 %1779 }
 0x484   : > { %1122 = vmatpush1.bf16.msra.mxu1 %v1085_v2  ;;  %v1777_v13 = vunpack.i.h.bf16 %v1775_v11  ;;  %v1776_v14 = vunpack.i.l.bf16 %v1775_v11  ;;  %v1782_v16 = vunpack.i.h.bf16 %v1780_v15  ;;  %v1781_v17 = vunpack.i.l.bf16 %v1780_v15 }
 0x485   : > { %1123 = vmatprep.subr.bf16.mxu1 %v2127_v21 }
 0x486   : > { %v1089_v18 = vpack.c.bf16 %v1777_v13, %v1776_v14  ;;  %v1090_v19 = vpack.c.bf16 %v1782_v16, %v1781_v17 }
 0x488   : > { %1124 = vmatpush1.bf16.msra.mxu1 %v1086_v4 }
 0x489   : > { %1125 = vmatprep.subr.bf16.mxu1 %v2127_v21 }
 0x48c   : > { %1126 = vmatpush1.bf16.msra.mxu1 %v1087_v10 }
 0x48d   : > { %1127 = vmatprep.subr.bf16.mxu1 %v2127_v21 }
 0x490   : > { %1128 = vmatpush1.bf16.msra.mxu1 %v1088_v12 }
 0x491   : > { %1129 = vmatprep.subr.bf16.mxu1 %v2127_v21 }
 0x494   : > { %1130 = vmatpush1.bf16.msra.mxu1 %v1089_v18  ;;  %v1096_v22 = vpop.permute.xlu1 %1095  ;;  %v1101_v26 = vpop.permute.xlu0 %1100 }
 0x495   : > { %1131 = vmatprep.subr.bf16.mxu1 %v2127_v21 }
 0x498   : > { %1132 = vmatpush1.bf16.msra.mxu1 %v1090_v19 }
 0x49b   : > { %1148 = vmatmul.mubr.bf16.vlgmr.msra.gmra.mrb[4].mxu1 %v1796_v20 }
 0x56e   : > { %v1149_v23 = vpop.f32.mrb[4].mxu1 }
 0x56f   : > { %v1150_v24 = vadd.f32 %v1149_v23, %v1096_v22  ;;  %v1151_v25 = vpop.f32.mrb[5].mxu1 }
 0x570   : > { %v1152_v27 = vpop.f32.mrb[6].mxu1 }
 0x571   : > { %v1156_v28 = vmax.f32 %v1150_v24, 0.0  ;;  %v1153_v31 = vadd.f32 %v1152_v27, %v1101_v26  ;;  %v1154_v32 = vpop.f32.mrb[7].mxu1 }
 0x573   : > { %v1368_v21 = vpack.c.bf16 %v1156_v28, %v1156_v28  ;;  %v1157_v33 = vmax.f32 %v1153_v31, 0.0 }
 0x575   : > { %1167 = vst.msk [vmem:[%s423_s10] sm:$0xf] %vm1166_vm10, %v1368_v21  ;;  %v1369_v34 = vpack.c.bf16 %v1157_v33, %v1157_v33 }
 0x577   : > { %1168 = vst.msk [vmem:[%s423_s10 + $0x4] sm:$0xf] %vm1166_vm10, %v1369_v34 }
 0x578   : > { %2036 = shalt.err (!%p2033_p0)
}
 0x579   : > { %s2037_s9 = scalar_lea.hbm %s2621_s1, 128  ;;  %s2041_s16 = scalar_lea.hbm %s2675_s8, 256 }
 0x57a   : > { %p2038_p2 = scmp.ne.s32.totalorder %s2621_s1, %s2037_s9  ;;  %p2042_p12 = scmp.lt.u32.totalorder %s2621_s1, %s2675_s8 }
 0x57b   : > { %p2043_p11 = scmp.lt.u32.totalorder %s2041_s16, %s2037_s9  ;;  %p2045_p5 = scmp.lt.u32.totalorder %s2037_s9, %s2621_s1 }
 0x57c   : > { %p2039_p9 = pnand %p2038_p2, %p2706_p7 }
 0x57d   : > { %p2044_p13 = por %p2043_p11, %p2042_p12 }
 0x57e   : > { %p2040_p10 = pneg %p2039_p9 }
 0x57f   : > { %p2046_p4 = por %p2045_p5, %p2044_p13 }
 0x581   : > { %p2047_p1 = pnand %p2046_p4, %p2040_p10 }
 0x583   : > { %2050 = shalt.err (!%p2047_p1)
}
 0x584   : > { %s2129_s18 = smov 64   ;;  %s2130_s17 = smov 4  }
 0x585   : > { %1409 = dma.vmem_to_hbm [thread:$0]  (%p2706_p7), %s2623_s22, 128, %s2621_s1, %s1170_s12, %s2129_s18, %s2129_s18, %s2130_s17  }
 0x586 PF: > { %s1198_s11 = sand.u32 1, %s2093_s27   ;;  %p2707_p3 = scmp.ne.s32.totalorder %s2695_s13, 0 }
 0x587   : > { %p2708_p8 = scmp.ge.s32.totalorder %s2105_s30, 2  ;;  %s1199_s25 = scalar_lea.sflag [#allocation4], %s1198_s11 }
 0x589   : > { %p1438_p6 = pnand %p2708_p8, %p2707_p3 }
 0x58b   : > { %2088 = dma.done.wait (!%p1438_p6), %s1199_s25, 128  }
 0x58c   : > { %2090 = vsyncadd (!%p1438_p6), %s1199_s25, 4294967168  ;;  %p25_p0 = scmp.ge.s32.totalorder %s2385_s23, 4   ;;  %s2709_s27 = smov %s2097_s28 }
 0x58d   : > { %s2710_s28 = smov %s2101_s29  ;;  %s2711_s29 = smov %s2397_s24 }
 0x58e   : > { %s2712_s30 = smov %s2385_s23  ;;  %27 = sbr.rel (!%p25_p0) target bundleno = 12 (0xc), region = 125 }
 0x595   :  { %1204 = vsyncpa [#allocation3], 1 }
 0x596   :  { %1206 = vsyncpa [#allocation3 + $0x1], 1 }
 0x597   :  { %1207 = vsyncpa [#allocation6], 1 }
 0x598   :  { %1208 = vsyncpa [#allocation9], 1 }
 0x599   :  { %1209 = vsyncpa [#allocation12], 1 }
 0x59a   :  { %1210 = vsyncpa [#allocation15], 1 }
 0x59b   :  { %1211 = vsyncpa [#allocation4], 1 }
 0x59c   :  { %1213 = vsyncpa [#allocation4 + $0x1], 1 }

// kernel: _lambda_.9
= control target key start
LH: loop header
LB: loop body
LE: loop exit
PB: predicated region body
PF: predicated region fallthrough
CT: control target
= control target key end

     0   :  { %s3247_s0 = inlined_call_operand.hbm [shape: bf16[2,16,438], index: 0, kind: input, shape index: {}]   ;;  %s3248_s1 = inlined_call_operand.hbm [shape: f32[1,438], index: 1, kind: input, shape index: {}]   ;;  %s3249_s2 = inlined_call_operand.hbm [shape: bf16[8,144], index: 2, kind: input, shape index: {}]   ;;  %s3250_s3 = inlined_call_operand.hbm [shape: f32[8,1], index: 3, kind: input, shape index: {}]   ;;  %s3251_s4 = inlined_call_operand.hbm [shape: bf16[8,72], index: 4, kind: input, shape index: {}]   ;;  %s3252_s5 = inlined_call_operand.hbm [shape: f32[8,1], index: 5, kind: input, shape index: {}]   ;;  %s3253_s6 = inlined_call_operand.hbm [shape: bf16[8,72], index: 6, kind: input, shape index: {}]   ;;  %s3254_s7 = inlined_call_operand.hbm [shape: f32[8,1], index: 7, kind: input, shape index: {}]   ;;  %s3255_s8 = inlined_call_operand.hbm [shape: bf16[1,8], index: 8, kind: input, shape index: {}]   ;;  %s3256_s9 = inlined_call_operand.<no memory space> [shape: f32[1,1], index: 9, kind: input, shape index: {}]   ;;  %s3257_s10 = inlined_call_operand.hbm [shape: f32[2,1,324], index: 10, kind: output, shape index: {}]  }
   0x1   :  { %3261 = sst [smem:[#allocation25_spill]] %s3248_s1  ;;  %v15_v0 = vstv %s3256_s9 }
   0x2   :  { %16 = vst [vmem:[#allocation2] sm:$0x1] %v15_v0 }
   0x3   :  { %17 = vsyncpa [#allocation4], 0 }
   0x4   :  { %19 = vsyncpa [#allocation4 + $0x1], 0 }
   0x5   :  { %20 = vsyncpa [#allocation7], 0 }
   0x6   :  { %21 = vsyncpa [#allocation10], 0 }
   0x7   :  { %22 = vsyncpa [#allocation13], 0 }
   0x8   :  { %23 = vsyncpa [#allocation16], 0 }
   0x9   :  { %24 = vsyncpa [#allocation5], 0 }
   0xa   :  { %26 = vsyncpa [#allocation5 + $0x1], 0  ;;  %s2619_s15 = smov 0   ;;  %s2621_s16 = smov 0  }
   0xb   :  { %s2623_s17 = smov 0   ;;  %s2625_s18 = smov 0  }
   0xc LB: > { %s2536_s9 = smov [#allocation6]   ;;  %s2640_s20 = sadd.s32 4294967295, %s2534_s18   ;;  %s2534_s18 = sphi %s2625_s18, %s3287_s18   ;;  %s2530_s17 = sphi %s2623_s17, %s3286_s17   ;;  %s2526_s16 = sphi %s2621_s16, %s3285_s16   ;;  %s2522_s15 = sphi %s2619_s15, %s3284_s15  }
   0xd   : > { %s291_s19 = sshll.u32 %s2536_s9, 4  ;;  %p1699_p0 = scmp.ge.s32.totalorder %s2534_s18, 1  ;;  %s2645_s19 = int_to_ptr.vmem [resolvable:$true] %s291_s19 }
   0xe   : > { %p3258_p1 = scmp.eq.s32.totalorder %s2640_s20, 0  ;;  %p278_p2 = scmp.lt.s32.totalorder %s2534_s18, 3 }
   0xf   : > { %s2537_s22 = smov [#allocation9]   ;;  %s2538_s24 = smov [#allocation12]  }
  0x10   : > { %p2647_p3 = pnand %p1699_p0, %p278_p2  ;;  %s313_s23 = sshll.u32 %s2537_s22, 4  ;;  %s2654_s23 = int_to_ptr.vmem [resolvable:$true] %s313_s23 }
  0x11   : > { %s335_s25 = sshll.u32 %s2538_s24, 4  ;;  %s2539_s27 = smov [#allocation15]   ;;  %s2662_s25 = int_to_ptr.vmem [resolvable:$true] %s335_s25 }
  0x12   : > { %s3262_s21 = scalar_select %p2647_p3, 1, 0 }
  0x13   : > { %p1829_p5 = pneg %p2647_p3  ;;  %s2664_s28 = sshll.u32 %s2539_s27, 4  ;;  %s358_s28 = int_to_ptr.vmem [resolvable:$true] %s2664_s28 }
  0x14   : > { %s3264_s1 = sld [smem:[#allocation25_spill]] }
  0x15   : > { %p2658_p6 = pnand %p1829_p5, %p3258_p1 }
  0x17   : > { %p2674_p8 = pneg %p2658_p6 }
  0x1a   : > { %s2198_s11 = scalar_lea.hbm %s3264_s1, 64 }
  0x1b   : > { %p2199_p7 = scmp.ne.s32.totalorder %s3264_s1, %s2198_s11  ;;  %p2205_p11 = scmp.lt.u32.totalorder %s2198_s11, %s3264_s1 }
  0x1d   : > { %p2201_p9 = pnand %p2674_p8, %p2199_p7 }
  0x1f   : > { %p2202_p10 = pneg %p2201_p9 }
  0x21   : > { %p2207_p12 = pnand %p2205_p11, %p2202_p10 }
  0x23   : > { %2210 = shalt.err (!%p2207_p12)
}
  0x24   : > { %s2211_s24 = scalar_lea.vmem %s2645_s19, 64  ;;  %p2219_p5 = scmp.lt.s32.totalorder %s2645_s19, %s2645_s19 }
  0x25   : > { %p2212_p13 = scmp.ne.s32.totalorder %s2645_s19, %s2211_s24  ;;  %p2220_p4 = scmp.lt.s32.totalorder %s2211_s24, %s2211_s24 }
  0x27   : > { %p2214_p0 = pnand %p2212_p13, %p2674_p8  ;;  %p2221_p7 = por %p2220_p4, %p2219_p5 }
  0x29   : > { %p2215_p2 = pneg %p2214_p0 }
  0x2b   : > { %p2222_p9 = pnand %p2221_p7, %p2215_p2 }
  0x2d   : > { %2225 = shalt.err (!%p2222_p9)
}
  0x2e   : > { %1832 = dma.hbm_to_vmem [thread:$0]  (!%p2658_p6), %s3264_s1, 64, %s2645_s19, [#allocation7]  }
  0x2f   : > { %s2226_s12 = scalar_lea.hbm %s3250_s3, 128 }
  0x30   : > { %p2227_p10 = scmp.ne.s32.totalorder %s3250_s3, %s2226_s12  ;;  %p2233_p12 = scmp.lt.u32.totalorder %s2226_s12, %s3250_s3 }
  0x32   : > { %p2229_p4 = pnand %p2227_p10, %p2674_p8 }
  0x34   : > { %p2230_p11 = pneg %p2229_p4 }
  0x36   : > { %p2235_p13 = pnand %p2233_p12, %p2230_p11 }
  0x38   : > { %2238 = shalt.err (!%p2235_p13)
}
  0x39   : > { %s2239_s19 = scalar_lea.vmem %s2654_s23, 128  ;;  %p2247_p7 = scmp.lt.s32.totalorder %s2654_s23, %s2654_s23 }
  0x3a   : > { %p2240_p0 = scmp.ne.s32.totalorder %s2654_s23, %s2239_s19  ;;  %p2248_p9 = scmp.lt.s32.totalorder %s2239_s19, %s2239_s19 }
  0x3c   : > { %p2242_p2 = pnand %p2240_p0, %p2674_p8  ;;  %p2249_p10 = por %p2248_p9, %p2247_p7 }
  0x3e   : > { %p2243_p5 = pneg %p2242_p2 }
  0x40   : > { %p2250_p4 = pnand %p2249_p10, %p2243_p5 }
  0x42   : > { %2253 = shalt.err (!%p2250_p4)
}
  0x43   : > { %1838 = dma.hbm_to_vmem [thread:$0]  (!%p2658_p6), %s3250_s3, 128, %s2654_s23, [#allocation10]  }
  0x44   : > { %s2254_s12 = scalar_lea.hbm %s3252_s5, 128 }
  0x45   : > { %p2255_p11 = scmp.ne.s32.totalorder %s3252_s5, %s2254_s12  ;;  %p2261_p0 = scmp.lt.u32.totalorder %s2254_s12, %s3252_s5 }
  0x47   : > { %p2257_p12 = pnand %p2255_p11, %p2674_p8 }
  0x49   : > { %p2258_p13 = pneg %p2257_p12 }
  0x4b   : > { %p2263_p2 = pnand %p2261_p0, %p2258_p13 }
  0x4d   : > { %2266 = shalt.err (!%p2263_p2)
}
  0x4e   : > { %s2267_s23 = scalar_lea.vmem %s2662_s25, 128  ;;  %p2275_p10 = scmp.lt.s32.totalorder %s2662_s25, %s2662_s25 }
  0x4f   : > { %p2268_p5 = scmp.ne.s32.totalorder %s2662_s25, %s2267_s23  ;;  %p2276_p4 = scmp.lt.s32.totalorder %s2267_s23, %s2267_s23 }
  0x51   : > { %p2270_p7 = pnand %p2268_p5, %p2674_p8  ;;  %p2277_p11 = por %p2276_p4, %p2275_p10 }
  0x53   : > { %p2271_p9 = pneg %p2270_p7 }
  0x55   : > { %p2278_p12 = pnand %p2277_p11, %p2271_p9 }
  0x57   : > { %2281 = shalt.err (!%p2278_p12)
}
  0x58   : > { %1844 = dma.hbm_to_vmem [thread:$0]  (!%p2658_p6), %s3252_s5, 128, %s2662_s25, [#allocation13]  }
  0x59   : > { %s2540_s29 = smov [#allocation8]   ;;  %s2282_s13 = scalar_lea.hbm %s3254_s7, 128 }
  0x5a   : > { %s302_s30 = sshll.u32 %s2540_s29, 4  ;;  %p2283_p13 = scmp.ne.s32.totalorder %s3254_s7, %s2282_s13  ;;  %s303_s30 = int_to_ptr.vmem [resolvable:$true] %s302_s30 }
  0x5b   : > { %p2289_p5 = scmp.lt.u32.totalorder %s2282_s13, %s3254_s7 }
  0x5c   : > { %p2285_p0 = pnand %p2283_p13, %p2674_p8 }
  0x5e   : > { %p2286_p2 = pneg %p2285_p0 }
  0x60   : > { %p2291_p7 = pnand %p2289_p5, %p2286_p2 }
  0x62   : > { %2294 = shalt.err (!%p2291_p7)
}
  0x63   : > { %s2295_s25 = scalar_lea.vmem %s358_s28, 128  ;;  %p2303_p11 = scmp.lt.s32.totalorder %s358_s28, %s358_s28 }
  0x64   : > { %p2296_p9 = scmp.ne.s32.totalorder %s358_s28, %s2295_s25  ;;  %p2304_p12 = scmp.lt.s32.totalorder %s2295_s25, %s2295_s25 }
  0x66   : > { %p2298_p10 = pnand %p2296_p9, %p2674_p8  ;;  %p2305_p1 = por %p2304_p12, %p2303_p11 }
  0x68   : > { %p2299_p4 = pneg %p2298_p10 }
  0x6a   : > { %p2306_p3 = pnand %p2305_p1, %p2299_p4 }
  0x6c   : > { %2309 = shalt.err (!%p2306_p3)
}
  0x6d   : > { %1850 = dma.hbm_to_vmem [thread:$0]  (!%p2658_p6), %s3254_s7, 128, %s358_s28, [#allocation16]  }
  0x6e   : > { %s2310_s12 = scalar_lea.hbm %s3249_s2, 128 }
  0x6f   : > { %p2311_p13 = scmp.ne.s32.totalorder %s3249_s2, %s2310_s12  ;;  %p2317_p3 = scmp.lt.u32.totalorder %s2310_s12, %s3249_s2 }
  0x71   : > { %p2313_p0 = pnand %p2311_p13, %p2674_p8 }
  0x73   : > { %p2314_p1 = pneg %p2313_p0 }
  0x75   : > { %p2319_p2 = pnand %p2317_p3, %p2314_p1 }
  0x77   : > { %2322 = shalt.err (!%p2319_p2)
}
  0x78   : > { %s2323_s23 = scalar_lea.vmem %s303_s30, 128  ;;  %p2331_p10 = scmp.lt.s32.totalorder %s303_s30, %s303_s30 }
  0x79   : > { %p2324_p5 = scmp.ne.s32.totalorder %s303_s30, %s2323_s23  ;;  %p2332_p4 = scmp.lt.s32.totalorder %s2323_s23, %s2323_s23 }
  0x7b   : > { %p2326_p7 = pnand %p2324_p5, %p2674_p8  ;;  %p2333_p11 = por %p2332_p4, %p2331_p10 }
  0x7d   : > { %p2327_p9 = pneg %p2326_p7 }
  0x7f   : > { %p2334_p12 = pnand %p2333_p11, %p2327_p9 }
  0x81   : > { %2337 = shalt.err (!%p2334_p12)
}
  0x82   : > { %1835 = dma.hbm_to_vmem [thread:$0]  (!%p2658_p6), %s3249_s2, 128, %s303_s30, [#allocation7]  }
  0x83   : > { %s2541_s19 = smov [#allocation11]   ;;  %s2542_s29 = smov [#allocation14]  }
  0x84   : > { %s324_s27 = sshll.u32 %s2541_s19, 4  ;;  %s346_s11 = sshll.u32 %s2542_s29, 4  ;;  %s325_s27 = int_to_ptr.vmem [resolvable:$true] %s324_s27  ;;  %s347_s11 = int_to_ptr.vmem [resolvable:$true] %s346_s11 }
  0x85   : > { %s2338_s9 = scalar_lea.hbm %s3251_s4, 64 }
  0x86   : > { %p2339_p13 = scmp.ne.s32.totalorder %s3251_s4, %s2338_s9  ;;  %p2345_p3 = scmp.lt.u32.totalorder %s2338_s9, %s3251_s4 }
  0x88   : > { %p2341_p0 = pnand %p2339_p13, %p2674_p8 }
  0x8a   : > { %p2342_p1 = pneg %p2341_p0 }
  0x8c   : > { %p2347_p2 = pnand %p2345_p3, %p2342_p1 }
  0x8e   : > { %2350 = shalt.err (!%p2347_p2)
}
  0x8f   : > { %s2351_s30 = scalar_lea.vmem %s325_s27, 64  ;;  %p2359_p10 = scmp.lt.s32.totalorder %s325_s27, %s325_s27 }
  0x90   : > { %p2352_p5 = scmp.ne.s32.totalorder %s325_s27, %s2351_s30  ;;  %p2360_p4 = scmp.lt.s32.totalorder %s2351_s30, %s2351_s30 }
  0x92   : > { %p2354_p7 = pnand %p2352_p5, %p2674_p8  ;;  %p2361_p11 = por %p2360_p4, %p2359_p10 }
  0x94   : > { %p2355_p9 = pneg %p2354_p7 }
  0x96   : > { %p2362_p12 = pnand %p2361_p11, %p2355_p9 }
  0x98   : > { %2365 = shalt.err (!%p2362_p12)
}
  0x99   : > { %1841 = dma.hbm_to_vmem [thread:$0]  (!%p2658_p6), %s3251_s4, 64, %s325_s27, [#allocation10]  }
  0x9a   : > { %s2366_s13 = scalar_lea.hbm %s3253_s6, 64 }
  0x9b   : > { %p2367_p13 = scmp.ne.s32.totalorder %s3253_s6, %s2366_s13  ;;  %p2373_p3 = scmp.lt.u32.totalorder %s2366_s13, %s3253_s6 }
  0x9d   : > { %p2369_p0 = pnand %p2367_p13, %p2674_p8 }
  0x9f   : > { %p2370_p1 = pneg %p2369_p0 }
  0xa1   : > { %p2375_p2 = pnand %p2373_p3, %p2370_p1 }
  0xa3   : > { %2378 = shalt.err (!%p2375_p2)
}
  0xa4   : > { %s2379_s28 = scalar_lea.vmem %s347_s11, 64  ;;  %p2387_p10 = scmp.lt.s32.totalorder %s347_s11, %s347_s11 }
  0xa5   : > { %p2380_p5 = scmp.ne.s32.totalorder %s347_s11, %s2379_s28  ;;  %p2388_p4 = scmp.lt.s32.totalorder %s2379_s28, %s2379_s28 }
  0xa7   : > { %p2382_p7 = pnand %p2380_p5, %p2674_p8  ;;  %p2389_p11 = por %p2388_p4, %p2387_p10 }
  0xa9   : > { %p2383_p9 = pneg %p2382_p7 }
  0xab   : > { %p2390_p12 = pnand %p2389_p11, %p2383_p9 }
  0xad   : > { %2393 = shalt.err (!%p2390_p12)
}
  0xae   : > { %1847 = dma.hbm_to_vmem [thread:$0]  (!%p2658_p6), %s3253_s6, 64, %s347_s11, [#allocation13]  }
  0xaf   : > { %s2543_s25 = smov [#allocation17]   ;;  %s2394_s13 = scalar_lea.hbm %s3255_s8, 16 }
  0xb0   : > { %s368_s19 = sshll.u32 %s2543_s25, 4  ;;  %p2395_p13 = scmp.ne.s32.totalorder %s3255_s8, %s2394_s13  ;;  %s369_s19 = int_to_ptr.vmem [resolvable:$true] %s368_s19 }
  0xb1   : > { %p2401_p3 = scmp.lt.u32.totalorder %s2394_s13, %s3255_s8 }
  0xb2   : > { %p2397_p0 = pnand %p2395_p13, %p2674_p8 }
  0xb4   : > { %p2398_p1 = pneg %p2397_p0 }
  0xb6   : > { %p2403_p2 = pnand %p2401_p3, %p2398_p1 }
  0xb8   : > { %2406 = shalt.err (!%p2403_p2)
}
  0xb9   : > { %s2407_s11 = scalar_lea.vmem %s369_s19, 16  ;;  %s2414_s28 = scalar_lea.vmem %s369_s19, 32 }
  0xba   : > { %p2408_p5 = scmp.ne.s32.totalorder %s369_s19, %s2407_s11  ;;  %p2415_p10 = scmp.lt.s32.totalorder %s369_s19, %s369_s19 }
  0xbb   : > { %p2416_p4 = scmp.lt.s32.totalorder %s2414_s28, %s2407_s11 }
  0xbc   : > { %p2410_p7 = pnand %p2408_p5, %p2674_p8 }
  0xbd   : > { %p2417_p11 = por %p2416_p4, %p2415_p10 }
  0xbe   : > { %p2411_p9 = pneg %p2410_p7 }
  0xc0   : > { %p2418_p12 = pnand %p2417_p11, %p2411_p9 }
  0xc2   : > { %2421 = shalt.err (!%p2418_p12)
}
  0xc3   : > { %1853 = dma.hbm_to_vmem [thread:$0]  (!%p2658_p6), %s3255_s8, 16, %s369_s19, [#allocation16]  }
  0xc4   : > { %s1698_s14 = sadd.s32 4294967294, %s2534_s18   ;;  %s2834_s26 = sadd.s32 1, %s2534_s18  }
  0xc5   : > { %s36_s25 = ssub.s32 %s2534_s18, %s2834_s26  ;;  %s39_s29 = sadd.s32 1, %s2530_s17 }
  0xc6   : > { %p37_p8 = scmp.eq.s32.totalorder %s36_s25, 0  ;;  %p46_p13 = scmp.ne.s32.totalorder %s2530_s17, %s2526_s16 }
  0xc7   : > { %p47_p0 = scmp.eq.s32.totalorder %s2534_s18, 0  ;;  %p52_p1 = scmp.ne.s32.totalorder %s2526_s16, %s2522_s15 }
  0xc8   : > { %s2845_s12 = scalar_select %p37_p8, %s2530_s17, %s39_s29  }
  0xc9   : > { %p2847_p3 = por %p47_p0, %p46_p13  ;;  %p3267_p2 = scmp.eq.s32.totalorder %s2640_s20, 0 }
  0xca   : > { %p265_p5 = scmp.eq.s32.totalorder %s2640_s20, 1  ;;  %p271_p7 = scmp.eq.s32.totalorder %s1698_s14, 1 }
  0xcb   : > { %p2853_p6 = por %p3267_p2, %p52_p1  ;;  %p1870_p9 = scmp.lt.s32.totalorder %s2534_s18, 2 }
  0xcc   : > { %s382_s9 = sand.u32 1, %s2530_s17   ;;  %p2860_p10 = por %p265_p5, %p46_p13 }
  0xcd   : > { %p2864_p4 = por %p271_p7, %p52_p1  ;;  %s1709_s23 = sshll.u32 %s382_s9, 5 }
  0xce   : > { %s3269_s22 = scalar_select %p2860_p10, 1, 0 }
  0xcf   : > { %s3270_s24 = scalar_select %p2864_p4, 1, 0 }
  0xd0   : > { %s1742_s11 = sshll.u32 %s2534_s18, 9  ;;  %s386_s14 = scalar_lea.vmem [#allocation3], %s1709_s23 }
  0xd1   : > { %s2872_s30 = scalar_lea.hbm %s3247_s0, %s1742_s11  ;;  %s393_s25 = sshll.u32 %s386_s14, 4  ;;  %s2874_s25 = int_to_ptr.vmem [resolvable:$true] %s393_s25 }
  0xd2   : > { %p2878_p11 = pnand %p1870_p9, %p2847_p3  ;;  %s2882_s1 = scalar_lea.sflag [#allocation4], %s382_s9 }
  0xd3   : > { %s2422_s28 = scalar_lea.hbm %s2872_s30, 512  ;;  %s2427_s13 = scalar_lea.hbm %s3247_s0, 1024 }
  0xd4   : > { %p2423_p12 = scmp.ne.s32.totalorder %s2872_s30, %s2422_s28  ;;  %p2424_p8 = pneg %p2878_p11 }
  0xd5   : > { %p2428_p1 = scmp.lt.u32.totalorder %s2872_s30, %s3247_s0  ;;  %p2429_p3 = scmp.lt.u32.totalorder %s2427_s13, %s2422_s28 }
  0xd6   : > { %p2425_p13 = pnand %p2424_p8, %p2423_p12  ;;  %p2431_p5 = scmp.lt.u32.totalorder %s2422_s28, %s2872_s30 }
  0xd7   : > { %p2430_p2 = por %p2429_p3, %p2428_p1 }
  0xd8   : > { %p2426_p0 = pneg %p2425_p13 }
  0xd9   : > { %p2432_p7 = por %p2431_p5, %p2430_p2 }
  0xdb   : > { %p2433_p9 = pnand %p2432_p7, %p2426_p0 }
  0xdd   : > { %2436 = shalt.err (!%p2433_p9)
}
  0xde   : > { %s2437_s9 = scalar_lea.vmem %s2874_s25, 512  ;;  %s2544_s23 = smov [#allocation3]  }
  0xdf   : > { %p2438_p12 = scmp.ne.s32.totalorder %s2874_s25, %s2437_s9  ;;  %s2442_s11 = sshll.u32 %s2544_s23, 4  ;;  %s2443_s11 = int_to_ptr.vmem [resolvable:$false] %s2442_s11 }
  0xe0   : > { %s2444_s27 = scalar_lea.vmem %s2443_s11, 1024  ;;  %p2445_p10 = scmp.lt.s32.totalorder %s2874_s25, %s2443_s11 }
  0xe1   : > { %p2440_p13 = pnand %p2438_p12, %p2424_p8  ;;  %p2446_p1 = scmp.lt.s32.totalorder %s2444_s27, %s2437_s9 }
  0xe3   : > { %p2441_p4 = pneg %p2440_p13  ;;  %p2447_p3 = por %p2446_p1, %p2445_p10 }
  0xe5   : > { %p2448_p2 = pnand %p2447_p3, %p2441_p4 }
  0xe7   : > { %2451 = shalt.err (!%p2448_p2)
}
  0xe8   : > { %s2545_s28 = smov 256   ;;  %s2546_s13 = smov 16  }
  0xe9   : > { %1857 = dma.hbm_to_vmem [thread:$0]  (!%p2878_p11), %s2872_s30, 512, %s2874_s25, %s2882_s1, %s2545_s28, %s2545_s28, %s2546_s13  }
  0xea   : > { %p3272_p8 = scmp.ne.s32.totalorder %s3262_s21, 0 }
  0xeb   : > { %s2913_s14 = sand.u32 (!%p3272_p8), 1, %s2526_s16  }
  0xec   : > { %405 = sbr.rel (%p3272_p8) target bundleno = 1649 (0x671), region = 60  ;;  %s1713_s9 = sshll.u32 (!%p3272_p8), %s2913_s14, 5 }
  0xed   : > { %s408_s23 = scalar_lea.sflag (!%p3272_p8), [#allocation4], %s2913_s14  ;;  %s411_s11 = scalar_lea.vmem (!%p3272_p8), [#allocation3], %s1713_s9 }
  0xf3   : > { %2497 = dma.done.wait (%p2853_p6), %s408_s23, 512  }
  0xf4   : > { %2499 = vsyncadd (%p2853_p6), %s408_s23, 4294966784  ;;  %p3273_p10 = scmp.eq.s32.totalorder %s2640_s20, 0 }
  0xf6   : > { %2501 = dma.done.wait (%p3273_p10), [#allocation7], 192   ;;  %p3274_p4 = pmov %p3273_p10 }
  0xf8   : > { %2503 = vsyncadd (%p3274_p4), [#allocation7], 4294967104  ;;  %p3275_p11 = pmov %p3274_p4 }
  0xf9   : > { %p3276_p0 = pmov %p3274_p4 }
  0xfa   : > { %2505 = dma.done.wait (%p3275_p11), [#allocation10], 192  }
  0xfb   : > { %2507 = vsyncadd (%p3276_p0), [#allocation10], 4294967104  ;;  %p3277_p5 = pmov %p3276_p0 }
  0xfc   : > { %p3278_p7 = pmov %p3276_p0 }
  0xfd   : > { %2509 = dma.done.wait (%p3277_p5), [#allocation13], 192  }
  0xfe   : > { %2511 = vsyncadd (%p3278_p7), [#allocation13], 4294967104  ;;  %p3279_p6 = pmov %p3276_p0 }
  0xff   : > { %p3280_p9 = pmov %p3276_p0 }
 0x100   : > { %2513 = dma.done.wait (%p3279_p6), [#allocation16], 144  }
 0x101   : > { %2515 = vsyncadd (%p3280_p9), [#allocation16], 4294967152  ;;  %v481_v1 = vld [vmem:[%s411_s11] sm:$0xff]  ;;  %v482_v2 = vld [vmem:[%s411_s11 + $0x8] sm:$0xff]  ;;  %s2547_s1 = smov 127   ;;  %s2548_s21 = smov 126   ;;  %v886_v23 = vlaneseq }
 0x102   : > { %v483_v3 = vld [vmem:[%s411_s11 + $0x10] sm:$0xff]  ;;  %v486_v4 = vunpack.c.h.bf16 %v481_v1  ;;  %v487_v5 = vunpack.c.l.bf16 %v482_v2  ;;  %v485_v6 = vunpack.c.l.bf16 %v481_v1  ;;  %v484_v8 = vld [vmem:[%s411_s11 + $0x18] sm:$0xff]  ;;  %v488_v11 = vunpack.c.h.bf16 %v482_v2  ;;  %s2549_s19 = smov 110   ;;  %s2550_s30 = smov 109   ;;  %v2965_v21 = vld [vmem:[#allocation8] sm:$0xff] }
 0x103   : > { %v489_v7 = vunpack.c.l.bf16 %v483_v3  ;;  %v490_v9 = vunpack.c.h.bf16 %v483_v3  ;;  %v491_v10 = vunpack.c.l.bf16 %v484_v8  ;;  %v492_v12 = vunpack.c.h.bf16 %v484_v8  ;;  %s2551_s25 = smov 108   ;;  %s2552_s29 = smov 92   ;;  %v884_v26 = vld [vmem:[#allocation6] sm:$0xf]  ;;  %v786_v30 = vld [vmem:[#allocation9] sm:$0xff] }
 0x104   : > { %v1935_v13 = vpack.i.bf16 %v487_v5, %v486_v4  ;;  %v1725_v17 = vcombine.high %v482_v2, %v484_v8  ;;  %v1723_v18 = vcombine.high %v481_v1, %v483_v3  ;;  %v1724_v19 = vcombine.low %v482_v2, %v484_v8  ;;  %s2553_s27 = smov 91   ;;  %s2554_s28 = smov 90  }
 0x105   : > { %v1945_v14 = vpack.i.bf16 %v489_v7, %v485_v6  ;;  %v1940_v15 = vpack.i.bf16 %v491_v10, %v490_v9  ;;  %v1950_v16 = vpack.i.bf16 %v492_v12, %v488_v11  ;;  %v1722_v20 = vcombine.low %v481_v1, %v483_v3  ;;  %s2558_s13 = smov 71   ;;  %s1791_s9 = smul.u32 3, %s2913_s14 }
 0x106   : > { %1936 = vrot.lane.b32.xlu0 %v1935_v13, %s2547_s1  ;;  %843 = vmatprep.subr.bf16.mxu1 %v1725_v17  ;;  %v1727_v22 = vcombine.high %v2965_v21, %v2965_v21  ;;  %vm798_vm0 = vcmask 130048   ;;  %v2555_v24 = vmov 0   ;;  %v2973_v25 = vshrl.u32 %v886_v23, 7  ;;  %s1792_s23 = smul.u32 48, %s2640_s20  ;;  %p3281_p13 = scmp.ne.s32.totalorder %s3269_s22, 0 }
 0x107   : > { %1946 = vrot.lane.b32.xlu1 %v1945_v14, %s2547_s1  ;;  %802 = vmatprep.subr.bf16.mxu0 %v1723_v18  ;;  %vm517_vm1 = vcmask 1039360   ;;  %vm548_vm2 = vcmask 1031168   ;;  %vm579_vm3 = vcmask 900096   ;;  %vm610_vm4 = vcmask 891904   ;;  %s479_s11 = scalar_lea.vmem [#allocation18], %s1791_s9  ;;  %s2560_s20 = smov [#allocation18]  }
 0x108   : > { %844 = vmatpush1.bf16.msra.mxu1 %v1724_v19  ;;  %803 = vmatpush1.bf16.msra.mxu0 %v1722_v20  ;;  %v892_v27 = vsub.s32 1, %v2973_v25  ;;  %v896_v28 = vsub.s32 2, %v2973_v25  ;;  %v900_v29 = vsub.s32 3, %v2973_v25  ;;  %v2992_v33 = vsub.s32 0, %v2973_v25 }
 0x109   : > { %1728 = vmatprep.mubr.msk.bf16.mxu0 %vm798_vm0, %v1727_v22  ;;  %1729 = vmatprep.mubr.msk.bf16.mxu1 %vm798_vm0, %v1727_v22  ;;  %vm641_vm5 = vcmask 883712   ;;  %vm672_vm6 = vcmask 752640   ;;  %vm703_vm7 = vcmask 744448   ;;  %vm734_vm8 = vcmask 736256  }
 0x10a   : > { %1941 = vrot.lane.b32.xlu0 %v1940_v15, %s2547_s1  ;;  %2191 = vset.pattern.permute.xlu1 %v2555_v24  ;;  %v2983_v31 = vrot.slane %v884_v26, %v892_v27  ;;  %v2989_v32 = vrot.slane %v884_v26, %v896_v28  ;;  %v2994_v34 = vrot.slane %v884_v26, %v900_v29  ;;  %vm2557_vm9 = vmmov 0  }
 0x10b   : > { %1951 = vrot.lane.b32.xlu1 %v1950_v16, %s2547_s1  ;;  %2095 = vset.pattern.permute.xlu0 %v2555_v24  ;;  %v2999_v35 = vrot.slane %v884_v26, %v2992_v33  ;;  %vm1048_vm10 = vcmask 1043456   ;;  %vm1044_vm11 = vcmask 588800   ;;  %vm1388_vm12 = vcmask 580608  }
 0x10c   : > { %vm1411_vm13 = vcmask 64512   ;;  %vm1534_vm14 = vcmp.lt.s32.totalorder %v886_v23, 324 }
 0x10e   : > { %1956 = vrot.lane.b32.xlu0 %v1935_v13, %s2548_s21 }
 0x10f   : > { %1961 = vrot.lane.b32.xlu1 %v1940_v15, %s2548_s21 }
 0x112   : > { %1966 = vrot.lane.b32.xlu0 %v1945_v14, %s2548_s21 }
 0x113   : > { %1971 = vrot.lane.b32.xlu1 %v1950_v16, %s2548_s21 }
 0x116   : > { %1976 = vrot.lane.b32.xlu0 %v1935_v13, %s2549_s19 }
 0x117   : > { %1981 = vrot.lane.b32.xlu1 %v1940_v15, %s2549_s19 }
 0x11a   : > { %1986 = vrot.lane.b32.xlu0 %v1945_v14, %s2549_s19 }
 0x11b   : > { %1991 = vrot.lane.b32.xlu1 %v1950_v16, %s2549_s19 }
 0x11e   : > { %1996 = vrot.lane.b32.xlu0 %v1935_v13, %s2550_s30 }
 0x11f   : > { %2001 = vrot.lane.b32.xlu1 %v1940_v15, %s2550_s30 }
 0x122   : > { %2006 = vrot.lane.b32.xlu0 %v1945_v14, %s2550_s30 }
 0x123   : > { %2011 = vrot.lane.b32.xlu1 %v1950_v16, %s2550_s30 }
 0x126   : > { %2016 = vrot.lane.b32.xlu0 %v1935_v13, %s2551_s25 }
 0x127   : > { %2021 = vrot.lane.b32.xlu1 %v1940_v15, %s2551_s25 }
 0x12a   : > { %2026 = vrot.lane.b32.xlu0 %v1945_v14, %s2551_s25 }
 0x12b   : > { %2031 = vrot.lane.b32.xlu1 %v1950_v16, %s2551_s25 }
 0x12e   : > { %2036 = vrot.lane.b32.xlu0 %v1935_v13, %s2552_s29 }
 0x12f   : > { %2041 = vrot.lane.b32.xlu1 %v1940_v15, %s2552_s29 }
 0x132   : > { %2046 = vrot.lane.b32.xlu0 %v1945_v14, %s2552_s29 }
 0x133   : > { %2051 = vrot.lane.b32.xlu1 %v1950_v16, %s2552_s29 }
 0x136   : > { %2056 = vrot.lane.b32.xlu0 %v1935_v13, %s2553_s27 }
 0x137   : > { %2061 = vrot.lane.b32.xlu1 %v1940_v15, %s2553_s27 }
 0x13a   : > { %2066 = vrot.lane.b32.xlu0 %v1945_v14, %s2553_s27 }
 0x13b   : > { %2071 = vrot.lane.b32.xlu1 %v1950_v16, %s2553_s27 }
 0x13e   : > { %2076 = vrot.lane.b32.xlu0 %v1935_v13, %s2554_s28 }
 0x13f   : > { %2081 = vrot.lane.b32.xlu1 %v1940_v15, %s2554_s28 }
 0x142   : > { %2086 = vrot.lane.b32.xlu0 %v1945_v14, %s2554_s28 }
 0x143   : > { %2091 = vrot.lane.b32.xlu1 %v1950_v16, %s2554_s28 }
 0x146   : > { %789 = vperm.xlu0 %2095, %v786_v30  }
 0x147   : > { %904 = vrot.lane.b32.xlu1 %v2983_v31, %s2550_s30 }
 0x14a   : > { %908 = vrot.lane.b32.xlu0 %v2994_v34, %s2550_s30 }
 0x14b   : > { %906 = vrot.lane.b32.xlu1 %v2989_v32, %s2550_s30 }
 0x14f   : > { %902 = vrot.lane.b32.xlu1 %v2999_v35, %s2550_s30 }
 0x178   : > { %v1937_v36 = vpop.permute.xlu0 %1936 }
 0x179   : > { %v1947_v37 = vpop.permute.xlu1 %1946  ;;  %v1939_v38 = vunpack.i.h.bf16 %v1937_v36  ;;  %v1938_v39 = vunpack.i.l.bf16 %v1937_v36 }
 0x17a   : > { %v1949_v40 = vunpack.i.h.bf16 %v1947_v37  ;;  %v1948_v41 = vunpack.i.l.bf16 %v1947_v37 }
 0x17b   : > { %v519_v48 = vsel %vm517_vm1, %v1938_v39, %v1939_v38 }
 0x17c   : > { %v1942_v42 = vpop.permute.xlu0 %1941  ;;  %v518_v57 = vsel %vm517_vm1, %v1948_v41, %v1938_v39 }
 0x17d   : > { %v1952_v43 = vpop.permute.xlu1 %1951  ;;  %v1944_v44 = vunpack.i.h.bf16 %v1942_v42  ;;  %v1943_v45 = vunpack.i.l.bf16 %v1942_v42 }
 0x17e   : > { %v1954_v46 = vunpack.i.h.bf16 %v1952_v43  ;;  %v1953_v47 = vunpack.i.l.bf16 %v1952_v43 }
 0x17f   : > { %v522_v50 = vsel %vm517_vm1, %v1943_v45, %v1944_v44  ;;  %v521_v58 = vsel %vm517_vm1, %v1949_v40, %v1943_v45 }
 0x180   : > { %v757_v49 = vpack.c.bf16 %v1954_v46, %v1953_v47  ;;  %v520_v51 = vsel %vm517_vm1, %v1939_v38, %v1953_v47  ;;  %v523_v52 = vsel %vm517_vm1, %v1944_v44, %v1954_v46  ;;  %v1957_v53 = vpop.permute.xlu0 %1956  ;;  %v755_v55 = vpack.c.bf16 %v522_v50, %v519_v48 }
 0x181   : > { %v1962_v54 = vpop.permute.xlu1 %1961  ;;  %v756_v56 = vpack.c.bf16 %v523_v52, %v520_v51  ;;  %v1959_v59 = vunpack.i.h.bf16 %v1957_v53  ;;  %v1958_v60 = vunpack.i.l.bf16 %v1957_v53  ;;  %v754_v63 = vpack.c.bf16 %v521_v58, %v518_v57 }
 0x182   : > { %v1964_v61 = vunpack.i.h.bf16 %v1962_v54  ;;  %v1963_v62 = vunpack.i.l.bf16 %v1962_v54  ;;  %845 = vmatprep.subr.bf16.mxu1 %v757_v49  ;;  %804 = vmatprep.subr.bf16.mxu0 %v755_v55 }
 0x183   : > { %846 = vmatpush1.bf16.msra.mxu1 %v756_v56  ;;  %v550_v0 = vsel %vm548_vm2, %v1958_v60, %v1959_v59  ;;  %805 = vmatpush1.bf16.msra.mxu0 %v754_v63 }
 0x184   : > { %v553_v1 = vsel %vm548_vm2, %v1963_v62, %v1964_v61  ;;  %v1967_v2 = vpop.permute.xlu0 %1966 }
 0x185   : > { %v1972_v3 = vpop.permute.xlu1 %1971  ;;  %v759_v4 = vpack.c.bf16 %v553_v1, %v550_v0  ;;  %v1969_v5 = vunpack.i.h.bf16 %v1967_v2  ;;  %v1968_v6 = vunpack.i.l.bf16 %v1967_v2 }
 0x186   : > { %v1974_v7 = vunpack.i.h.bf16 %v1972_v3  ;;  %v1973_v8 = vunpack.i.l.bf16 %v1972_v3 }
 0x187   : > { %806 = vmatprep.subr.bf16.mxu0 %v759_v4  ;;  %v549_v10 = vsel %vm548_vm2, %v1968_v6, %v1958_v60  ;;  %v552_v11 = vsel %vm548_vm2, %v1969_v5, %v1963_v62 }
 0x188   : > { %v761_v9 = vpack.c.bf16 %v1974_v7, %v1973_v8  ;;  %v551_v12 = vsel %vm548_vm2, %v1959_v59, %v1973_v8  ;;  %v1977_v13 = vpop.permute.xlu0 %1976  ;;  %v758_v15 = vpack.c.bf16 %v552_v11, %v549_v10  ;;  %v554_v16 = vsel %vm548_vm2, %v1964_v61, %v1974_v7 }
 0x189   : > { %v1982_v14 = vpop.permute.xlu1 %1981  ;;  %v1979_v17 = vunpack.i.h.bf16 %v1977_v13  ;;  %v1978_v18 = vunpack.i.l.bf16 %v1977_v13  ;;  %v760_v22 = vpack.c.bf16 %v554_v16, %v551_v12 }
 0x18a   : > { %v1984_v19 = vunpack.i.h.bf16 %v1982_v14  ;;  %v1983_v20 = vunpack.i.l.bf16 %v1982_v14  ;;  %847 = vmatprep.subr.bf16.mxu1 %v761_v9  ;;  %807 = vmatpush1.bf16.msra.mxu0 %v758_v15 }
 0x18b   : > { %v581_v26 = vsel %vm579_vm3, %v1978_v18, %v1979_v17  ;;  %848 = vmatpush1.bf16.msra.mxu1 %v760_v22 }
 0x18c   : > { %v584_v29 = vsel %vm579_vm3, %v1983_v20, %v1984_v19  ;;  %v1987_v30 = vpop.permute.xlu0 %1986 }
 0x18d   : > { %v1992_v36 = vpop.permute.xlu1 %1991  ;;  %v763_v37 = vpack.c.bf16 %v584_v29, %v581_v26  ;;  %v1989_v38 = vunpack.i.h.bf16 %v1987_v30  ;;  %v1988_v39 = vunpack.i.l.bf16 %v1987_v30 }
 0x18e   : > { %v1994_v40 = vunpack.i.h.bf16 %v1992_v36  ;;  %v1993_v41 = vunpack.i.l.bf16 %v1992_v36 }
 0x18f   : > { %808 = vmatprep.subr.bf16.mxu0 %v763_v37  ;;  %v580_v43 = vsel %vm579_vm3, %v1988_v39, %v1978_v18  ;;  %v583_v44 = vsel %vm579_vm3, %v1989_v38, %v1983_v20 }
 0x190   : > { %v765_v42 = vpack.c.bf16 %v1994_v40, %v1993_v41  ;;  %v582_v45 = vsel %vm579_vm3, %v1979_v17, %v1993_v41  ;;  %v1997_v46 = vpop.permute.xlu0 %1996  ;;  %v762_v48 = vpack.c.bf16 %v583_v44, %v580_v43  ;;  %v585_v49 = vsel %vm579_vm3, %v1984_v19, %v1994_v40 }
 0x191   : > { %v2002_v47 = vpop.permute.xlu1 %2001  ;;  %v1999_v50 = vunpack.i.h.bf16 %v1997_v46  ;;  %v1998_v51 = vunpack.i.l.bf16 %v1997_v46  ;;  %v764_v54 = vpack.c.bf16 %v585_v49, %v582_v45 }
 0x192   : > { %v2004_v52 = vunpack.i.h.bf16 %v2002_v47  ;;  %v2003_v53 = vunpack.i.l.bf16 %v2002_v47  ;;  %849 = vmatprep.subr.bf16.mxu1 %v765_v42  ;;  %809 = vmatpush1.bf16.msra.mxu0 %v762_v48 }
 0x193   : > { %v612_v55 = vsel %vm610_vm4, %v1998_v51, %v1999_v50  ;;  %850 = vmatpush1.bf16.msra.mxu1 %v764_v54 }
 0x194   : > { %v615_v56 = vsel %vm610_vm4, %v2003_v53, %v2004_v52  ;;  %v2007_v57 = vpop.permute.xlu0 %2006 }
 0x195   : > { %v2012_v58 = vpop.permute.xlu1 %2011  ;;  %v767_v59 = vpack.c.bf16 %v615_v56, %v612_v55  ;;  %v2009_v60 = vunpack.i.h.bf16 %v2007_v57  ;;  %v2008_v61 = vunpack.i.l.bf16 %v2007_v57 }
 0x196   : > { %v2014_v62 = vunpack.i.h.bf16 %v2012_v58  ;;  %v2013_v63 = vunpack.i.l.bf16 %v2012_v58 }
 0x197   : > { %810 = vmatprep.subr.bf16.mxu0 %v767_v59  ;;  %v611_v1 = vsel %vm610_vm4, %v2008_v61, %v1998_v51  ;;  %v614_v2 = vsel %vm610_vm4, %v2009_v60, %v2003_v53 }
 0x198   : > { %v769_v0 = vpack.c.bf16 %v2014_v62, %v2013_v63  ;;  %v613_v3 = vsel %vm610_vm4, %v1999_v50, %v2013_v63  ;;  %v2017_v4 = vpop.permute.xlu0 %2016  ;;  %v766_v6 = vpack.c.bf16 %v614_v2, %v611_v1  ;;  %v616_v7 = vsel %vm610_vm4, %v2004_v52, %v2014_v62 }
 0x199   : > { %v2022_v5 = vpop.permute.xlu1 %2021  ;;  %v2019_v8 = vunpack.i.h.bf16 %v2017_v4  ;;  %v2018_v9 = vunpack.i.l.bf16 %v2017_v4  ;;  %v768_v12 = vpack.c.bf16 %v616_v7, %v613_v3 }
 0x19a   : > { %v2024_v10 = vunpack.i.h.bf16 %v2022_v5  ;;  %v2023_v11 = vunpack.i.l.bf16 %v2022_v5  ;;  %851 = vmatprep.subr.bf16.mxu1 %v769_v0  ;;  %811 = vmatpush1.bf16.msra.mxu0 %v766_v6 }
 0x19b   : > { %v643_v13 = vsel %vm641_vm5, %v2018_v9, %v2019_v8  ;;  %852 = vmatpush1.bf16.msra.mxu1 %v768_v12 }
 0x19c   : > { %v646_v14 = vsel %vm641_vm5, %v2023_v11, %v2024_v10  ;;  %v2027_v15 = vpop.permute.xlu0 %2026 }
 0x19d   : > { %v2032_v16 = vpop.permute.xlu1 %2031  ;;  %v771_v17 = vpack.c.bf16 %v646_v14, %v643_v13  ;;  %v2029_v18 = vunpack.i.h.bf16 %v2027_v15  ;;  %v2028_v19 = vunpack.i.l.bf16 %v2027_v15 }
 0x19e   : > { %v2034_v20 = vunpack.i.h.bf16 %v2032_v16  ;;  %v2033_v22 = vunpack.i.l.bf16 %v2032_v16 }
 0x19f   : > { %812 = vmatprep.subr.bf16.mxu0 %v771_v17  ;;  %v642_v29 = vsel %vm641_vm5, %v2028_v19, %v2018_v9  ;;  %v645_v30 = vsel %vm641_vm5, %v2029_v18, %v2023_v11 }
 0x1a0   : > { %v773_v26 = vpack.c.bf16 %v2034_v20, %v2033_v22  ;;  %v644_v36 = vsel %vm641_vm5, %v2019_v8, %v2033_v22  ;;  %v2037_v37 = vpop.permute.xlu0 %2036  ;;  %v770_v39 = vpack.c.bf16 %v645_v30, %v642_v29  ;;  %v647_v40 = vsel %vm641_vm5, %v2024_v10, %v2034_v20 }
 0x1a1   : > { %v2042_v38 = vpop.permute.xlu1 %2041  ;;  %v2039_v41 = vunpack.i.h.bf16 %v2037_v37  ;;  %v2038_v42 = vunpack.i.l.bf16 %v2037_v37  ;;  %v772_v45 = vpack.c.bf16 %v647_v40, %v644_v36 }
 0x1a2   : > { %v2044_v43 = vunpack.i.h.bf16 %v2042_v38  ;;  %v2043_v44 = vunpack.i.l.bf16 %v2042_v38  ;;  %853 = vmatprep.subr.bf16.mxu1 %v773_v26  ;;  %813 = vmatpush1.bf16.msra.mxu0 %v770_v39 }
 0x1a3   : > { %v674_v46 = vsel %vm672_vm6, %v2038_v42, %v2039_v41  ;;  %854 = vmatpush1.bf16.msra.mxu1 %v772_v45 }
 0x1a4   : > { %v677_v47 = vsel %vm672_vm6, %v2043_v44, %v2044_v43  ;;  %v2047_v48 = vpop.permute.xlu0 %2046 }
 0x1a5   : > { %v2052_v49 = vpop.permute.xlu1 %2051  ;;  %v775_v50 = vpack.c.bf16 %v677_v47, %v674_v46  ;;  %v2049_v51 = vunpack.i.h.bf16 %v2047_v48  ;;  %v2048_v52 = vunpack.i.l.bf16 %v2047_v48 }
 0x1a6   : > { %v2054_v53 = vunpack.i.h.bf16 %v2052_v49  ;;  %v2053_v54 = vunpack.i.l.bf16 %v2052_v49 }
 0x1a7   : > { %814 = vmatprep.subr.bf16.mxu0 %v775_v50  ;;  %v673_v56 = vsel %vm672_vm6, %v2048_v52, %v2038_v42  ;;  %v676_v57 = vsel %vm672_vm6, %v2049_v51, %v2043_v44 }
 0x1a8   : > { %v777_v55 = vpack.c.bf16 %v2054_v53, %v2053_v54  ;;  %v675_v58 = vsel %vm672_vm6, %v2039_v41, %v2053_v54  ;;  %v2057_v59 = vpop.permute.xlu0 %2056  ;;  %v774_v61 = vpack.c.bf16 %v676_v57, %v673_v56  ;;  %v678_v62 = vsel %vm672_vm6, %v2044_v43, %v2054_v53 }
 0x1a9   : > { %v2062_v60 = vpop.permute.xlu1 %2061  ;;  %v2059_v63 = vunpack.i.h.bf16 %v2057_v59  ;;  %v2058_v0 = vunpack.i.l.bf16 %v2057_v59  ;;  %v776_v3 = vpack.c.bf16 %v678_v62, %v675_v58  ;;  %v1726_v53 = vcombine.low %v2965_v21, %v2965_v21 }
 0x1aa   : > { %v2064_v1 = vunpack.i.h.bf16 %v2062_v60  ;;  %v2063_v2 = vunpack.i.l.bf16 %v2062_v60  ;;  %855 = vmatprep.subr.bf16.mxu1 %v777_v55  ;;  %815 = vmatpush1.bf16.msra.mxu0 %v774_v61 }
 0x1ab   : > { %v705_v4 = vsel %vm703_vm7, %v2058_v0, %v2059_v63  ;;  %856 = vmatpush1.bf16.msra.mxu1 %v776_v3 }
 0x1ac   : > { %v708_v5 = vsel %vm703_vm7, %v2063_v2, %v2064_v1  ;;  %v2067_v6 = vpop.permute.xlu0 %2066 }
 0x1ad   : > { %v2072_v7 = vpop.permute.xlu1 %2071  ;;  %v779_v8 = vpack.c.bf16 %v708_v5, %v705_v4  ;;  %v2069_v9 = vunpack.i.h.bf16 %v2067_v6  ;;  %v2068_v10 = vunpack.i.l.bf16 %v2067_v6 }
 0x1ae   : > { %v2074_v11 = vunpack.i.h.bf16 %v2072_v7  ;;  %v2073_v12 = vunpack.i.l.bf16 %v2072_v7 }
 0x1af   : > { %816 = vmatprep.subr.bf16.mxu0 %v779_v8  ;;  %v704_v14 = vsel %vm703_vm7, %v2068_v10, %v2058_v0  ;;  %v707_v15 = vsel %vm703_vm7, %v2069_v9, %v2063_v2 }
 0x1b0   : > { %v781_v13 = vpack.c.bf16 %v2074_v11, %v2073_v12  ;;  %v706_v16 = vsel %vm703_vm7, %v2059_v63, %v2073_v12  ;;  %v2077_v17 = vpop.permute.xlu0 %2076  ;;  %v778_v19 = vpack.c.bf16 %v707_v15, %v704_v14  ;;  %v709_v20 = vsel %vm703_vm7, %v2064_v1, %v2074_v11 }
 0x1b1   : > { %v2082_v18 = vpop.permute.xlu1 %2081  ;;  %v2079_v22 = vunpack.i.h.bf16 %v2077_v17  ;;  %v2078_v26 = vunpack.i.l.bf16 %v2077_v17  ;;  %v780_v36 = vpack.c.bf16 %v709_v20, %v706_v16  ;;  %v2556_v11 = vmov 0.0  }
 0x1b2   : > { %v2084_v29 = vunpack.i.h.bf16 %v2082_v18  ;;  %v2083_v30 = vunpack.i.l.bf16 %v2082_v18  ;;  %857 = vmatprep.subr.bf16.mxu1 %v781_v13  ;;  %817 = vmatpush1.bf16.msra.mxu0 %v778_v19  ;;  %v1038_v18 = vld [vmem:[#allocation12] sm:$0xff] }
 0x1b3   : > { %v736_v37 = vsel %vm734_vm8, %v2078_v26, %v2079_v22  ;;  %858 = vmatpush1.bf16.msra.mxu1 %v780_v36 }
 0x1b4   : > { %v739_v38 = vsel %vm734_vm8, %v2083_v30, %v2084_v29  ;;  %v2087_v39 = vpop.permute.xlu0 %2086 }
 0x1b5   : > { %v2092_v40 = vpop.permute.xlu1 %2091  ;;  %v783_v41 = vpack.c.bf16 %v739_v38, %v736_v37  ;;  %v2089_v42 = vunpack.i.h.bf16 %v2087_v39  ;;  %v2088_v43 = vunpack.i.l.bf16 %v2087_v39 }
 0x1b6   : > { %v2094_v44 = vunpack.i.h.bf16 %v2092_v40  ;;  %v2093_v45 = vunpack.i.l.bf16 %v2092_v40 }
 0x1b7   : > { %818 = vmatprep.subr.bf16.mxu0 %v783_v41  ;;  %v735_v47 = vsel %vm734_vm8, %v2088_v43, %v2078_v26  ;;  %v738_v48 = vsel %vm734_vm8, %v2089_v42, %v2083_v30 }
 0x1b8   : > { %v785_v46 = vpack.c.bf16 %v2094_v44, %v2093_v45  ;;  %v737_v49 = vsel %vm734_vm8, %v2079_v22, %v2093_v45  ;;  %v782_v50 = vpack.c.bf16 %v738_v48, %v735_v47  ;;  %v740_v51 = vsel %vm734_vm8, %v2084_v29, %v2094_v44 }
 0x1b9   : > { %v784_v52 = vpack.c.bf16 %v740_v51, %v737_v49  ;;  %v905_v54 = vpop.permute.xlu1 %904 }
 0x1ba   : > { %859 = vmatprep.subr.bf16.mxu1 %v785_v46  ;;  %819 = vmatpush1.bf16.msra.mxu0 %v782_v50 }
 0x1bb   : > { %860 = vmatpush1.bf16.msra.mxu1 %v784_v52 }
 0x1bc   : > { %1757 = vmatprep.subr.bf16.mxu1 %v2556_v11 }
 0x1bd   : > { %835 = vmatmul.mubr.bf16.vlgmr.msra.gmra.mrb[0].mxu0 %v1726_v53  ;;  %v907_v55 = vpop.permute.xlu1 %906 }
 0x1be   : > { %876 = vmatmul.mubr.bf16.vlgmr.msra.gmra.mrb[0].mxu1 %v1726_v53  ;;  %1090 = vmatprep.mubr.bf16.mxu0 %v2555_v24  ;;  %v911_v9 = vsel %vm610_vm4, %v905_v54, %v907_v55 }
 0x1bf   : > { %1767 = vmatprep.mubr.msk.bf16.mxu1 %vm2557_vm9, %v2556_v11 }
 0x1c1   : > { %v903_v56 = vpop.permute.xlu1 %902 }
 0x1c2   : > { %v910_v62 = vsel %vm610_vm4, %v903_v56, %v905_v54 }
 0x1c5   : > { %v790_v57 = vpop.permute.xlu0 %789 }
 0x1c9   : > { %v909_v5 = vpop.permute.xlu0 %908 }
 0x1ca   : > { %v912_v10 = vsel %vm610_vm4, %v907_v55, %v909_v5 }
 0x290   : > { %v836_v58 = vpop.f32.mrb[0].mxu0 }
 0x291   : > { %v837_v59 = vadd.f32 %v836_v58, %v790_v57  ;;  %v877_v60 = vpop.f32.mrb[0].mxu1  ;;  %v838_v61 = vpop.f32.mrb[1].mxu0 }
 0x292   : > { %v879_v63 = vpop.f32.mrb[1].mxu1  ;;  %v840_v0 = vpop.f32.mrb[2].mxu0  ;;  %v878_v6 = vadd.f32 %v877_v60, %v790_v57  ;;  %v839_v7 = vadd.f32 %v838_v61, %v790_v57 }
 0x293   : > { %v3057_v1 = vmul.f32 %v910_v62, %v837_v59  ;;  %v880_v21 = vadd.f32 %v879_v63, %v790_v57  ;;  %v841_v2 = vpop.f32.mrb[3].mxu0  ;;  %v881_v3 = vpop.f32.mrb[2].mxu1 }
 0x294   : > { %v882_v4 = vpop.f32.mrb[3].mxu1  ;;  %v919_v12 = vmul.f32 %v912_v10, %v878_v6  ;;  %v918_v13 = vmul.f32 %v911_v9, %v839_v7 }
 0x295   : > { %935 = vrot.lane.b32.xlu0 %v3057_v1, %s2548_s21  ;;  %924 = vrot.lane.b32.xlu1 %v3057_v1, %s2547_s1  ;;  %v920_v8 = vmul.f32 %v909_v5, %v880_v21 }
 0x296   : > { %v2106_v15 = vpack.i.bf16 %v919_v12, %v918_v13  ;;  %v2141_v16 = vpack.i.bf16 %v918_v13, %v3057_v1 }
 0x297   : > { %v2096_v14 = vpack.i.bf16 %v920_v8, %v3057_v1  ;;  %v2146_v17 = vpack.i.bf16 %v920_v8, %v919_v12 }
 0x299   : > { %957 = vrot.lane.b32.xlu0 %v3057_v1, %s2550_s30  ;;  %946 = vrot.lane.b32.xlu1 %v3057_v1, %s2549_s19 }
 0x29d   : > { %2097 = vrot.lane.b32.xlu0 %v2096_v14, %s2552_s29  ;;  %968 = vrot.lane.b32.xlu1 %v3057_v1, %s2551_s25 }
 0x2a1   : > { %2107 = vrot.lane.b32.xlu0 %v2106_v15, %s2547_s1  ;;  %2102 = vrot.lane.b32.xlu1 %v2096_v14, %s2553_s27 }
 0x2a5   : > { %2112 = vrot.lane.b32.xlu0 %v2106_v15, %s2548_s21  ;;  %2117 = vrot.lane.b32.xlu1 %v2106_v15, %s2549_s19 }
 0x2a9   : > { %2122 = vrot.lane.b32.xlu0 %v2106_v15, %s2550_s30  ;;  %2127 = vrot.lane.b32.xlu1 %v2106_v15, %s2551_s25 }
 0x2ad   : > { %2132 = vrot.lane.b32.xlu0 %v2106_v15, %s2552_s29  ;;  %2137 = vrot.lane.b32.xlu1 %v2106_v15, %s2553_s27 }
 0x2b1   : > { %2142 = vrot.lane.b32.xlu0 %v2141_v16, %s2554_s28  ;;  %2147 = vrot.lane.b32.xlu1 %v2146_v17, %s2554_s28 }
 0x2b5   : > { %1041 = vperm.xlu0 %2095, %v1038_v18   ;;  %1144 = vrot.lane.b32.xlu1 %v2983_v31, %s2554_s28 }
 0x2b9   : > { %1146 = vrot.lane.b32.xlu0 %v2989_v32, %s2554_s28  ;;  %1148 = vrot.lane.b32.xlu1 %v2994_v34, %s2554_s28 }
 0x2bd   : > { %1142 = vrot.lane.b32.xlu0 %v2999_v35, %s2554_s28 }
 0x307   : > { %v936_v19 = vpop.permute.xlu0 %935  ;;  %v925_v20 = vpop.permute.xlu1 %924 }
 0x30b   : > { %v958_v22 = vpop.permute.xlu0 %957  ;;  %v947_v26 = vpop.permute.xlu1 %946 }
 0x30f   : > { %v2098_v29 = vpop.permute.xlu0 %2097  ;;  %v969_v30 = vpop.permute.xlu1 %968 }
 0x310   : > { %v2100_v59 = vunpack.i.h.bf16 %v2098_v29  ;;  %v2099_v60 = vunpack.i.l.bf16 %v2098_v29 }
 0x313   : > { %v2108_v36 = vpop.permute.xlu0 %2107  ;;  %v2103_v37 = vpop.permute.xlu1 %2102 }
 0x314   : > { %v2110_v38 = vunpack.i.h.bf16 %v2108_v36  ;;  %v2109_v39 = vunpack.i.l.bf16 %v2108_v36  ;;  %v2105_v21 = vunpack.i.h.bf16 %v2103_v37  ;;  %v2104_v2 = vunpack.i.l.bf16 %v2103_v37 }
 0x316   : > { %v1025_v31 = vpack.c.bf16 %v2110_v38, %v919_v12  ;;  %v930_v40 = vsel %vm517_vm1, %v925_v20, %v2109_v39  ;;  %v931_v32 = vsel %vm517_vm1, %v2109_v39, %v2110_v38 }
 0x317   : > { %v1023_v34 = vpack.c.bf16 %v930_v40, %v3057_v1  ;;  %v2113_v41 = vpop.permute.xlu0 %2112  ;;  %v2118_v42 = vpop.permute.xlu1 %2117  ;;  %v1024_v35 = vpack.c.bf16 %v931_v32, %v918_v13 }
 0x318   : > { %v2115_v43 = vunpack.i.h.bf16 %v2113_v41  ;;  %v2114_v44 = vunpack.i.l.bf16 %v2113_v41  ;;  %v2120_v45 = vunpack.i.h.bf16 %v2118_v42  ;;  %v2119_v46 = vunpack.i.l.bf16 %v2118_v42  ;;  %1758 = vmatpush3.bf16.msra.mxu1 %v1025_v31 }
 0x319   : > { %1058 = vmatprep.subr.bf16.mxu0 %v1024_v35  ;;  %1759 = vmatprep.subr.bf16.mxu1 %v2556_v11 }
 0x31a   : > { %v941_v47 = vsel %vm548_vm2, %v936_v19, %v2114_v44  ;;  %v1028_v48 = vpack.c.bf16 %v2120_v45, %v2115_v43  ;;  %v952_v49 = vsel %vm579_vm3, %v947_v26, %v2119_v46  ;;  %1059 = vmatpush1.bf16.msra.mxu0 %v1023_v34  ;;  %v942_v50 = vsel %vm548_vm2, %v2114_v44, %v2115_v43  ;;  %v1022_v43 = vld [vmem:[#allocation11] sm:$0xf] }
 0x31b   : > { %v1026_v51 = vpack.c.bf16 %v952_v49, %v941_v47  ;;  %v2123_v52 = vpop.permute.xlu0 %2122  ;;  %v2128_v53 = vpop.permute.xlu1 %2127  ;;  %v953_v54 = vsel %vm579_vm3, %v2119_v46, %v2120_v45 }
 0x31c   : > { %v2125_v55 = vunpack.i.h.bf16 %v2123_v52  ;;  %v2124_v56 = vunpack.i.l.bf16 %v2123_v52  ;;  %v2130_v57 = vunpack.i.h.bf16 %v2128_v53  ;;  %v2129_v58 = vunpack.i.l.bf16 %v2128_v53  ;;  %1760 = vmatpush3.bf16.msra.mxu1 %v1028_v48 }
 0x31d   : > { %v1027_v61 = vpack.c.bf16 %v953_v54, %v942_v50  ;;  %1761 = vmatprep.subr.bf16.mxu1 %v2556_v11 }
 0x31e   : > { %v963_v62 = vsel %vm610_vm4, %v958_v22, %v2124_v56  ;;  %v1031_v63 = vpack.c.bf16 %v2130_v57, %v2125_v55  ;;  %v974_v0 = vsel %vm641_vm5, %v969_v30, %v2129_v58  ;;  %v964_v1 = vsel %vm610_vm4, %v2124_v56, %v2125_v55 }
 0x31f   : > { %v1029_v3 = vpack.c.bf16 %v974_v0, %v963_v62  ;;  %1060 = vmatprep.subr.bf16.mxu0 %v1027_v61  ;;  %v2133_v4 = vpop.permute.xlu0 %2132  ;;  %v2138_v5 = vpop.permute.xlu1 %2137  ;;  %v975_v6 = vsel %vm641_vm5, %v2129_v58, %v2130_v57 }
 0x320   : > { %1061 = vmatpush1.bf16.msra.mxu0 %v1026_v51  ;;  %v2135_v7 = vunpack.i.h.bf16 %v2133_v4  ;;  %v2134_v8 = vunpack.i.l.bf16 %v2133_v4  ;;  %v2140_v9 = vunpack.i.h.bf16 %v2138_v5  ;;  %v2139_v10 = vunpack.i.l.bf16 %v2138_v5  ;;  %1762 = vmatpush3.bf16.msra.mxu1 %v1031_v63 }
 0x321   : > { %v1030_v12 = vpack.c.bf16 %v975_v6, %v964_v1  ;;  %1763 = vmatprep.subr.bf16.mxu1 %v2556_v11  ;;  %v1368_v6 = vld [vmem:[#allocation6] sm:$0x7] }
 0x322   : > { %v988_v13 = vsel %vm672_vm6, %v2099_v60, %v2134_v8  ;;  %v990_v14 = vsel %vm672_vm6, %v2135_v7, %v2100_v59  ;;  %v1002_v15 = vsel %vm703_vm7, %v2104_v2, %v2139_v10  ;;  %v1004_v16 = vsel %vm703_vm7, %v2140_v9, %v2105_v21 }
 0x323   : > { %v1032_v17 = vpack.c.bf16 %v1002_v15, %v988_v13  ;;  %v1034_v18 = vpack.c.bf16 %v1004_v16, %v990_v14  ;;  %1062 = vmatprep.subr.bf16.mxu0 %v1030_v12  ;;  %v2143_v19 = vpop.permute.xlu0 %2142  ;;  %v2148_v20 = vpop.permute.xlu1 %2147  ;;  %v989_v22 = vsel %vm672_vm6, %v2134_v8, %v2135_v7  ;;  %v1003_v26 = vsel %vm703_vm7, %v2139_v10, %v2140_v9  ;;  %v1266_v8 = vld [vmem:[#allocation15] sm:$0xff]  ;;  %v1401_v12 = vld [vmem:[#allocation2] sm:$0x1] }
 0x324   : > { %1063 = vmatpush1.bf16.msra.mxu0 %v1029_v3  ;;  %v2145_v29 = vunpack.i.h.bf16 %v2143_v19  ;;  %v2144_v30 = vunpack.i.l.bf16 %v2143_v19  ;;  %v2150_v36 = vunpack.i.h.bf16 %v2148_v20  ;;  %v2149_v37 = vunpack.i.l.bf16 %v2148_v20 }
 0x325   : > { %v1033_v38 = vpack.c.bf16 %v1003_v26, %v989_v22  ;;  %1764 = vmatpush3.bf16.msra.mxu1 %v1034_v18  ;;  %v1373_v7 = vrot.slane %v1368_v6, %v2992_v33  ;;  %v1377_v9 = vrot.slane %v1368_v6, %v892_v27  ;;  %v1381_v10 = vrot.slane %v1368_v6, %v896_v28 }
 0x326   : > { %v1017_v39 = vsel %vm734_vm8, %v2145_v29, %v2149_v37  ;;  %1765 = vmatprep.subr.bf16.mxu1 %v2556_v11  ;;  %v1016_v31 = vsel %vm734_vm8, %v2144_v30, %v2145_v29  ;;  %v1018_v40 = vsel %vm734_vm8, %v2149_v37, %v2150_v36 }
 0x327   : > { %v1036_v32 = vpack.c.bf16 %v1017_v39, %v1017_v39  ;;  %1064 = vmatprep.subr.bf16.mxu0 %v1033_v38  ;;  %v1035_v34 = vpack.c.bf16 %v1016_v31, %v1016_v31  ;;  %v1037_v41 = vpack.c.bf16 %v1018_v40, %v1018_v40  ;;  %v1145_v46 = vpop.permute.xlu1 %1144 }
 0x328   : > { %1065 = vmatpush1.bf16.msra.mxu0 %v1032_v17 }
 0x329   : > { %1730 = vmatprep.subr.msk.bf16.mxu0 %vm1048_vm10, %v1036_v32  ;;  %v1050_v42 = vsel %vm1048_vm10, %v1035_v34, 0  ;;  %v1056_v35 = vsel %vm1048_vm10, %v1037_v41, 0 }
 0x32a   : > { %1766 = vmatpush3.bf16.msra.mxu1 %v1056_v35 }
 0x32b   : > { %1771 = vmatprep.subr.bf16.mxu1 %v2556_v11  ;;  %v1149_v62 = vpop.permute.xlu1 %1148 }
 0x32c   : > { %1067 = vmatpush1.bf16.msra.mxu0 %v1050_v42 }
 0x32d   : > { %1768 = vmatmul.mubr.msk.bf16.vlgmr.msra.gmra.mrb[4].mxu1 %vm1044_vm11, %v1022_v43 }
 0x32e   : > { %1781 = vmatprep.mubr.msk.bf16.mxu1 %vm2557_vm9, %v2556_v11 }
 0x32f   : > { %1731 = vmatmul.mubr.msk.bf16.vlgmr.msra.gmra.mrb[4].mxu0 %vm1044_vm11, %v1022_v43 }
 0x330   : > { %1316 = vmatprep.mubr.bf16.mxu0 %v2555_v24 }
 0x334   : > { %v1042_v44 = vpop.permute.xlu0 %1041 }
 0x338   : > { %v1147_v45 = vpop.permute.xlu0 %1146 }
 0x339   : > { %v1151_v1 = vsel %vm734_vm8, %v1145_v46, %v1147_v45  ;;  %v1152_v21 = vsel %vm734_vm8, %v1147_v45, %v1149_v62 }
 0x33c   : > { %v1143_v48 = vpop.permute.xlu0 %1142 }
 0x33d   : > { %v1150_v56 = vsel %vm734_vm8, %v1143_v48, %v1145_v46 }
 0x400   : > { %v1133_v47 = vpop.f32.mrb[4].mxu1 }
 0x401   : > { %v1769_v49 = vpop.f32.mrb[5].mxu1  ;;  %v1134_v59 = vadd.f32 %v1133_v47, %v1042_v44 }
 0x402   : > { %v1092_v50 = vpop.f32.mrb[4].mxu0  ;;  %v1136_v51 = vpop.f32.mrb[6].mxu1 }
 0x403   : > { %v1093_v52 = vadd.f32 %v1092_v50, %v1042_v44  ;;  %v1094_v53 = vpop.f32.mrb[5].mxu0  ;;  %v1770_v54 = vpop.f32.mrb[7].mxu1  ;;  %v1141_v63 = vmax.f32 %v1134_v59, 0.0 }
 0x404   : > { %v1096_v55 = vpop.f32.mrb[6].mxu0  ;;  %v1095_v60 = vadd.f32 %v1094_v53, %v1042_v44 }
 0x405   : > { %v1139_v57 = vmax.f32 %v1093_v52, 0.0  ;;  %v1097_v58 = vpop.f32.mrb[7].mxu0  ;;  %v1158_v2 = vmul.f32 %v1152_v21, %v1141_v63 }
 0x406   : > { %v1140_v0 = vmax.f32 %v1095_v60, 0.0 }
 0x407   : > { %v3129_v61 = vmul.f32 %v1150_v56, %v1139_v57 }
 0x408   : > { %v1157_v3 = vmul.f32 %v1151_v1, %v1140_v0 }
 0x409   : > { %1173 = vrot.lane.b32.xlu1 %v3129_v61, %s2548_s21  ;;  %1162 = vrot.lane.b32.xlu0 %v3129_v61, %s2547_s1 }
 0x40a   : > { %v2151_v4 = vpack.i.bf16 %v1158_v2, %v1157_v3  ;;  %v2186_v5 = vpack.i.bf16 %v1157_v3, %v3129_v61 }
 0x40d   : > { %1195 = vrot.lane.b32.xlu1 %v3129_v61, %s2550_s30  ;;  %1184 = vrot.lane.b32.xlu0 %v3129_v61, %s2549_s19 }
 0x411   : > { %1217 = vrot.lane.b32.xlu1 %v3129_v61, %s2552_s29  ;;  %1206 = vrot.lane.b32.xlu0 %v3129_v61, %s2551_s25 }
 0x415   : > { %2152 = vrot.lane.b32.xlu1 %v2151_v4, %s2547_s1  ;;  %1228 = vrot.lane.b32.xlu0 %v3129_v61, %s2553_s27  ;;  %s1552_s1 = sshll.u32 %s479_s11, 4  ;;  %s3205_s1 = int_to_ptr.vmem [resolvable:$true] %s1552_s1 }
 0x419   : > { %2157 = vrot.lane.b32.xlu1 %v2151_v4, %s2548_s21  ;;  %2162 = vrot.lane.b32.xlu0 %v2151_v4, %s2549_s19 }
 0x41d   : > { %2167 = vrot.lane.b32.xlu1 %v2151_v4, %s2550_s30  ;;  %2172 = vrot.lane.b32.xlu0 %v2151_v4, %s2551_s25  ;;  %s3203_s30 = scalar_lea.hbm %s3257_s10, %s1792_s23  ;;  %s1538_s25 = scalar_lea.sflag [#allocation5], %s2913_s14 }
 0x421   : > { %2177 = vrot.lane.b32.xlu1 %v2151_v4, %s2552_s29  ;;  %2182 = vrot.lane.b32.xlu0 %v2151_v4, %s2553_s27  ;;  %s2452_s29 = scalar_lea.vmem %s3205_s1, 48  ;;  %s2456_s27 = sshll.u32 %s2560_s20, 4  ;;  %s2457_s27 = int_to_ptr.vmem [resolvable:$false] %s2456_s27 }
 0x422   : > { %p2453_p12 = scmp.ne.s32.totalorder %s3205_s1, %s2452_s29  ;;  %p2459_p2 = scmp.lt.s32.totalorder %s3205_s1, %s2457_s27 }
 0x424   : > { %p2454_p1 = pnand %p2453_p12, %p3281_p13 }
 0x425   : > { %2187 = vrot.lane.b32.xlu1 %v2186_v5, %s2554_s28  ;;  %1243 = vrot.lane.b32.xlu0 %v1158_v2, %s2554_s28  ;;  %s2458_s28 = scalar_lea.vmem %s2457_s27, 96 }
 0x426   : > { %p2455_p3 = pneg %p2454_p1  ;;  %p2460_p8 = scmp.lt.s32.totalorder %s2458_s28, %s2452_s29 }
 0x428   : > { %p2461_p10 = por %p2460_p8, %p2459_p2 }
 0x429   : > { %1269 = vperm.xlu1 %2191, %v1266_v8   ;;  %1382 = vrot.lane.b32.xlu0 %v1373_v7, %s2558_s13 }
 0x42a   : > { %p2462_p4 = pnand %p2461_p10, %p2455_p3 }
 0x42d   : > { %1384 = vrot.lane.b32.xlu1 %v1377_v9, %s2558_s13  ;;  %1386 = vrot.lane.b32.xlu0 %v1381_v10, %s2558_s13 }
 0x431   : > { %1404 = vperm.xlu1 %2191, %v1401_v12  }
 0x47b   : > { %v1174_v13 = vpop.permute.xlu1 %1173  ;;  %v1163_v14 = vpop.permute.xlu0 %1162 }
 0x47f   : > { %v1196_v15 = vpop.permute.xlu1 %1195  ;;  %v1185_v16 = vpop.permute.xlu0 %1184 }
 0x483   : > { %v1218_v17 = vpop.permute.xlu1 %1217  ;;  %v1207_v18 = vpop.permute.xlu0 %1206 }
 0x487   : > { %v2153_v19 = vpop.permute.xlu1 %2152  ;;  %v1229_v20 = vpop.permute.xlu0 %1228 }
 0x488   : > { %v2155_v22 = vunpack.i.h.bf16 %v2153_v19  ;;  %v2154_v26 = vunpack.i.l.bf16 %v2153_v19 }
 0x48a   : > { %v1253_v27 = vpack.c.bf16 %v2155_v22, %v1158_v2  ;;  %v1168_v29 = vsel %vm517_vm1, %v1163_v14, %v2154_v26  ;;  %v1169_v30 = vsel %vm517_vm1, %v2154_v26, %v2155_v22 }
 0x48b   : > { %v1251_v28 = vpack.c.bf16 %v1168_v29, %v3129_v61  ;;  %v2158_v36 = vpop.permute.xlu1 %2157  ;;  %v2163_v37 = vpop.permute.xlu0 %2162  ;;  %v1252_v38 = vpack.c.bf16 %v1169_v30, %v1157_v3 }
 0x48c   : > { %v2160_v39 = vunpack.i.h.bf16 %v2158_v36  ;;  %v2159_v31 = vunpack.i.l.bf16 %v2158_v36  ;;  %v2165_v40 = vunpack.i.h.bf16 %v2163_v37  ;;  %v2164_v32 = vunpack.i.l.bf16 %v2163_v37  ;;  %1772 = vmatpush3.bf16.msra.mxu1 %v1253_v27 }
 0x48d   : > { %1284 = vmatprep.subr.bf16.mxu0 %v1252_v38  ;;  %1773 = vmatprep.subr.bf16.mxu1 %v2556_v11 }
 0x48e   : > { %v1179_v34 = vsel %vm548_vm2, %v1174_v13, %v2159_v31  ;;  %v1256_v41 = vpack.c.bf16 %v2165_v40, %v2160_v39  ;;  %v1190_v42 = vsel %vm579_vm3, %v1185_v16, %v2164_v32  ;;  %1285 = vmatpush1.bf16.msra.mxu0 %v1251_v28  ;;  %v1180_v35 = vsel %vm548_vm2, %v2159_v31, %v2160_v39 }
 0x48f   : > { %v1254_v43 = vpack.c.bf16 %v1190_v42, %v1179_v34  ;;  %v2168_v44 = vpop.permute.xlu1 %2167  ;;  %v2173_v45 = vpop.permute.xlu0 %2172  ;;  %v1191_v46 = vsel %vm579_vm3, %v2164_v32, %v2165_v40 }
 0x490   : > { %v2170_v47 = vunpack.i.h.bf16 %v2168_v44  ;;  %v2169_v48 = vunpack.i.l.bf16 %v2168_v44  ;;  %v2175_v49 = vunpack.i.h.bf16 %v2173_v45  ;;  %v2174_v50 = vunpack.i.l.bf16 %v2173_v45  ;;  %1774 = vmatpush3.bf16.msra.mxu1 %v1256_v41 }
 0x491   : > { %v1255_v51 = vpack.c.bf16 %v1191_v46, %v1180_v35  ;;  %1775 = vmatprep.subr.bf16.mxu1 %v2556_v11 }
 0x492   : > { %v1201_v52 = vsel %vm610_vm4, %v1196_v15, %v2169_v48  ;;  %v1259_v53 = vpack.c.bf16 %v2175_v49, %v2170_v47  ;;  %v1212_v54 = vsel %vm641_vm5, %v1207_v18, %v2174_v50  ;;  %v1202_v55 = vsel %vm610_vm4, %v2169_v48, %v2170_v47  ;;  %v1250_v18 = vld [vmem:[#allocation14] sm:$0xf]  ;;  %v1397_v48 = vld [vmem:[#allocation17] sm:$0x1] }
 0x493   : > { %v1257_v56 = vpack.c.bf16 %v1212_v54, %v1201_v52  ;;  %1286 = vmatprep.subr.bf16.mxu0 %v1255_v51  ;;  %v2178_v57 = vpop.permute.xlu1 %2177  ;;  %v2183_v58 = vpop.permute.xlu0 %2182  ;;  %v1213_v59 = vsel %vm641_vm5, %v2174_v50, %v2175_v49  ;;  %v2559_v52 = vmov 1966171168  }
 0x494   : > { %1287 = vmatpush1.bf16.msra.mxu0 %v1254_v43  ;;  %v2180_v60 = vunpack.i.h.bf16 %v2178_v57  ;;  %v2179_v61 = vunpack.i.l.bf16 %v2178_v57  ;;  %v2185_v62 = vunpack.i.h.bf16 %v2183_v58  ;;  %v2184_v63 = vunpack.i.l.bf16 %v2183_v58  ;;  %1776 = vmatpush3.bf16.msra.mxu1 %v1259_v53 }
 0x495   : > { %v1258_v0 = vpack.c.bf16 %v1213_v59, %v1202_v55  ;;  %1777 = vmatprep.subr.bf16.mxu1 %v2556_v11  ;;  %v1510_v53 = vunpack.c.l.s4 %v2559_v52 }
 0x496   : > { %v1223_v1 = vsel %vm672_vm6, %v1218_v17, %v2179_v61  ;;  %v1262_v21 = vpack.c.bf16 %v2185_v62, %v2180_v60  ;;  %v1234_v2 = vsel %vm703_vm7, %v1229_v20, %v2184_v63  ;;  %v1224_v3 = vsel %vm672_vm6, %v2179_v61, %v2180_v60 }
 0x497   : > { %v1260_v4 = vpack.c.bf16 %v1234_v2, %v1223_v1  ;;  %1288 = vmatprep.subr.bf16.mxu0 %v1258_v0  ;;  %v2188_v5 = vpop.permute.xlu1 %2187  ;;  %v1244_v6 = vpop.permute.xlu0 %1243  ;;  %v1235_v7 = vsel %vm703_vm7, %v2184_v63, %v2185_v62  ;;  %v1511_v58 = vunpack.c.0.s8 %v1510_v53 }
 0x498   : > { %1289 = vmatpush1.bf16.msra.mxu0 %v1257_v56  ;;  %v2190_v8 = vunpack.i.h.bf16 %v2188_v5  ;;  %v2189_v9 = vunpack.i.l.bf16 %v2188_v5  ;;  %v1265_v10 = vpack.c.bf16 %v1244_v6, %v1244_v6  ;;  %1778 = vmatpush3.bf16.msra.mxu1 %v1262_v21  ;;  %v1261_v12 = vpack.c.bf16 %v1235_v7, %v1224_v3 }
 0x499   : > { %1779 = vmatprep.subr.bf16.mxu1 %v2556_v11  ;;  %v1514_v1 = vsub.s32 %v1511_v58, %v2973_v25 }
 0x49a   : > { %v1246_v13 = vsel %vm734_vm8, %v2190_v8, %v1244_v6  ;;  %1290 = vmatprep.subr.bf16.mxu0 %v1261_v12  ;;  %v1282_v14 = vsel %vm1048_vm10, %v1265_v10, 0  ;;  %v1245_v15 = vsel %vm734_vm8, %v2189_v9, %v2190_v8 }
 0x49b   : > { %v1264_v16 = vpack.c.bf16 %v1246_v13, %v1246_v13  ;;  %v1263_v17 = vpack.c.bf16 %v1245_v15, %v1245_v15  ;;  %v1383_v20 = vpop.permute.xlu0 %1382 }
 0x49c   : > { %1291 = vmatpush1.bf16.msra.mxu0 %v1260_v4  ;;  %1780 = vmatpush3.bf16.msra.mxu1 %v1282_v14 }
 0x49d   : > { %1733 = vmatprep.subr.msk.bf16.mxu0 %vm1048_vm10, %v1264_v16  ;;  %v1276_v19 = vsel %vm1048_vm10, %v1263_v17, 0  ;;  %1785 = vmatprep.subr.bf16.mxu1 %v2556_v11 }
 0x49f   : > { %1782 = vmatmul.mubr.msk.bf16.vlgmr.msra.gmra.mrb[8].mxu1 %vm1044_vm11, %v1250_v18  ;;  %v1387_v30 = vpop.permute.xlu0 %1386 }
 0x4a0   : > { %1293 = vmatpush1.bf16.msra.mxu0 %v1276_v19  ;;  %1787 = vmatprep.mubr.msk.bf16.mxu1 %vm2557_vm9, %v2556_v11 }
 0x4a3   : > { %1734 = vmatmul.mubr.msk.bf16.vlgmr.msra.gmra.mrb[8].mxu0 %vm1044_vm11, %v1250_v18 }
 0x4a4   : > { %1456 = vmatprep.mubr.bf16.mxu0 %v2555_v24 }
 0x4a8   : > { %v1270_v22 = vpop.permute.xlu1 %1269 }
 0x4ac   : > { %v1385_v32 = vpop.permute.xlu1 %1384 }
 0x4ad   : > { %v1390_v42 = vsel %vm1388_vm12, %v1385_v32, %v1387_v30  ;;  %v1389_v43 = vsel %vm1388_vm12, %v1383_v20, %v1385_v32 }
 0x4b0   : > { %v1405_v55 = vpop.permute.xlu1 %1404 }
 0x4b1   : > { %v1410_v60 = vrot.slane %v1405_v55, %v2992_v33 }
 0x572   : > { %v1359_v26 = vpop.f32.mrb[8].mxu1 }
 0x573   : > { %v1360_v27 = vadd.f32 %v1359_v26, %v1270_v22  ;;  %v1783_v29 = vpop.f32.mrb[9].mxu1 }
 0x574   : > { %v1362_v28 = vpop.f32.mrb[10].mxu1 }
 0x575   : > { %v1367_v36 = vmax.f32 %v1360_v27, 0.0  ;;  %v1784_v37 = vpop.f32.mrb[11].mxu1 }
 0x576   : > { %v1318_v38 = vpop.f32.mrb[8].mxu0 }
 0x577   : > { %v1319_v39 = vadd.f32 %v1318_v38, %v1270_v22  ;;  %v1320_v31 = vpop.f32.mrb[9].mxu0  ;;  %v1396_v40 = vmul.f32 %v1387_v30, %v1367_v36 }
 0x578   : > { %v1321_v11 = vadd.f32 %v1320_v31, %v1270_v22  ;;  %v1322_v34 = vpop.f32.mrb[10].mxu0 }
 0x579   : > { %v1365_v41 = vmax.f32 %v1319_v39, 0.0  ;;  %v1400_v24 = vpack.c.bf16 %v1396_v40, %v1396_v40  ;;  %v1323_v35 = vpop.f32.mrb[11].mxu0 }
 0x57a   : > { %v1366_v44 = vmax.f32 %v1321_v11, 0.0 }
 0x57b   : > { %v1394_v45 = vmul.f32 %v1389_v43, %v1365_v41  ;;  %v1422_v46 = vsel %vm1048_vm10, %v1400_v24, 0 }
 0x57c   : > { %v1395_v47 = vmul.f32 %v1390_v42, %v1366_v44  ;;  %1786 = vmatpush3.bf16.msra.mxu1 %v1422_v46 }
 0x57d   : > { %v1398_v49 = vpack.c.bf16 %v1394_v45, %v1394_v45 }
 0x57e   : > { %v1399_v50 = vpack.c.bf16 %v1395_v47, %v1395_v47 }
 0x57f   : > { %v1416_v51 = vsel %vm1048_vm10, %v1398_v49, 0  ;;  %1788 = vmatmul.mubr.msk.bf16.vlgmr.msra.gmra.mrb[12].mxu1 %vm1411_vm13, %v1397_v48 }
 0x580   : > { %1736 = vmatprep.subr.msk.bf16.mxu0 %vm1048_vm10, %v1399_v50 }
 0x581   : > { %1425 = vmatpush1.bf16.msra.mxu0 %v1416_v51 }
 0x584   : > { %1737 = vmatmul.mubr.msk.bf16.vlgmr.msra.gmra.mrb[12].mxu0 %vm1411_vm13, %v1397_v48 }
 0x652   : > { %v1499_v54 = vpop.f32.mrb[12].mxu1 }
 0x653   : > { %v1789_v56 = vpop.f32.mrb[13].mxu1  ;;  %v1500_v0 = vadd.f32 %v1499_v54, %v1410_v60 }
 0x654   : > { %v1502_v57 = vpop.f32.mrb[14].mxu1 }
 0x655   : > { %v1790_v59 = vpop.f32.mrb[15].mxu1  ;;  %v1522_v5 = vrot.slane %v1500_v0, %v1514_v1 }
 0x657   : > { %v1458_v61 = vpop.f32.mrb[12].mxu0 }
 0x658   : > { %v1459_v62 = vadd.f32 %v1458_v61, %v1410_v60  ;;  %v1460_v63 = vpop.f32.mrb[13].mxu0 }
 0x659   : > { %v1461_v21 = vadd.f32 %v1460_v63, %v1410_v60  ;;  %v1462_v2 = vpop.f32.mrb[14].mxu0 }
 0x65a   : > { %v1463_v3 = vpop.f32.mrb[15].mxu0 }
 0x65b   : > { %v1508_v4 = vcombine.low %v1459_v62, %v1461_v21 }
 0x65d   : > { %v1515_v6 = vrot.slane %v1508_v4, %v1514_v1 }
 0x65f   : > { %v1523_v7 = vcombine.low %v1515_v6, %v1522_v5 }
 0x661   : > { %v1530_v33 = vrot.slane %v1523_v7, %v1514_v1 }
 0x663   : > { %1536 = vst.msk [vmem:[%s479_s11] sm:$0x7] %vm1534_vm14, %v1530_v33 }
 0x664   : > { %2465 = shalt.err (!%p2462_p4)
}
 0x665   : > { %s2466_s14 = scalar_lea.hbm %s3203_s30, 48  ;;  %s2470_s23 = scalar_lea.hbm %s3257_s10, 96 }
 0x666   : > { %p2467_p11 = scmp.ne.s32.totalorder %s3203_s30, %s2466_s14  ;;  %p2471_p7 = scmp.lt.u32.totalorder %s3203_s30, %s3257_s10 }
 0x667   : > { %p2472_p6 = scmp.lt.u32.totalorder %s2470_s23, %s2466_s14  ;;  %p2474_p12 = scmp.lt.u32.totalorder %s2466_s14, %s3203_s30 }
 0x668   : > { %p2468_p0 = pnand %p2467_p11, %p3281_p13 }
 0x669   : > { %p2473_p9 = por %p2472_p6, %p2471_p7 }
 0x66a   : > { %p2469_p5 = pneg %p2468_p0 }
 0x66b   : > { %p2475_p1 = por %p2474_p12, %p2473_p9 }
 0x66d   : > { %p2476_p3 = pnand %p2475_p1, %p2469_p5 }
 0x66f   : > { %2479 = shalt.err (!%p2476_p3)
}
 0x670   : > { %1827 = dma.vmem_to_hbm [thread:$0]  (%p3281_p13), %s3205_s1, 48, %s3203_s30, %s1538_s25  }
 0x671 PF: > { %s1564_s19 = sand.u32 1, %s2522_s15   ;;  %p3282_p2 = scmp.ne.s32.totalorder %s3270_s24, 0 }
 0x672   : > { %p3283_p8 = scmp.ge.s32.totalorder %s2534_s18, 2  ;;  %s1565_s29 = scalar_lea.sflag [#allocation5], %s1564_s19 }
 0x674   : > { %p1859_p10 = pnand %p3283_p8, %p3282_p2 }
 0x676   : > { %2517 = dma.done.wait (!%p1859_p10), %s1565_s29, 48  }
 0x677   : > { %2519 = vsyncadd (!%p1859_p10), %s1565_s29, 4294967248  ;;  %p29_p4 = scmp.ge.s32.totalorder %s2834_s26, 4   ;;  %s3284_s15 = smov %s2526_s16 }
 0x678   : > { %s3285_s16 = smov %s2530_s17  ;;  %s3286_s17 = smov %s2845_s12 }
 0x679   : > { %s3287_s18 = smov %s2834_s26  ;;  %31 = sbr.rel (!%p29_p4) target bundleno = 12 (0xc), region = 137 }
 0x680   :  { %1570 = vsyncpa [#allocation4], 1 }
 0x681   :  { %1572 = vsyncpa [#allocation4 + $0x1], 1 }
 0x682   :  { %1573 = vsyncpa [#allocation7], 1 }
 0x683   :  { %1574 = vsyncpa [#allocation10], 1 }
 0x684   :  { %1575 = vsyncpa [#allocation13], 1 }
 0x685   :  { %1576 = vsyncpa [#allocation16], 1 }
 0x686   :  { %1577 = vsyncpa [#allocation5], 1 }
 0x687   :  { %1579 = vsyncpa [#allocation5 + $0x1], 1 }

</bundles_post_ra>
